<compile_context>
chip_gen: v6e
topology: v6e:2x2x1
jax: 0.10.0
libtpu: 0.0.40
codegen_flags: <defaults>
</compile_context>

<pallas_src>
import functools

import jax
import jax.numpy as jnp
from jax.experimental import pallas as pl
from jax.experimental.pallas import tpu as pltpu

# ----------------------------- model configuration -----------------------------
N_NODES = 16          # total atoms in the batch
N_EDGES = 32          # total bonds (directed)
N_GRAPHS = 2          # molecules in the batch
F_NODE = 9            # raw node_attr features
F_EDGE = 6            # raw edge_attr features
F_MOL = 10            # raw mol_attr features
D_NODE = 16           # node embedding  (== AttentiveFP in_channels)
D_EDGE = 8            # edge embedding  (== AttentiveFP edge_dim)
D_MOL = 13            # mol embedding
HID = 32              # AttentiveFP hidden_channels
AFP_OUT = 16          # AttentiveFP out_channels
NUM_LAYERS = 2        # AttentiveFP num_layers
NUM_TIMESTEPS = 2     # AttentiveFP num_timesteps
PRED_HIDDEN = 16      # predictor hidden width
BN_C = AFP_OUT + D_MOL + 3      # = 32, BatchNorm width
BN_EPS = 1e-5


# ----------------------------- static slab layouts -----------------------------
def _rup(x, m):
    return ((x + m - 1) // m) * m


def _layout(entries, row_align=8):
    """entries: list of (name, rows, cols) -> dict name -> (row_offset, rows, cols)."""
    off, r0 = {}, 0
    for name, r, c in entries:
        off[name] = (r0, r, c)
        r0 += _rup(r, row_align)
    return off, _rup(r0, row_align)


def _weight_entries():
    ents = []
    e = lambda name, r, c: ents.append((name, r, c))
    e("emb_node.wt", F_NODE, D_NODE); e("emb_node.b", 1, D_NODE)
    e("emb_edge.wt", F_EDGE, D_EDGE); e("emb_edge.b", 1, D_EDGE)
    e("emb_mol.wt", F_MOL, D_MOL);    e("emb_mol.b", 1, D_MOL)
    e("afp.lin1.wt", D_NODE, HID);    e("afp.lin1.b", 1, HID)
    e("afp.gate.w1x_t", HID, HID)
    e("afp.gate.w1e_t", D_EDGE, HID)
    e("afp.gate.att_lr", 2 * HID, 1)
    e("afp.gate.w2_t", HID, HID)
    e("afp.gate.bias", 1, HID)

    def gru(p):
        e(p + ".wih_t", HID, 3 * HID); e(p + ".whh_t", HID, 3 * HID)
        e(p + ".bih", 1, 3 * HID);     e(p + ".bhh", 1, 3 * HID)

    def gat(p):
        e(p + ".w_t", HID, HID); e(p + ".att_sd", HID, 2); e(p + ".bias", 1, HID)

    gru("afp.gru0")
    for li in range(NUM_LAYERS - 1):
        gat("afp.layer%d.conv" % li)
        gru("afp.layer%d.gru" % li)
    gat("afp.mol_conv")
    gru("afp.mol_gru")
    e("afp.lin2.wt", HID, AFP_OUT); e("afp.lin2.b", 1, AFP_OUT)
    e("bn.scale_afp", 1, AFP_OUT);  e("bn.shift_afp", 1, AFP_OUT)
    e("bn.scale_mol", 1, D_MOL);    e("bn.shift_mol", 1, D_MOL)
    e("bn.scale_cnt", 1, 3);        e("bn.shift_cnt", 1, 3)
    e("pred0.wt_afp", AFP_OUT, PRED_HIDDEN)
    e("pred0.wt_mol", D_MOL, PRED_HIDDEN)
    e("pred0.wt_cnt", 3, PRED_HIDDEN)
    e("pred0.b", 1, PRED_HIDDEN)
    e("pred1.wt", PRED_HIDDEN, 1);  e("pred1.b", 1, 1)
    return ents


def _data_entries():
    return [("x", N_NODES, F_NODE),
            ("edge_attr", N_EDGES, F_EDGE),
            ("mol_attr", N_GRAPHS, F_MOL),
            ("cntns", N_GRAPHS, 3)]


_W_OFF, _W_ROWS = _layout(_weight_entries())
_W_COLS = 128
_D_OFF, _D_ROWS = _layout(_data_entries())
_D_COLS = 16


# ----------------------------- shared activation helper -----------------------------
def _act(y, act):
    if act == "relu":
        return jnp.maximum(y, 0.0)
    if act == "leaky_relu":                       # negative_slope = 0.01 (PyTorch / AttentiveFP)
        return jnp.where(y > 0, y, 0.01 * y)
    if act == "elu":                              # alpha = 1.0
        return jnp.where(y > 0, y, jnp.exp(jnp.minimum(y, 0.0)) - 1.0)
    return y


# ----------------------------- fused forward kernel -----------------------------
def _artnet_kernel(w_ref, d_ref, ic_ref, ir_ref, o_ref, *, w_off, d_off,
                   num_atom_layers, num_timesteps, n_nodes, n_edges, n_graphs):
    f32 = jnp.float32
    N, E, G = n_nodes, n_edges, n_graphs
    dot = lambda a, b: jnp.dot(a, b, preferred_element_type=f32)

    def W(name):                                  # static slice out of the single weight slab
        r0, r, c = w_off[name]
        return w_ref[r0:r0 + r, 0:c]

    def D(name):                                  # static slice out of the single data slab
        r0, r, c = d_off[name]
        return d_ref[r0:r0 + r, 0:c]

    def lin(x, p, act="none"):
        return _act(dot(x, W(p + ".wt")) + W(p + ".b"), act)

    def gru_relu(inp, hx, p):
        # torch.nn.GRUCell (gate order r, z, n) followed by .relu_() as in AttentiveFP.
        # Two packed matmuls; a single fused [inp|hx] matmul is not equivalent because
        # the n-gate needs r * (hx @ W_hn^T + b_hn) separately.
        H = hx.shape[1]
        gi = dot(inp, W(p + ".wih_t")) + W(p + ".bih")      # [*, 3H]
        gh = dot(hx, W(p + ".whh_t")) + W(p + ".bhh")       # [*, 3H]
        r = jax.nn.sigmoid(gi[:, :H] + gh[:, :H])
        z = jax.nn.sigmoid(gi[:, H:2 * H] + gh[:, H:2 * H])
        n = jnp.tanh(gi[:, 2 * H:] + r * gh[:, 2 * H:])
        return jnp.maximum((1.0 - z) * n + z * hx, 0.0)

    def grouped_softmax(alpha, oh_eg, oh_ge):
        # Exact per-destination softmax.  alpha: [R,1]; oh_eg: [R,G] one-hot membership;
        # oh_ge == oh_eg.T.  Every row's group contains the row itself, so den > 0.
        # Segment max stays a masked max; the segment sums ride the MXU as matmuls.
        neg = jnp.float32(-1e30)
        m_g = jnp.max(jnp.where(oh_eg > 0, alpha, neg), axis=0, keepdims=True)   # [1,G]
        m_e = jnp.sum(oh_eg * m_g, axis=1, keepdims=True)                        # [R,1]
        ex = jnp.exp(alpha - m_e)
        den_g = dot(oh_ge, ex)                                                    # [G,1] (MXU)
        den_e = dot(oh_eg, den_g)                                                 # [R,1] (MXU)
        return ex / den_e

    # ---- one-hot gather/scatter masks built in-kernel from the int32 index operands ----
    iota_en = jax.lax.broadcasted_iota(jnp.int32, (E, N), 1)
    ssrc = (iota_en == ic_ref[:, 0:1]).astype(f32)                  # [E,N] gathers x[src]
    sdst = (iota_en == ic_ref[:, 1:2]).astype(f32)                  # [E,N] gathers x[dst]
    sdst2 = (jax.lax.broadcasted_iota(jnp.int32, (N, G), 1)
             == ic_ref[0:N, 2:3]).astype(f32)                       # [N,G] gathers out[batch]
    mdst = (jax.lax.broadcasted_iota(jnp.int32, (N, E), 0)
            == ir_ref[0:1, :]).astype(f32)                          # [N,E] scatter-add by dst
    pool = (jax.lax.broadcasted_iota(jnp.int32, (G, N), 0)
            == ir_ref[1:2, 0:N]).astype(f32)                        # [G,N] pool / scatter by graph

    # ---- embedding layers ----
    x0 = lin(D("x"), "emb_node", "relu")                            # [N, D_NODE]
    ea = lin(D("edge_attr"), "emb_edge", "relu")                    # [E, D_EDGE]

    # ---- AttentiveFP: atom embedding ----
    x = lin(x0, "afp.lin1", "leaky_relu")                           # [N, HID]

    # GATEConv (aggr='add') fused with trailing F.elu_.  w1 pre-split so that
    # dot(x_j,w1x)+dot(ea,w1e) == concat([x_j,ea]) @ w1.T; att_l/att_r packed into one
    # [2H,1] column applied to concat([t, x_i]) -> a single attention matmul.
    x_j = dot(ssrc, x)                                              # x[src]  [E, HID]
    x_i = dot(sdst, x)                                              # x[dst]  [E, HID]
    t = _act(dot(x_j, W("afp.gate.w1x_t")) + dot(ea, W("afp.gate.w1e_t")), "leaky_relu")
    alpha = dot(jnp.concatenate([t, x_i], axis=1), W("afp.gate.att_lr"))        # [E,1]
    wts = grouped_softmax(_act(alpha, "leaky_relu"), sdst, mdst)
    h = dot(mdst, wts * dot(x_j, W("afp.gate.w2_t"))) + W("afp.gate.bias")
    x = gru_relu(_act(h, "elu"), x, "afp.gru0")

    # GATConv atom layers (heads=1, add_self_loops=False), unrolled.
    # att_src/att_dst packed to a [HID,2] block -> one attention matmul per layer.
    for li in range(num_atom_layers):
        p = "afp.layer%d" % li
        hs = dot(x, W(p + ".conv.w_t"))                             # lin(x)  [N, HID]
        asd = dot(hs, W(p + ".conv.att_sd"))                        # [N, 2]  (src|dst columns)
        alpha = _act(dot(ssrc, asd[:, 0:1]) + dot(sdst, asd[:, 1:2]), "leaky_relu")  # [E,1]
        wts = grouped_softmax(alpha, sdst, mdst)
        h = _act(dot(mdst, wts * dot(ssrc, hs)) + W(p + ".conv.bias"), "elu")
        x = gru_relu(h, x, p + ".gru")

    # ---- AttentiveFP: molecule embedding ----
    out = jnp.maximum(dot(pool, x), 0.0)                            # global_add_pool().relu_()
    for _ in range(num_timesteps):
        hs = dot(x, W("afp.mol_conv.w_t"))                          # [N, HID]
        hd = dot(out, W("afp.mol_conv.w_t"))                        # [G, HID]
        a_src = dot(hs, W("afp.mol_conv.att_sd"))[:, 0:1]           # [N,1]
        a_dst = dot(hd, W("afp.mol_conv.att_sd"))[:, 1:2]           # [G,1]
        alpha = _act(a_src + dot(sdst2, a_dst), "leaky_relu")       # [N,1]  (src = arange(N))
        wts = grouped_softmax(alpha, sdst2, pool)
        h = _act(dot(pool, wts * hs) + W("afp.mol_conv.bias"), "elu")
        out = gru_relu(h, out, "afp.mol_gru")
    afp_out = lin(out, "afp.lin2")                                  # [G, AFP_OUT]

    # ---- mol_attr embedding + BatchNorm(eval) + predictor MLP ----
    # BN scale/shift and pred0 weight rows are pre-split per feature chunk so the
    # reference concat([afp, mol, cntns]) folds into three matmul contributions.
    h_mol = lin(D("mol_attr"), "emb_mol", "relu")                   # [G, D_MOL]
    cnt = D("cntns")                                                # [G, 3]
    h0 = (dot(afp_out * W("bn.scale_afp") + W("bn.shift_afp"), W("pred0.wt_afp"))
          + dot(h_mol * W("bn.scale_mol") + W("bn.shift_mol"), W("pred0.wt_mol"))
          + dot(cnt * W("bn.scale_cnt") + W("bn.shift_cnt"), W("pred0.wt_cnt"))
          + W("pred0.b"))
    h0 = jnp.maximum(h0, 0.0)
    o_ref[...] = dot(h0, W("pred1.wt")) + W("pred1.b")


# ----------------------------- parameter packing (one-time, outside the hot path) ----
def pack_params(params):
    """Transpose / split / fold every parameter once and write it into ONE f32 slab."""
    vals = {}

    def put(name, arr):
        arr = jnp.asarray(arr, jnp.float32)
        if arr.ndim == 1:
            arr = arr.reshape(1, -1)
        vals[name] = arr

    def lin(prefix, w, b):
        put(prefix + ".wt", jnp.asarray(w, jnp.float32).T)
        put(prefix + ".b", b)

    def gru(prefix, gp):
        put(prefix + ".wih_t", gp["w_ih"].T)       # [H_in, 3H], torch gate order r,z,n preserved
        put(prefix + ".whh_t", gp["w_hh"].T)       # [H,   3H]
        put(prefix + ".bih", gp["b_ih"])
        put(prefix + ".bhh", gp["b_hh"])

    def gat(prefix, cp):
        put(prefix + ".w_t", cp["w"].T)
        put(prefix + ".att_sd", jnp.stack([cp["att_src"], cp["att_dst"]], axis=1))  # [HID,2]
        put(prefix + ".bias", cp["bias"])

    lin("emb_node", params["emb_node_w"], params["emb_node_b"])
    lin("emb_edge", params["emb_edge_w"], params["emb_edge_b"])
    lin("emb_mol", params["emb_mol_w"], params["emb_mol_b"])

    afp = params["afp"]
    lin("afp.lin1", afp["lin1_w"], afp["lin1_b"])
    g = afp["gate"]
    put("afp.gate.w1x_t", g["w1"][:, :HID].T)      # split of the fused [H, H+edge_dim] weight
    put("afp.gate.w1e_t", g["w1"][:, HID:].T)
    put("afp.gate.att_lr", jnp.concatenate([g["att_l"], g["att_r"]]).reshape(-1, 1))  # [2H,1]
    put("afp.gate.w2_t", g["w2"].T)
    put("afp.gate.bias", g["bias"])
    gru("afp.gru0", afp["gru0"])
    for li, lp in enumerate(afp["atom_layers"]):
        gat("afp.layer%d.conv" % li, lp["conv"])
        gru("afp.layer%d.gru" % li, lp["gru"])
    gat("afp.mol_conv", afp["mol_conv"])
    gru("afp.mol_gru", afp["mol_gru"])
    lin("afp.lin2", afp["lin2_w"], afp["lin2_b"])

    bn = params["bn"]
    scale = bn["gamma"] * jax.lax.rsqrt(bn["var"] + BN_EPS)
    shift = bn["beta"] - bn["mean"] * scale
    c0, c1 = AFP_OUT, AFP_OUT + D_MOL
    w0t = jnp.asarray(params["pred0_w"], jnp.float32).T          # [BN_C, PRED_HIDDEN]
    put("bn.scale_afp", scale[:c0]); put("bn.shift_afp", shift[:c0])
    put("bn.scale_mol", scale[c0:c1]); put("bn.shift_mol", shift[c0:c1])
    put("bn.scale_cnt", scale[c1:]); put("bn.shift_cnt", shift[c1:])
    put("pred0.wt_afp", w0t[:c0, :])
    put("pred0.wt_mol", w0t[c0:c1, :])
    put("pred0.wt_cnt", w0t[c1:, :])
    put("pred0.b", params["pred0_b"])
    lin("pred1", params["pred1_w"], params["pred1_b"])

    slab = jnp.zeros((_W_ROWS, _W_COLS), jnp.float32)
    for name, (r0, r, c) in _W_OFF.items():
        arr = vals[name]
        assert arr.shape == (r, c), (name, arr.shape, (r, c))
        slab = slab.at[r0:r0 + r, :c].set(arr)
    return slab


# ----------------------------- fused forward wrapper -----------------------------
def artnet_forward_pallas(w_slab, data):
    N = data["x"].shape[0]
    E = data["edge_attr"].shape[0]
    G = data["mol_attr"].shape[0]
    src = data["edge_index"][0].astype(jnp.int32)
    dst = data["edge_index"][1].astype(jnp.int32)
    batch = data["batch"].astype(jnp.int32)

    # one small f32 data slab ...
    d_slab = jnp.zeros((_D_ROWS, _D_COLS), jnp.float32)

    def put(slab, name, arr):
        r0, r, c = _D_OFF[name]
        return slab.at[r0:r0 + r, :c].set(jnp.asarray(arr, jnp.float32))

    d_slab = put(d_slab, "x", data["x"])
    d_slab = put(d_slab, "edge_attr", data["edge_attr"])
    d_slab = put(d_slab, "mol_attr", data["mol_attr"].reshape(G, -1))
    d_slab = put(d_slab, "cntns",
                 jnp.stack([data["mlogP"], data["volumn"], data["wt"]], axis=1))

    # ... plus two tiny int32 index operands (column- and row-oriented), padding = -1
    # so padded entries never match any iota value.
    idx_col = jnp.full((E, 8), -1, jnp.int32)
    idx_col = idx_col.at[:, 0].set(src).at[:, 1].set(dst).at[:N, 2].set(batch)
    idx_row = jnp.full((8, E), -1, jnp.int32)
    idx_row = idx_row.at[0, :].set(dst).at[1, :N].set(batch)

    kernel = functools.partial(
        _artnet_kernel, w_off=_W_OFF, d_off=_D_OFF,
        num_atom_layers=NUM_LAYERS - 1, num_timesteps=NUM_TIMESTEPS,
        n_nodes=N, n_edges=E, n_graphs=G)

    vmem = pltpu.MemorySpace.VMEM
    # Grid-less single invocation: whole arrays live in VMEM, no pipelining machinery,
    # no double buffering, 4 input DMAs total.
    # TODO(synk): when batching many molecule batches per call (needed to fill the MXU /
    #             use v7x's second TensorCore), add a leading 'parallel' grid axis and
    #             re-tile the O(E*N) one-hot design with PrefetchScalarGridSpec gathers.
    return pl.pallas_call(
        kernel,
        out_shape=jax.ShapeDtypeStruct((G, 1), jnp.float32),
        in_specs=[pl.BlockSpec(memory_space=vmem)] * 4,
        out_specs=pl.BlockSpec(memory_space=vmem),
    )(w_slab, d_slab, idx_col, idx_row)


# ----------------------------- pure-JAX reference (gather / segment ops) -----------------------------
def _seg_softmax(a, seg, n):
    m = jax.ops.segment_max(a, seg, num_segments=n)
    m = jnp.where(jnp.isfinite(m), m, 0.0)
    ex = jnp.exp(a - m[seg])
    den = jax.ops.segment_sum(ex, seg, num_segments=n)
    return ex / den[seg]


def _gru_ref(inp, hx, gp):
    H = hx.shape[1]
    gi = inp @ gp["w_ih"].T + gp["b_ih"]
    gh = hx @ gp["w_hh"].T + gp["b_hh"]
    r = jax.nn.sigmoid(gi[:, :H] + gh[:, :H])
    z = jax.nn.sigmoid(gi[:, H:2 * H] + gh[:, H:2 * H])
    n = jnp.tanh(gi[:, 2 * H:] + r * gh[:, 2 * H:])
    return jnp.maximum((1.0 - z) * n + z * hx, 0.0)


def ref_attentive_fp(p, x, edge_index, edge_attr, batch, num_graphs):
    N = x.shape[0]
    src, dst = edge_index[0], edge_index[1]
    x = _act(x @ p["lin1_w"].T + p["lin1_b"], "leaky_relu")

    gp = p["gate"]
    x_j, x_i = x[src], x[dst]
    t = _act(jnp.concatenate([x_j, edge_attr], axis=1) @ gp["w1"].T, "leaky_relu")
    alpha = _act((t * gp["att_l"]).sum(1) + (x_i * gp["att_r"]).sum(1), "leaky_relu")
    alpha = _seg_softmax(alpha, dst, N)
    h = jax.ops.segment_sum((x_j @ gp["w2"].T) * alpha[:, None], dst, num_segments=N) + gp["bias"]
    x = _gru_ref(_act(h, "elu"), x, p["gru0"])

    for lp in p["atom_layers"]:
        cp = lp["conv"]
        hs = x @ cp["w"].T
        a = _act((hs * cp["att_src"]).sum(1)[src] + (hs * cp["att_dst"]).sum(1)[dst], "leaky_relu")
        a = _seg_softmax(a, dst, N)
        h = _act(jax.ops.segment_sum(hs[src] * a[:, None], dst, num_segments=N) + cp["bias"], "elu")
        x = _gru_ref(h, x, lp["gru"])

    out = _act(jax.ops.segment_sum(x, batch, num_segments=num_graphs), "relu")
    src2, dst2 = jnp.arange(N), batch
    cp = p["mol_conv"]
    for _ in range(NUM_TIMESTEPS):
        hs = x @ cp["w"].T
        hd = out @ cp["w"].T
        a = _act((hs * cp["att_src"]).sum(1)[src2] + (hd * cp["att_dst"]).sum(1)[dst2], "leaky_relu")
        a = _seg_softmax(a, dst2, num_graphs)
        h = _act(jax.ops.segment_sum(hs[src2] * a[:, None], dst2, num_segments=num_graphs)
                 + cp["bias"], "elu")
        out = _gru_ref(h, out, p["mol_gru"])
    return out @ p["lin2_w"].T + p["lin2_b"]


def ref_artnet(params, data):
    G = data["mol_attr"].shape[0]
    lin = lambda x, w, b, act="none": _act(x @ w.T + b, act)
    h_node = lin(data["x"], params["emb_node_w"], params["emb_node_b"], "relu")
    h_edge = lin(data["edge_attr"], params["emb_edge_w"], params["emb_edge_b"], "relu")
    afp = ref_attentive_fp(params["afp"], h_node, data["edge_index"], h_edge, data["batch"], G)
    h_mol = lin(data["mol_attr"].reshape(G, -1), params["emb_mol_w"], params["emb_mol_b"], "relu")
    cntns = jnp.stack([data["mlogP"], data["volumn"], data["wt"]], axis=1)
    f = jnp.concatenate([afp, h_mol, cntns], axis=1)
    bn = params["bn"]
    f = (f - bn["mean"]) * jax.lax.rsqrt(bn["var"] + BN_EPS) * bn["gamma"] + bn["beta"]
    h = lin(f, params["pred0_w"], params["pred0_b"], "relu")
    return lin(h, params["pred1_w"], params["pred1_b"])


# ----------------------------- deterministic parameter init -----------------------------
def _glorot(key, shape):
    fan_out, fan_in = shape
    std = (2.0 / (fan_in + fan_out)) ** 0.5
    return std * jax.random.normal(key, shape, dtype=jnp.float32)


def init_params(key):
    keys = iter(jax.random.split(key, 64))
    nk = lambda: next(keys)

    def gru_params():
        return dict(w_ih=_glorot(nk(), (3 * HID, HID)), w_hh=_glorot(nk(), (3 * HID, HID)),
                    b_ih=0.1 * jax.random.normal(nk(), (3 * HID,), dtype=jnp.float32),
                    b_hh=0.1 * jax.random.normal(nk(), (3 * HID,), dtype=jnp.float32))

    def gat_params():
        return dict(w=_glorot(nk(), (HID, HID)),
                    att_src=0.2 * jax.random.normal(nk(), (HID,), dtype=jnp.float32),
                    att_dst=0.2 * jax.random.normal(nk(), (HID,), dtype=jnp.float32),
                    bias=jnp.zeros((HID,), jnp.float32))

    afp = dict(
        lin1_w=_glorot(nk(), (HID, D_NODE)), lin1_b=jnp.zeros((HID,), jnp.float32),
        gate=dict(w1=_glorot(nk(), (HID, HID + D_EDGE)),
                  att_l=0.2 * jax.random.normal(nk(), (HID,), dtype=jnp.float32),
                  att_r=0.2 * jax.random.normal(nk(), (HID,), dtype=jnp.float32),
                  w2=_glorot(nk(), (HID, HID)),
                  bias=jnp.zeros((HID,), jnp.float32)),
        gru0=gru_params(),
        atom_layers=[dict(conv=gat_params(), gru=gru_params()) for _ in range(NUM_LAYERS - 1)],
        mol_conv=gat_params(),
        mol_gru=gru_params(),
        lin2_w=_glorot(nk(), (AFP_OUT, HID)), lin2_b=jnp.zeros((AFP_OUT,), jnp.float32),
    )
    return dict(
        emb_node_w=_glorot(nk(), (D_NODE, F_NODE)), emb_node_b=jnp.full((D_NODE,), 0.01, jnp.float32),
        emb_edge_w=_glorot(nk(), (D_EDGE, F_EDGE)), emb_edge_b=jnp.full((D_EDGE,), 0.01, jnp.float32),
        emb_mol_w=_glorot(nk(), (D_MOL, F_MOL)), emb_mol_b=jnp.full((D_MOL,), 0.01, jnp.float32),
        afp=afp,
        bn=dict(gamma=1.0 + 0.1 * jax.random.normal(nk(), (BN_C,), dtype=jnp.float32),
                beta=0.1 * jax.random.normal(nk(), (BN_C,), dtype=jnp.float32),
                mean=0.1 * jax.random.normal(nk(), (BN_C,), dtype=jnp.float32),
                var=1.0 + 0.1 * jnp.abs(jax.random.normal(nk(), (BN_C,), dtype=jnp.float32))),
        pred0_w=_glorot(nk(), (PRED_HIDDEN, BN_C)), pred0_b=jnp.full((PRED_HIDDEN,), 0.01, jnp.float32),
        pred1_w=_glorot(nk(), (1, PRED_HIDDEN)), pred1_b=jnp.full((1,), 0.01, jnp.float32),
    )


def make_graph(key):
    npg = N_NODES // N_GRAPHS
    extra = (N_EDGES - N_NODES) // N_GRAPHS
    srcs, dsts = [], []
    for g in range(N_GRAPHS):
        off = g * npg
        for i in range(npg):                      # ring: every node gets an incoming edge
            srcs.append(off + i)
            dsts.append(off + (i + 1) % npg)
        k1, k2, key = jax.random.split(key, 3)
        es = jax.random.randint(k1, (extra,), 0, npg).tolist()
        ed = jax.random.randint(k2, (extra,), 0, npg).tolist()
        for a, b in zip(es, ed):
            srcs.append(off + int(a))
            dsts.append(off + int(b))
    edge_index = jnp.array([srcs, dsts], dtype=jnp.int32)
    batch = jnp.array(sum([[g] * npg for g in range(N_GRAPHS)], []), dtype=jnp.int32)
    return edge_index, batch


# ----------------------------- main -----------------------------
if __name__ == "__main__":
    key = jax.random.PRNGKey(0)
    k_param, k_data, k_graph = jax.random.split(key, 3)
    params = init_params(k_param)
    edge_index, batch = make_graph(k_graph)
    dk = jax.random.split(k_data, 6)
    data = dict(
        x=jax.random.normal(dk[0], (N_NODES, F_NODE), dtype=jnp.float32),
        edge_attr=jax.random.normal(dk[1], (N_EDGES, F_EDGE), dtype=jnp.float32),
        edge_index=edge_index,
        batch=batch,
        mol_attr=jax.random.normal(dk[2], (N_GRAPHS, F_MOL), dtype=jnp.float32),
        mlogP=jax.random.normal(dk[3], (N_GRAPHS,), dtype=jnp.float32),
        volumn=jax.random.normal(dk[4], (N_GRAPHS,), dtype=jnp.float32),
        wt=jax.random.normal(dk[5], (N_GRAPHS,), dtype=jnp.float32),
    )

    w_slab = pack_params(params)                  # one-time weight slab packing, outside jit
    fwd = jax.jit(artnet_forward_pallas)
    y = fwd(w_slab, data)
    y = jax.block_until_ready(y)

    y_ref = ref_artnet(params, data)
    assert y.shape == (N_GRAPHS, 1), y.shape
    assert bool(jnp.all(jnp.isfinite(y)))
    err = float(jnp.max(jnp.abs(y - y_ref)))
    if err > 1e-3:
        raise AssertionError(f"Pallas output mismatch vs pure-JAX reference: max abs err = {err}")
    print("KERNEL_OK")
</pallas_src>

<mosaic_0001>
module attributes {stable_mosaic.version = 11 : i64} {
  func.func @_artnet_kernel(%arg0: memref<776x128xf32, #tpu.memory_space<vmem>>, %arg1: memref<64x16xf32, #tpu.memory_space<vmem>>, %arg2: memref<32x8xi32, #tpu.memory_space<vmem>>, %arg3: memref<8x32xi32, #tpu.memory_space<vmem>>, %arg4: memref<2x1xf32, #tpu.memory_space<vmem>>) attributes {dimension_semantics = [], scalar_prefetch = 0 : i64, scratch_operands = 0 : i64, tpu.core_type = #tpu.core_type<tc>} {
    %0 = tpu.iota {dimensions = array<i32: 1>} : vector<32x16xi32>
    %c0 = arith.constant 0 : index
    %c0_0 = arith.constant 0 : index
    %1 = vector.load %arg2[%c0, %c0_0] : memref<32x8xi32, #tpu.memory_space<vmem>>, vector<32x1xi32>
    %2 = vector.broadcast %1 : vector<32x1xi32> to vector<32x16xi32>
    %3 = arith.cmpi eq, %0, %2 : vector<32x16xi32>
    %4 = arith.extui %3 : vector<32x16xi1> to vector<32x16xi32>
    %5 = arith.sitofp %4 : vector<32x16xi32> to vector<32x16xf32>
    %c0_1 = arith.constant 0 : index
    %c1 = arith.constant 1 : index
    %6 = vector.load %arg2[%c0_1, %c1] : memref<32x8xi32, #tpu.memory_space<vmem>>, vector<32x1xi32>
    %7 = vector.broadcast %6 : vector<32x1xi32> to vector<32x16xi32>
    %8 = arith.cmpi eq, %0, %7 : vector<32x16xi32>
    %9 = arith.extui %8 : vector<32x16xi1> to vector<32x16xi32>
    %10 = arith.sitofp %9 : vector<32x16xi32> to vector<32x16xf32>
    %11 = tpu.iota {dimensions = array<i32: 1>} : vector<16x2xi32>
    %c0_2 = arith.constant 0 : index
    %c2 = arith.constant 2 : index
    %12 = vector.load %arg2[%c0_2, %c2] : memref<32x8xi32, #tpu.memory_space<vmem>>, vector<16x1xi32>
    %13 = vector.broadcast %12 : vector<16x1xi32> to vector<16x2xi32>
    %14 = arith.cmpi eq, %11, %13 : vector<16x2xi32>
    %15 = arith.extui %14 : vector<16x2xi1> to vector<16x2xi32>
    %16 = arith.sitofp %15 : vector<16x2xi32> to vector<16x2xf32>
    %17 = tpu.iota {dimensions = array<i32: 0>} : vector<16x32xi32>
    %c0_3 = arith.constant 0 : index
    %c0_4 = arith.constant 0 : index
    %18 = vector.load %arg3[%c0_3, %c0_4] : memref<8x32xi32, #tpu.memory_space<vmem>>, vector<1x32xi32>
    %19 = vector.broadcast %18 : vector<1x32xi32> to vector<16x32xi32>
    %20 = arith.cmpi eq, %17, %19 : vector<16x32xi32>
    %21 = arith.extui %20 : vector<16x32xi1> to vector<16x32xi32>
    %22 = arith.sitofp %21 : vector<16x32xi32> to vector<16x32xf32>
    %23 = tpu.iota {dimensions = array<i32: 0>} : vector<2x16xi32>
    %c1_5 = arith.constant 1 : index
    %c0_6 = arith.constant 0 : index
    %24 = vector.load %arg3[%c1_5, %c0_6] : memref<8x32xi32, #tpu.memory_space<vmem>>, vector<1x16xi32>
    %25 = vector.broadcast %24 : vector<1x16xi32> to vector<2x16xi32>
    %26 = arith.cmpi eq, %23, %25 : vector<2x16xi32>
    %27 = arith.extui %26 : vector<2x16xi1> to vector<2x16xi32>
    %28 = arith.sitofp %27 : vector<2x16xi32> to vector<2x16xf32>
    %c0_7 = arith.constant 0 : index
    %c0_8 = arith.constant 0 : index
    %29 = vector.load %arg1[%c0_7, %c0_8] : memref<64x16xf32, #tpu.memory_space<vmem>>, vector<16x9xf32>
    %c0_9 = arith.constant 0 : index
    %c0_10 = arith.constant 0 : index
    %30 = vector.load %arg0[%c0_9, %c0_10] : memref<776x128xf32, #tpu.memory_space<vmem>>, vector<9x16xf32>
    %cst = arith.constant dense<0.000000e+00> : vector<16x16xf32>
    %31 = tpu.matmul %29, %30, %cst {dimension_numbers = #tpu.dot_dimension_numbers<[1], [0], [0], [1], [0, 0, 1, 1], [], []>} : vector<16x9xf32>, vector<9x16xf32>, vector<16x16xf32> -> vector<16x16xf32>
    %c16 = arith.constant 16 : index
    %c0_11 = arith.constant 0 : index
    %32 = vector.load %arg0[%c16, %c0_11] : memref<776x128xf32, #tpu.memory_space<vmem>>, vector<1x16xf32>
    %33 = vector.broadcast %32 : vector<1x16xf32> to vector<16x16xf32>
    %34 = arith.addf %31, %33 : vector<16x16xf32>
    %cst_12 = arith.constant 0.000000e+00 : f32
    %35 = vector.broadcast %cst_12 : f32 to vector<16x16xf32>
    %36 = arith.maximumf %34, %35 : vector<16x16xf32>
    %c16_13 = arith.constant 16 : index
    %c0_14 = arith.constant 0 : index
    %37 = vector.load %arg1[%c16_13, %c0_14] : memref<64x16xf32, #tpu.memory_space<vmem>>, vector<32x6xf32>
    %c24 = arith.constant 24 : index
    %c0_15 = arith.constant 0 : index
    %38 = vector.load %arg0[%c24, %c0_15] : memref<776x128xf32, #tpu.memory_space<vmem>>, vector<6x8xf32>
    %cst_16 = arith.constant dense<0.000000e+00> : vector<32x8xf32>
    %39 = tpu.matmul %37, %38, %cst_16 {dimension_numbers = #tpu.dot_dimension_numbers<[1], [0], [0], [1], [0, 0, 1, 1], [], []>} : vector<32x6xf32>, vector<6x8xf32>, vector<32x8xf32> -> vector<32x8xf32>
    %c32 = arith.constant 32 : index
    %c0_17 = arith.constant 0 : index
    %40 = vector.load %arg0[%c32, %c0_17] : memref<776x128xf32, #tpu.memory_space<vmem>>, vector<1x8xf32>
    %41 = vector.broadcast %40 : vector<1x8xf32> to vector<32x8xf32>
    %42 = arith.addf %39, %41 : vector<32x8xf32>
    %cst_18 = arith.constant 0.000000e+00 : f32
    %43 = vector.broadcast %cst_18 : f32 to vector<32x8xf32>
    %44 = arith.maximumf %42, %43 : vector<32x8xf32>
    %c64 = arith.constant 64 : index
    %c0_19 = arith.constant 0 : index
    %45 = vector.load %arg0[%c64, %c0_19] : memref<776x128xf32, #tpu.memory_space<vmem>>, vector<16x32xf32>
    %cst_20 = arith.constant dense<0.000000e+00> : vector<16x32xf32>
    %46 = tpu.matmul %36, %45, %cst_20 {dimension_numbers = #tpu.dot_dimension_numbers<[1], [0], [0], [1], [0, 0, 1, 1], [], []>} : vector<16x16xf32>, vector<16x32xf32>, vector<16x32xf32> -> vector<16x32xf32>
    %c80 = arith.constant 80 : index
    %c0_21 = arith.constant 0 : index
    %47 = vector.load %arg0[%c80, %c0_21] : memref<776x128xf32, #tpu.memory_space<vmem>>, vector<1x32xf32>
    %48 = vector.broadcast %47 : vector<1x32xf32> to vector<16x32xf32>
    %49 = arith.addf %46, %48 : vector<16x32xf32>
    %cst_22 = arith.constant 0.000000e+00 : f32
    %50 = vector.broadcast %cst_22 : f32 to vector<16x32xf32>
    %51 = arith.cmpf ogt, %49, %50 : vector<16x32xf32>
    %cst_23 = arith.constant 0.00999999977 : f32
    %52 = vector.broadcast %cst_23 : f32 to vector<16x32xf32>
    %53 = arith.mulf %52, %49 : vector<16x32xf32>
    %54 = arith.select %51, %49, %53 : vector<16x32xi1>, vector<16x32xf32>
    %cst_24 = arith.constant dense<0.000000e+00> : vector<32x32xf32>
    %55 = tpu.matmul %5, %54, %cst_24 {dimension_numbers = #tpu.dot_dimension_numbers<[1], [0], [0], [1], [0, 0, 1, 1], [], []>} : vector<32x16xf32>, vector<16x32xf32>, vector<32x32xf32> -> vector<32x32xf32>
    %cst_25 = arith.constant dense<0.000000e+00> : vector<32x32xf32>
    %56 = tpu.matmul %10, %54, %cst_25 {dimension_numbers = #tpu.dot_dimension_numbers<[1], [0], [0], [1], [0, 0, 1, 1], [], []>} : vector<32x16xf32>, vector<16x32xf32>, vector<32x32xf32> -> vector<32x32xf32>
    %c88 = arith.constant 88 : index
    %c0_26 = arith.constant 0 : index
    %57 = vector.load %arg0[%c88, %c0_26] : memref<776x128xf32, #tpu.memory_space<vmem>>, vector<32x32xf32>
    %cst_27 = arith.constant dense<0.000000e+00> : vector<32x32xf32>
    %58 = tpu.matmul %55, %57, %cst_27 {dimension_numbers = #tpu.dot_dimension_numbers<[1], [0], [0], [1], [0, 0, 1, 1], [], []>} : vector<32x32xf32>, vector<32x32xf32>, vector<32x32xf32> -> vector<32x32xf32>
    %c120 = arith.constant 120 : index
    %c0_28 = arith.constant 0 : index
    %59 = vector.load %arg0[%c120, %c0_28] : memref<776x128xf32, #tpu.memory_space<vmem>>, vector<8x32xf32>
    %cst_29 = arith.constant dense<0.000000e+00> : vector<32x32xf32>
    %60 = tpu.matmul %44, %59, %cst_29 {dimension_numbers = #tpu.dot_dimension_numbers<[1], [0], [0], [1], [0, 0, 1, 1], [], []>} : vector<32x8xf32>, vector<8x32xf32>, vector<32x32xf32> -> vector<32x32xf32>
    %61 = arith.addf %58, %60 : vector<32x32xf32>
    %cst_30 = arith.constant 0.000000e+00 : f32
    %62 = vector.broadcast %cst_30 : f32 to vector<32x32xf32>
    %63 = arith.cmpf ogt, %61, %62 : vector<32x32xf32>
    %cst_31 = arith.constant 0.00999999977 : f32
    %64 = vector.broadcast %cst_31 : f32 to vector<32x32xf32>
    %65 = arith.mulf %64, %61 : vector<32x32xf32>
    %66 = arith.select %63, %61, %65 : vector<32x32xi1>, vector<32x32xf32>
    %67 = tpu.concatenate %66, %56 in 1 : vector<32x32xf32>, vector<32x32xf32> -> vector<32x64xf32>
    %c128 = arith.constant 128 : index
    %c0_32 = arith.constant 0 : index
    %68 = vector.load %arg0[%c128, %c0_32] : memref<776x128xf32, #tpu.memory_space<vmem>>, vector<64x1xf32>
    %cst_33 = arith.constant dense<0.000000e+00> : vector<32x1xf32>
    %69 = tpu.matmul %67, %68, %cst_33 {dimension_numbers = #tpu.dot_dimension_numbers<[1], [0], [0], [1], [0, 0, 1, 1], [], []>} : vector<32x64xf32>, vector<64x1xf32>, vector<32x1xf32> -> vector<32x1xf32>
    %cst_34 = arith.constant 0.000000e+00 : f32
    %70 = vector.broadcast %cst_34 : f32 to vector<32x1xf32>
    %71 = arith.cmpf ogt, %69, %70 : vector<32x1xf32>
    %cst_35 = arith.constant 0.00999999977 : f32
    %72 = vector.broadcast %cst_35 : f32 to vector<32x1xf32>
    %73 = arith.mulf %72, %69 : vector<32x1xf32>
    %74 = arith.select %71, %69, %73 : vector<32x1xi1>, vector<32x1xf32>
    %cst_36 = arith.constant 0.000000e+00 : f32
    %75 = vector.broadcast %cst_36 : f32 to vector<32x16xf32>
    %76 = arith.cmpf ogt, %10, %75 : vector<32x16xf32>
    %cst_37 = arith.constant -1.000000e+30 : f32
    %77 = vector.shape_cast %74 : vector<32x1xf32> to vector<32x1xf32>
    %78 = vector.broadcast %77 : vector<32x1xf32> to vector<32x16xf32>
    %79 = vector.broadcast %cst_37 : f32 to vector<32x16xf32>
    %80 = arith.select %76, %78, %79 : vector<32x16xi1>, vector<32x16xf32>
    %cst_38 = arith.constant dense<0xFF800000> : vector<16xf32>
    %81 = vector.multi_reduction <maximumf>, %80, %cst_38 [0] : vector<32x16xf32> to vector<16xf32>
    %82 = vector.shape_cast %81 : vector<16xf32> to vector<1x16xf32>
    %83 = vector.broadcast %82 : vector<1x16xf32> to vector<32x16xf32>
    %84 = arith.mulf %10, %83 : vector<32x16xf32>
    %cst_39 = arith.constant dense<0.000000e+00> : vector<32xf32>
    %85 = vector.multi_reduction <add>, %84, %cst_39 [1] : vector<32x16xf32> to vector<32xf32>
    %86 = vector.shape_cast %85 : vector<32xf32> to vector<32x1xf32>
    %87 = arith.subf %74, %86 : vector<32x1xf32>
    %88 = math.exp %87 : vector<32x1xf32>
    %cst_40 = arith.constant dense<0.000000e+00> : vector<16x1xf32>
    %89 = tpu.matmul %22, %88, %cst_40 {dimension_numbers = #tpu.dot_dimension_numbers<[1], [0], [0], [1], [0, 0, 1, 1], [], []>} : vector<16x32xf32>, vector<32x1xf32>, vector<16x1xf32> -> vector<16x1xf32>
    %cst_41 = arith.constant dense<0.000000e+00> : vector<32x1xf32>
    %90 = tpu.matmul %10, %89, %cst_41 {dimension_numbers = #tpu.dot_dimension_numbers<[1], [0], [0], [1], [0, 0, 1, 1], [], []>} : vector<32x16xf32>, vector<16x1xf32>, vector<32x1xf32> -> vector<32x1xf32>
    %91 = arith.divf %88, %90 : vector<32x1xf32>
    %c192 = arith.constant 192 : index
    %c0_42 = arith.constant 0 : index
    %92 = vector.load %arg0[%c192, %c0_42] : memref<776x128xf32, #tpu.memory_space<vmem>>, vector<32x32xf32>
    %cst_43 = arith.constant dense<0.000000e+00> : vector<32x32xf32>
    %93 = tpu.matmul %55, %92, %cst_43 {dimension_numbers = #tpu.dot_dimension_numbers<[1], [0], [0], [1], [0, 0, 1, 1], [], []>} : vector<32x32xf32>, vector<32x32xf32>, vector<32x32xf32> -> vector<32x32xf32>
    %94 = vector.broadcast %91 : vector<32x1xf32> to vector<32x32xf32>
    %95 = arith.mulf %94, %93 : vector<32x32xf32>
    %cst_44 = arith.constant dense<0.000000e+00> : vector<16x32xf32>
    %96 = tpu.matmul %22, %95, %cst_44 {dimension_numbers = #tpu.dot_dimension_numbers<[1], [0], [0], [1], [0, 0, 1, 1], [], []>} : vector<16x32xf32>, vector<32x32xf32>, vector<16x32xf32> -> vector<16x32xf32>
    %c224 = arith.constant 224 : index
    %c0_45 = arith.constant 0 : index
    %97 = vector.load %arg0[%c224, %c0_45] : memref<776x128xf32, #tpu.memory_space<vmem>>, vector<1x32xf32>
    %98 = vector.broadcast %97 : vector<1x32xf32> to vector<16x32xf32>
    %99 = arith.addf %96, %98 : vector<16x32xf32>
    %cst_46 = arith.constant 0.000000e+00 : f32
    %100 = vector.broadcast %cst_46 : f32 to vector<16x32xf32>
    %101 = arith.cmpf ogt, %99, %100 : vector<16x32xf32>
    %cst_47 = arith.constant 0.000000e+00 : f32
    %102 = vector.broadcast %cst_47 : f32 to vector<16x32xf32>
    %103 = arith.minimumf %99, %102 : vector<16x32xf32>
    %104 = math.exp %103 : vector<16x32xf32>
    %cst_48 = arith.constant 1.000000e+00 : f32
    %105 = vector.broadcast %cst_48 : f32 to vector<16x32xf32>
    %106 = arith.subf %104, %105 : vector<16x32xf32>
    %107 = arith.select %101, %99, %106 : vector<16x32xi1>, vector<16x32xf32>
    %c232 = arith.constant 232 : index
    %c0_49 = arith.constant 0 : index
    %108 = vector.load %arg0[%c232, %c0_49] : memref<776x128xf32, #tpu.memory_space<vmem>>, vector<32x96xf32>
    %cst_50 = arith.constant dense<0.000000e+00> : vector<16x96xf32>
    %109 = tpu.matmul %107, %108, %cst_50 {dimension_numbers = #tpu.dot_dimension_numbers<[1], [0], [0], [1], [0, 0, 1, 1], [], []>} : vector<16x32xf32>, vector<32x96xf32>, vector<16x96xf32> -> vector<16x96xf32>
    %c296 = arith.constant 296 : index
    %c0_51 = arith.constant 0 : index
    %110 = vector.load %arg0[%c296, %c0_51] : memref<776x128xf32, #tpu.memory_space<vmem>>, vector<1x96xf32>
    %111 = vector.broadcast %110 : vector<1x96xf32> to vector<16x96xf32>
    %112 = arith.addf %109, %111 : vector<16x96xf32>
    %c264 = arith.constant 264 : index
    %c0_52 = arith.constant 0 : index
    %113 = vector.load %arg0[%c264, %c0_52] : memref<776x128xf32, #tpu.memory_space<vmem>>, vector<32x96xf32>
    %cst_53 = arith.constant dense<0.000000e+00> : vector<16x96xf32>
    %114 = tpu.matmul %54, %113, %cst_53 {dimension_numbers = #tpu.dot_dimension_numbers<[1], [0], [0], [1], [0, 0, 1, 1], [], []>} : vector<16x32xf32>, vector<32x96xf32>, vector<16x96xf32> -> vector<16x96xf32>
    %c304 = arith.constant 304 : index
    %c0_54 = arith.constant 0 : index
    %115 = vector.load %arg0[%c304, %c0_54] : memref<776x128xf32, #tpu.memory_space<vmem>>, vector<1x96xf32>
    %116 = vector.broadcast %115 : vector<1x96xf32> to vector<16x96xf32>
    %117 = arith.addf %114, %116 : vector<16x96xf32>
    %118 = vector.extract_strided_slice %112 {offsets = [0, 0], sizes = [16, 32], strides = [1, 1]} : vector<16x96xf32> to vector<16x32xf32>
    %119 = vector.extract_strided_slice %117 {offsets = [0, 0], sizes = [16, 32], strides = [1, 1]} : vector<16x96xf32> to vector<16x32xf32>
    %120 = arith.addf %118, %119 : vector<16x32xf32>
    %121 = arith.negf %120 : vector<16x32xf32>
    %122 = math.exp %121 : vector<16x32xf32>
    %cst_55 = arith.constant 1.000000e+00 : f32
    %123 = vector.broadcast %cst_55 : f32 to vector<16x32xf32>
    %124 = arith.addf %123, %122 : vector<16x32xf32>
    %125 = arith.divf %123, %124 : vector<16x32xf32>
    %126 = vector.extract_strided_slice %112 {offsets = [0, 32], sizes = [16, 32], strides = [1, 1]} : vector<16x96xf32> to vector<16x32xf32>
    %127 = vector.extract_strided_slice %117 {offsets = [0, 32], sizes = [16, 32], strides = [1, 1]} : vector<16x96xf32> to vector<16x32xf32>
    %128 = arith.addf %126, %127 : vector<16x32xf32>
    %129 = arith.negf %128 : vector<16x32xf32>
    %130 = math.exp %129 : vector<16x32xf32>
    %cst_56 = arith.constant 1.000000e+00 : f32
    %131 = vector.broadcast %cst_56 : f32 to vector<16x32xf32>
    %132 = arith.addf %131, %130 : vector<16x32xf32>
    %133 = arith.divf %131, %132 : vector<16x32xf32>
    %134 = vector.extract_strided_slice %112 {offsets = [0, 64], sizes = [16, 32], strides = [1, 1]} : vector<16x96xf32> to vector<16x32xf32>
    %135 = vector.extract_strided_slice %117 {offsets = [0, 64], sizes = [16, 32], strides = [1, 1]} : vector<16x96xf32> to vector<16x32xf32>
    %136 = arith.mulf %125, %135 : vector<16x32xf32>
    %137 = arith.addf %134, %136 : vector<16x32xf32>
    %138 = math.tanh %137 : vector<16x32xf32>
    %cst_57 = arith.constant 1.000000e+00 : f32
    %139 = vector.broadcast %cst_57 : f32 to vector<16x32xf32>
    %140 = arith.subf %139, %133 : vector<16x32xf32>
    %141 = arith.mulf %140, %138 : vector<16x32xf32>
    %142 = arith.mulf %133, %54 : vector<16x32xf32>
    %143 = arith.addf %141, %142 : vector<16x32xf32>
    %cst_58 = arith.constant 0.000000e+00 : f32
    %144 = vector.broadcast %cst_58 : f32 to vector<16x32xf32>
    %145 = arith.maximumf %143, %144 : vector<16x32xf32>
    %c312 = arith.constant 312 : index
    %c0_59 = arith.constant 0 : index
    %146 = vector.load %arg0[%c312, %c0_59] : memref<776x128xf32, #tpu.memory_space<vmem>>, vector<32x32xf32>
    %cst_60 = arith.constant dense<0.000000e+00> : vector<16x32xf32>
    %147 = tpu.matmul %145, %146, %cst_60 {dimension_numbers = #tpu.dot_dimension_numbers<[1], [0], [0], [1], [0, 0, 1, 1], [], []>} : vector<16x32xf32>, vector<32x32xf32>, vector<16x32xf32> -> vector<16x32xf32>
    %c344 = arith.constant 344 : index
    %c0_61 = arith.constant 0 : index
    %148 = vector.load %arg0[%c344, %c0_61] : memref<776x128xf32, #tpu.memory_space<vmem>>, vector<32x2xf32>
    %cst_62 = arith.constant dense<0.000000e+00> : vector<16x2xf32>
    %149 = tpu.matmul %147, %148, %cst_62 {dimension_numbers = #tpu.dot_dimension_numbers<[1], [0], [0], [1], [0, 0, 1, 1], [], []>} : vector<16x32xf32>, vector<32x2xf32>, vector<16x2xf32> -> vector<16x2xf32>
    %150 = vector.extract_strided_slice %149 {offsets = [0, 0], sizes = [16, 1], strides = [1, 1]} : vector<16x2xf32> to vector<16x1xf32>
    %cst_63 = arith.constant dense<0.000000e+00> : vector<32x1xf32>
    %151 = tpu.matmul %5, %150, %cst_63 {dimension_numbers = #tpu.dot_dimension_numbers<[1], [0], [0], [1], [0, 0, 1, 1], [], []>} : vector<32x16xf32>, vector<16x1xf32>, vector<32x1xf32> -> vector<32x1xf32>
    %152 = vector.extract_strided_slice %149 {offsets = [0, 1], sizes = [16, 1], strides = [1, 1]} : vector<16x2xf32> to vector<16x1xf32>
    %cst_64 = arith.constant dense<0.000000e+00> : vector<32x1xf32>
    %153 = tpu.matmul %10, %152, %cst_64 {dimension_numbers = #tpu.dot_dimension_numbers<[1], [0], [0], [1], [0, 0, 1, 1], [], []>} : vector<32x16xf32>, vector<16x1xf32>, vector<32x1xf32> -> vector<32x1xf32>
    %154 = arith.addf %151, %153 : vector<32x1xf32>
    %cst_65 = arith.constant 0.000000e+00 : f32
    %155 = vector.broadcast %cst_65 : f32 to vector<32x1xf32>
    %156 = arith.cmpf ogt, %154, %155 : vector<32x1xf32>
    %cst_66 = arith.constant 0.00999999977 : f32
    %157 = vector.broadcast %cst_66 : f32 to vector<32x1xf32>
    %158 = arith.mulf %157, %154 : vector<32x1xf32>
    %159 = arith.select %156, %154, %158 : vector<32x1xi1>, vector<32x1xf32>
    %cst_67 = arith.constant 0.000000e+00 : f32
    %160 = vector.broadcast %cst_67 : f32 to vector<32x16xf32>
    %161 = arith.cmpf ogt, %10, %160 : vector<32x16xf32>
    %cst_68 = arith.constant -1.000000e+30 : f32
    %162 = vector.shape_cast %159 : vector<32x1xf32> to vector<32x1xf32>
    %163 = vector.broadcast %162 : vector<32x1xf32> to vector<32x16xf32>
    %164 = vector.broadcast %cst_68 : f32 to vector<32x16xf32>
    %165 = arith.select %161, %163, %164 : vector<32x16xi1>, vector<32x16xf32>
    %cst_69 = arith.constant dense<0xFF800000> : vector<16xf32>
    %166 = vector.multi_reduction <maximumf>, %165, %cst_69 [0] : vector<32x16xf32> to vector<16xf32>
    %167 = vector.shape_cast %166 : vector<16xf32> to vector<1x16xf32>
    %168 = vector.broadcast %167 : vector<1x16xf32> to vector<32x16xf32>
    %169 = arith.mulf %10, %168 : vector<32x16xf32>
    %cst_70 = arith.constant dense<0.000000e+00> : vector<32xf32>
    %170 = vector.multi_reduction <add>, %169, %cst_70 [1] : vector<32x16xf32> to vector<32xf32>
    %171 = vector.shape_cast %170 : vector<32xf32> to vector<32x1xf32>
    %172 = arith.subf %159, %171 : vector<32x1xf32>
    %173 = math.exp %172 : vector<32x1xf32>
    %cst_71 = arith.constant dense<0.000000e+00> : vector<16x1xf32>
    %174 = tpu.matmul %22, %173, %cst_71 {dimension_numbers = #tpu.dot_dimension_numbers<[1], [0], [0], [1], [0, 0, 1, 1], [], []>} : vector<16x32xf32>, vector<32x1xf32>, vector<16x1xf32> -> vector<16x1xf32>
    %cst_72 = arith.constant dense<0.000000e+00> : vector<32x1xf32>
    %175 = tpu.matmul %10, %174, %cst_72 {dimension_numbers = #tpu.dot_dimension_numbers<[1], [0], [0], [1], [0, 0, 1, 1], [], []>} : vector<32x16xf32>, vector<16x1xf32>, vector<32x1xf32> -> vector<32x1xf32>
    %176 = arith.divf %173, %175 : vector<32x1xf32>
    %cst_73 = arith.constant dense<0.000000e+00> : vector<32x32xf32>
    %177 = tpu.matmul %5, %147, %cst_73 {dimension_numbers = #tpu.dot_dimension_numbers<[1], [0], [0], [1], [0, 0, 1, 1], [], []>} : vector<32x16xf32>, vector<16x32xf32>, vector<32x32xf32> -> vector<32x32xf32>
    %178 = vector.broadcast %176 : vector<32x1xf32> to vector<32x32xf32>
    %179 = arith.mulf %178, %177 : vector<32x32xf32>
    %cst_74 = arith.constant dense<0.000000e+00> : vector<16x32xf32>
    %180 = tpu.matmul %22, %179, %cst_74 {dimension_numbers = #tpu.dot_dimension_numbers<[1], [0], [0], [1], [0, 0, 1, 1], [], []>} : vector<16x32xf32>, vector<32x32xf32>, vector<16x32xf32> -> vector<16x32xf32>
    %c376 = arith.constant 376 : index
    %c0_75 = arith.constant 0 : index
    %181 = vector.load %arg0[%c376, %c0_75] : memref<776x128xf32, #tpu.memory_space<vmem>>, vector<1x32xf32>
    %182 = vector.broadcast %181 : vector<1x32xf32> to vector<16x32xf32>
    %183 = arith.addf %180, %182 : vector<16x32xf32>
    %cst_76 = arith.constant 0.000000e+00 : f32
    %184 = vector.broadcast %cst_76 : f32 to vector<16x32xf32>
    %185 = arith.cmpf ogt, %183, %184 : vector<16x32xf32>
    %cst_77 = arith.constant 0.000000e+00 : f32
    %186 = vector.broadcast %cst_77 : f32 to vector<16x32xf32>
    %187 = arith.minimumf %183, %186 : vector<16x32xf32>
    %188 = math.exp %187 : vector<16x32xf32>
    %cst_78 = arith.constant 1.000000e+00 : f32
    %189 = vector.broadcast %cst_78 : f32 to vector<16x32xf32>
    %190 = arith.subf %188, %189 : vector<16x32xf32>
    %191 = arith.select %185, %183, %190 : vector<16x32xi1>, vector<16x32xf32>
    %c384 = arith.constant 384 : index
    %c0_79 = arith.constant 0 : index
    %192 = vector.load %arg0[%c384, %c0_79] : memref<776x128xf32, #tpu.memory_space<vmem>>, vector<32x96xf32>
    %cst_80 = arith.constant dense<0.000000e+00> : vector<16x96xf32>
    %193 = tpu.matmul %191, %192, %cst_80 {dimension_numbers = #tpu.dot_dimension_numbers<[1], [0], [0], [1], [0, 0, 1, 1], [], []>} : vector<16x32xf32>, vector<32x96xf32>, vector<16x96xf32> -> vector<16x96xf32>
    %c448 = arith.constant 448 : index
    %c0_81 = arith.constant 0 : index
    %194 = vector.load %arg0[%c448, %c0_81] : memref<776x128xf32, #tpu.memory_space<vmem>>, vector<1x96xf32>
    %195 = vector.broadcast %194 : vector<1x96xf32> to vector<16x96xf32>
    %196 = arith.addf %193, %195 : vector<16x96xf32>
    %c416 = arith.constant 416 : index
    %c0_82 = arith.constant 0 : index
    %197 = vector.load %arg0[%c416, %c0_82] : memref<776x128xf32, #tpu.memory_space<vmem>>, vector<32x96xf32>
    %cst_83 = arith.constant dense<0.000000e+00> : vector<16x96xf32>
    %198 = tpu.matmul %145, %197, %cst_83 {dimension_numbers = #tpu.dot_dimension_numbers<[1], [0], [0], [1], [0, 0, 1, 1], [], []>} : vector<16x32xf32>, vector<32x96xf32>, vector<16x96xf32> -> vector<16x96xf32>
    %c456 = arith.constant 456 : index
    %c0_84 = arith.constant 0 : index
    %199 = vector.load %arg0[%c456, %c0_84] : memref<776x128xf32, #tpu.memory_space<vmem>>, vector<1x96xf32>
    %200 = vector.broadcast %199 : vector<1x96xf32> to vector<16x96xf32>
    %201 = arith.addf %198, %200 : vector<16x96xf32>
    %202 = vector.extract_strided_slice %196 {offsets = [0, 0], sizes = [16, 32], strides = [1, 1]} : vector<16x96xf32> to vector<16x32xf32>
    %203 = vector.extract_strided_slice %201 {offsets = [0, 0], sizes = [16, 32], strides = [1, 1]} : vector<16x96xf32> to vector<16x32xf32>
    %204 = arith.addf %202, %203 : vector<16x32xf32>
    %205 = arith.negf %204 : vector<16x32xf32>
    %206 = math.exp %205 : vector<16x32xf32>
    %cst_85 = arith.constant 1.000000e+00 : f32
    %207 = vector.broadcast %cst_85 : f32 to vector<16x32xf32>
    %208 = arith.addf %207, %206 : vector<16x32xf32>
    %209 = arith.divf %207, %208 : vector<16x32xf32>
    %210 = vector.extract_strided_slice %196 {offsets = [0, 32], sizes = [16, 32], strides = [1, 1]} : vector<16x96xf32> to vector<16x32xf32>
    %211 = vector.extract_strided_slice %201 {offsets = [0, 32], sizes = [16, 32], strides = [1, 1]} : vector<16x96xf32> to vector<16x32xf32>
    %212 = arith.addf %210, %211 : vector<16x32xf32>
    %213 = arith.negf %212 : vector<16x32xf32>
    %214 = math.exp %213 : vector<16x32xf32>
    %cst_86 = arith.constant 1.000000e+00 : f32
    %215 = vector.broadcast %cst_86 : f32 to vector<16x32xf32>
    %216 = arith.addf %215, %214 : vector<16x32xf32>
    %217 = arith.divf %215, %216 : vector<16x32xf32>
    %218 = vector.extract_strided_slice %196 {offsets = [0, 64], sizes = [16, 32], strides = [1, 1]} : vector<16x96xf32> to vector<16x32xf32>
    %219 = vector.extract_strided_slice %201 {offsets = [0, 64], sizes = [16, 32], strides = [1, 1]} : vector<16x96xf32> to vector<16x32xf32>
    %220 = arith.mulf %209, %219 : vector<16x32xf32>
    %221 = arith.addf %218, %220 : vector<16x32xf32>
    %222 = math.tanh %221 : vector<16x32xf32>
    %cst_87 = arith.constant 1.000000e+00 : f32
    %223 = vector.broadcast %cst_87 : f32 to vector<16x32xf32>
    %224 = arith.subf %223, %217 : vector<16x32xf32>
    %225 = arith.mulf %224, %222 : vector<16x32xf32>
    %226 = arith.mulf %217, %145 : vector<16x32xf32>
    %227 = arith.addf %225, %226 : vector<16x32xf32>
    %cst_88 = arith.constant 0.000000e+00 : f32
    %228 = vector.broadcast %cst_88 : f32 to vector<16x32xf32>
    %229 = arith.maximumf %227, %228 : vector<16x32xf32>
    %cst_89 = arith.constant dense<0.000000e+00> : vector<2x32xf32>
    %230 = tpu.matmul %28, %229, %cst_89 {dimension_numbers = #tpu.dot_dimension_numbers<[1], [0], [0], [1], [0, 0, 1, 1], [], []>} : vector<2x16xf32>, vector<16x32xf32>, vector<2x32xf32> -> vector<2x32xf32>
    %cst_90 = arith.constant 0.000000e+00 : f32
    %231 = vector.broadcast %cst_90 : f32 to vector<2x32xf32>
    %232 = arith.maximumf %230, %231 : vector<2x32xf32>
    %c464 = arith.constant 464 : index
    %c0_91 = arith.constant 0 : index
    %233 = vector.load %arg0[%c464, %c0_91] : memref<776x128xf32, #tpu.memory_space<vmem>>, vector<32x32xf32>
    %cst_92 = arith.constant dense<0.000000e+00> : vector<16x32xf32>
    %234 = tpu.matmul %229, %233, %cst_92 {dimension_numbers = #tpu.dot_dimension_numbers<[1], [0], [0], [1], [0, 0, 1, 1], [], []>} : vector<16x32xf32>, vector<32x32xf32>, vector<16x32xf32> -> vector<16x32xf32>
    %c464_93 = arith.constant 464 : index
    %c0_94 = arith.constant 0 : index
    %235 = vector.load %arg0[%c464_93, %c0_94] : memref<776x128xf32, #tpu.memory_space<vmem>>, vector<32x32xf32>
    %cst_95 = arith.constant dense<0.000000e+00> : vector<2x32xf32>
    %236 = tpu.matmul %232, %235, %cst_95 {dimension_numbers = #tpu.dot_dimension_numbers<[1], [0], [0], [1], [0, 0, 1, 1], [], []>} : vector<2x32xf32>, vector<32x32xf32>, vector<2x32xf32> -> vector<2x32xf32>
    %c496 = arith.constant 496 : index
    %c0_96 = arith.constant 0 : index
    %237 = vector.load %arg0[%c496, %c0_96] : memref<776x128xf32, #tpu.memory_space<vmem>>, vector<32x2xf32>
    %cst_97 = arith.constant dense<0.000000e+00> : vector<16x2xf32>
    %238 = tpu.matmul %234, %237, %cst_97 {dimension_numbers = #tpu.dot_dimension_numbers<[1], [0], [0], [1], [0, 0, 1, 1], [], []>} : vector<16x32xf32>, vector<32x2xf32>, vector<16x2xf32> -> vector<16x2xf32>
    %239 = vector.extract_strided_slice %238 {offsets = [0, 0], sizes = [16, 1], strides = [1, 1]} : vector<16x2xf32> to vector<16x1xf32>
    %c496_98 = arith.constant 496 : index
    %c0_99 = arith.constant 0 : index
    %240 = vector.load %arg0[%c496_98, %c0_99] : memref<776x128xf32, #tpu.memory_space<vmem>>, vector<32x2xf32>
    %cst_100 = arith.constant dense<0.000000e+00> : vector<2x2xf32>
    %241 = tpu.matmul %236, %240, %cst_100 {dimension_numbers = #tpu.dot_dimension_numbers<[1], [0], [0], [1], [0, 0, 1, 1], [], []>} : vector<2x32xf32>, vector<32x2xf32>, vector<2x2xf32> -> vector<2x2xf32>
    %242 = vector.extract_strided_slice %241 {offsets = [0, 1], sizes = [2, 1], strides = [1, 1]} : vector<2x2xf32> to vector<2x1xf32>
    %cst_101 = arith.constant dense<0.000000e+00> : vector<16x1xf32>
    %243 = tpu.matmul %16, %242, %cst_101 {dimension_numbers = #tpu.dot_dimension_numbers<[1], [0], [0], [1], [0, 0, 1, 1], [], []>} : vector<16x2xf32>, vector<2x1xf32>, vector<16x1xf32> -> vector<16x1xf32>
    %244 = arith.addf %239, %243 : vector<16x1xf32>
    %cst_102 = arith.constant 0.000000e+00 : f32
    %245 = vector.broadcast %cst_102 : f32 to vector<16x1xf32>
    %246 = arith.cmpf ogt, %244, %245 : vector<16x1xf32>
    %cst_103 = arith.constant 0.00999999977 : f32
    %247 = vector.broadcast %cst_103 : f32 to vector<16x1xf32>
    %248 = arith.mulf %247, %244 : vector<16x1xf32>
    %249 = arith.select %246, %244, %248 : vector<16x1xi1>, vector<16x1xf32>
    %cst_104 = arith.constant 0.000000e+00 : f32
    %250 = vector.broadcast %cst_104 : f32 to vector<16x2xf32>
    %251 = arith.cmpf ogt, %16, %250 : vector<16x2xf32>
    %cst_105 = arith.constant -1.000000e+30 : f32
    %252 = vector.shape_cast %249 : vector<16x1xf32> to vector<16x1xf32>
    %253 = vector.broadcast %252 : vector<16x1xf32> to vector<16x2xf32>
    %254 = vector.broadcast %cst_105 : f32 to vector<16x2xf32>
    %255 = arith.select %251, %253, %254 : vector<16x2xi1>, vector<16x2xf32>
    %cst_106 = arith.constant dense<0xFF800000> : vector<2xf32>
    %256 = vector.multi_reduction <maximumf>, %255, %cst_106 [0] : vector<16x2xf32> to vector<2xf32>
    %257 = vector.shape_cast %256 : vector<2xf32> to vector<1x2xf32>
    %258 = vector.broadcast %257 : vector<1x2xf32> to vector<16x2xf32>
    %259 = arith.mulf %16, %258 : vector<16x2xf32>
    %cst_107 = arith.constant dense<0.000000e+00> : vector<16xf32>
    %260 = vector.multi_reduction <add>, %259, %cst_107 [1] : vector<16x2xf32> to vector<16xf32>
    %261 = vector.shape_cast %260 : vector<16xf32> to vector<16x1xf32>
    %262 = arith.subf %249, %261 : vector<16x1xf32>
    %263 = math.exp %262 : vector<16x1xf32>
    %cst_108 = arith.constant dense<0.000000e+00> : vector<2x1xf32>
    %264 = tpu.matmul %28, %263, %cst_108 {dimension_numbers = #tpu.dot_dimension_numbers<[1], [0], [0], [1], [0, 0, 1, 1], [], []>} : vector<2x16xf32>, vector<16x1xf32>, vector<2x1xf32> -> vector<2x1xf32>
    %cst_109 = arith.constant dense<0.000000e+00> : vector<16x1xf32>
    %265 = tpu.matmul %16, %264, %cst_109 {dimension_numbers = #tpu.dot_dimension_numbers<[1], [0], [0], [1], [0, 0, 1, 1], [], []>} : vector<16x2xf32>, vector<2x1xf32>, vector<16x1xf32> -> vector<16x1xf32>
    %266 = arith.divf %263, %265 : vector<16x1xf32>
    %267 = vector.broadcast %266 : vector<16x1xf32> to vector<16x32xf32>
    %268 = arith.mulf %267, %234 : vector<16x32xf32>
    %cst_110 = arith.constant dense<0.000000e+00> : vector<2x32xf32>
    %269 = tpu.matmul %28, %268, %cst_110 {dimension_numbers = #tpu.dot_dimension_numbers<[1], [0], [0], [1], [0, 0, 1, 1], [], []>} : vector<2x16xf32>, vector<16x32xf32>, vector<2x32xf32> -> vector<2x32xf32>
    %c528 = arith.constant 528 : index
    %c0_111 = arith.constant 0 : index
    %270 = vector.load %arg0[%c528, %c0_111] : memref<776x128xf32, #tpu.memory_space<vmem>>, vector<1x32xf32>
    %271 = vector.broadcast %270 : vector<1x32xf32> to vector<2x32xf32>
    %272 = arith.addf %269, %271 : vector<2x32xf32>
    %cst_112 = arith.constant 0.000000e+00 : f32
    %273 = vector.broadcast %cst_112 : f32 to vector<2x32xf32>
    %274 = arith.cmpf ogt, %272, %273 : vector<2x32xf32>
    %cst_113 = arith.constant 0.000000e+00 : f32
    %275 = vector.broadcast %cst_113 : f32 to vector<2x32xf32>
    %276 = arith.minimumf %272, %275 : vector<2x32xf32>
    %277 = math.exp %276 : vector<2x32xf32>
    %cst_114 = arith.constant 1.000000e+00 : f32
    %278 = vector.broadcast %cst_114 : f32 to vector<2x32xf32>
    %279 = arith.subf %277, %278 : vector<2x32xf32>
    %280 = arith.select %274, %272, %279 : vector<2x32xi1>, vector<2x32xf32>
    %c536 = arith.constant 536 : index
    %c0_115 = arith.constant 0 : index
    %281 = vector.load %arg0[%c536, %c0_115] : memref<776x128xf32, #tpu.memory_space<vmem>>, vector<32x96xf32>
    %cst_116 = arith.constant dense<0.000000e+00> : vector<2x96xf32>
    %282 = tpu.matmul %280, %281, %cst_116 {dimension_numbers = #tpu.dot_dimension_numbers<[1], [0], [0], [1], [0, 0, 1, 1], [], []>} : vector<2x32xf32>, vector<32x96xf32>, vector<2x96xf32> -> vector<2x96xf32>
    %c600 = arith.constant 600 : index
    %c0_117 = arith.constant 0 : index
    %283 = vector.load %arg0[%c600, %c0_117] : memref<776x128xf32, #tpu.memory_space<vmem>>, vector<1x96xf32>
    %284 = vector.broadcast %283 : vector<1x96xf32> to vector<2x96xf32>
    %285 = arith.addf %282, %284 : vector<2x96xf32>
    %c568 = arith.constant 568 : index
    %c0_118 = arith.constant 0 : index
    %286 = vector.load %arg0[%c568, %c0_118] : memref<776x128xf32, #tpu.memory_space<vmem>>, vector<32x96xf32>
    %cst_119 = arith.constant dense<0.000000e+00> : vector<2x96xf32>
    %287 = tpu.matmul %232, %286, %cst_119 {dimension_numbers = #tpu.dot_dimension_numbers<[1], [0], [0], [1], [0, 0, 1, 1], [], []>} : vector<2x32xf32>, vector<32x96xf32>, vector<2x96xf32> -> vector<2x96xf32>
    %c608 = arith.constant 608 : index
    %c0_120 = arith.constant 0 : index
    %288 = vector.load %arg0[%c608, %c0_120] : memref<776x128xf32, #tpu.memory_space<vmem>>, vector<1x96xf32>
    %289 = vector.broadcast %288 : vector<1x96xf32> to vector<2x96xf32>
    %290 = arith.addf %287, %289 : vector<2x96xf32>
    %291 = vector.extract_strided_slice %285 {offsets = [0, 0], sizes = [2, 32], strides = [1, 1]} : vector<2x96xf32> to vector<2x32xf32>
    %292 = vector.extract_strided_slice %290 {offsets = [0, 0], sizes = [2, 32], strides = [1, 1]} : vector<2x96xf32> to vector<2x32xf32>
    %293 = arith.addf %291, %292 : vector<2x32xf32>
    %294 = arith.negf %293 : vector<2x32xf32>
    %295 = math.exp %294 : vector<2x32xf32>
    %cst_121 = arith.constant 1.000000e+00 : f32
    %296 = vector.broadcast %cst_121 : f32 to vector<2x32xf32>
    %297 = arith.addf %296, %295 : vector<2x32xf32>
    %298 = arith.divf %296, %297 : vector<2x32xf32>
    %299 = vector.extract_strided_slice %285 {offsets = [0, 32], sizes = [2, 32], strides = [1, 1]} : vector<2x96xf32> to vector<2x32xf32>
    %300 = vector.extract_strided_slice %290 {offsets = [0, 32], sizes = [2, 32], strides = [1, 1]} : vector<2x96xf32> to vector<2x32xf32>
    %301 = arith.addf %299, %300 : vector<2x32xf32>
    %302 = arith.negf %301 : vector<2x32xf32>
    %303 = math.exp %302 : vector<2x32xf32>
    %cst_122 = arith.constant 1.000000e+00 : f32
    %304 = vector.broadcast %cst_122 : f32 to vector<2x32xf32>
    %305 = arith.addf %304, %303 : vector<2x32xf32>
    %306 = arith.divf %304, %305 : vector<2x32xf32>
    %307 = vector.extract_strided_slice %285 {offsets = [0, 64], sizes = [2, 32], strides = [1, 1]} : vector<2x96xf32> to vector<2x32xf32>
    %308 = vector.extract_strided_slice %290 {offsets = [0, 64], sizes = [2, 32], strides = [1, 1]} : vector<2x96xf32> to vector<2x32xf32>
    %309 = arith.mulf %298, %308 : vector<2x32xf32>
    %310 = arith.addf %307, %309 : vector<2x32xf32>
    %311 = math.tanh %310 : vector<2x32xf32>
    %cst_123 = arith.constant 1.000000e+00 : f32
    %312 = vector.broadcast %cst_123 : f32 to vector<2x32xf32>
    %313 = arith.subf %312, %306 : vector<2x32xf32>
    %314 = arith.mulf %313, %311 : vector<2x32xf32>
    %315 = arith.mulf %306, %232 : vector<2x32xf32>
    %316 = arith.addf %314, %315 : vector<2x32xf32>
    %cst_124 = arith.constant 0.000000e+00 : f32
    %317 = vector.broadcast %cst_124 : f32 to vector<2x32xf32>
    %318 = arith.maximumf %316, %317 : vector<2x32xf32>
    %c464_125 = arith.constant 464 : index
    %c0_126 = arith.constant 0 : index
    %319 = vector.load %arg0[%c464_125, %c0_126] : memref<776x128xf32, #tpu.memory_space<vmem>>, vector<32x32xf32>
    %cst_127 = arith.constant dense<0.000000e+00> : vector<16x32xf32>
    %320 = tpu.matmul %229, %319, %cst_127 {dimension_numbers = #tpu.dot_dimension_numbers<[1], [0], [0], [1], [0, 0, 1, 1], [], []>} : vector<16x32xf32>, vector<32x32xf32>, vector<16x32xf32> -> vector<16x32xf32>
    %c464_128 = arith.constant 464 : index
    %c0_129 = arith.constant 0 : index
    %321 = vector.load %arg0[%c464_128, %c0_129] : memref<776x128xf32, #tpu.memory_space<vmem>>, vector<32x32xf32>
    %cst_130 = arith.constant dense<0.000000e+00> : vector<2x32xf32>
    %322 = tpu.matmul %318, %321, %cst_130 {dimension_numbers = #tpu.dot_dimension_numbers<[1], [0], [0], [1], [0, 0, 1, 1], [], []>} : vector<2x32xf32>, vector<32x32xf32>, vector<2x32xf32> -> vector<2x32xf32>
    %c496_131 = arith.constant 496 : index
    %c0_132 = arith.constant 0 : index
    %323 = vector.load %arg0[%c496_131, %c0_132] : memref<776x128xf32, #tpu.memory_space<vmem>>, vector<32x2xf32>
    %cst_133 = arith.constant dense<0.000000e+00> : vector<16x2xf32>
    %324 = tpu.matmul %320, %323, %cst_133 {dimension_numbers = #tpu.dot_dimension_numbers<[1], [0], [0], [1], [0, 0, 1, 1], [], []>} : vector<16x32xf32>, vector<32x2xf32>, vector<16x2xf32> -> vector<16x2xf32>
    %325 = vector.extract_strided_slice %324 {offsets = [0, 0], sizes = [16, 1], strides = [1, 1]} : vector<16x2xf32> to vector<16x1xf32>
    %c496_134 = arith.constant 496 : index
    %c0_135 = arith.constant 0 : index
    %326 = vector.load %arg0[%c496_134, %c0_135] : memref<776x128xf32, #tpu.memory_space<vmem>>, vector<32x2xf32>
    %cst_136 = arith.constant dense<0.000000e+00> : vector<2x2xf32>
    %327 = tpu.matmul %322, %326, %cst_136 {dimension_numbers = #tpu.dot_dimension_numbers<[1], [0], [0], [1], [0, 0, 1, 1], [], []>} : vector<2x32xf32>, vector<32x2xf32>, vector<2x2xf32> -> vector<2x2xf32>
    %328 = vector.extract_strided_slice %327 {offsets = [0, 1], sizes = [2, 1], strides = [1, 1]} : vector<2x2xf32> to vector<2x1xf32>
    %cst_137 = arith.constant dense<0.000000e+00> : vector<16x1xf32>
    %329 = tpu.matmul %16, %328, %cst_137 {dimension_numbers = #tpu.dot_dimension_numbers<[1], [0], [0], [1], [0, 0, 1, 1], [], []>} : vector<16x2xf32>, vector<2x1xf32>, vector<16x1xf32> -> vector<16x1xf32>
    %330 = arith.addf %325, %329 : vector<16x1xf32>
    %cst_138 = arith.constant 0.000000e+00 : f32
    %331 = vector.broadcast %cst_138 : f32 to vector<16x1xf32>
    %332 = arith.cmpf ogt, %330, %331 : vector<16x1xf32>
    %cst_139 = arith.constant 0.00999999977 : f32
    %333 = vector.broadcast %cst_139 : f32 to vector<16x1xf32>
    %334 = arith.mulf %333, %330 : vector<16x1xf32>
    %335 = arith.select %332, %330, %334 : vector<16x1xi1>, vector<16x1xf32>
    %cst_140 = arith.constant 0.000000e+00 : f32
    %336 = vector.broadcast %cst_140 : f32 to vector<16x2xf32>
    %337 = arith.cmpf ogt, %16, %336 : vector<16x2xf32>
    %cst_141 = arith.constant -1.000000e+30 : f32
    %338 = vector.shape_cast %335 : vector<16x1xf32> to vector<16x1xf32>
    %339 = vector.broadcast %338 : vector<16x1xf32> to vector<16x2xf32>
    %340 = vector.broadcast %cst_141 : f32 to vector<16x2xf32>
    %341 = arith.select %337, %339, %340 : vector<16x2xi1>, vector<16x2xf32>
    %cst_142 = arith.constant dense<0xFF800000> : vector<2xf32>
    %342 = vector.multi_reduction <maximumf>, %341, %cst_142 [0] : vector<16x2xf32> to vector<2xf32>
    %343 = vector.shape_cast %342 : vector<2xf32> to vector<1x2xf32>
    %344 = vector.broadcast %343 : vector<1x2xf32> to vector<16x2xf32>
    %345 = arith.mulf %16, %344 : vector<16x2xf32>
    %cst_143 = arith.constant dense<0.000000e+00> : vector<16xf32>
    %346 = vector.multi_reduction <add>, %345, %cst_143 [1] : vector<16x2xf32> to vector<16xf32>
    %347 = vector.shape_cast %346 : vector<16xf32> to vector<16x1xf32>
    %348 = arith.subf %335, %347 : vector<16x1xf32>
    %349 = math.exp %348 : vector<16x1xf32>
    %cst_144 = arith.constant dense<0.000000e+00> : vector<2x1xf32>
    %350 = tpu.matmul %28, %349, %cst_144 {dimension_numbers = #tpu.dot_dimension_numbers<[1], [0], [0], [1], [0, 0, 1, 1], [], []>} : vector<2x16xf32>, vector<16x1xf32>, vector<2x1xf32> -> vector<2x1xf32>
    %cst_145 = arith.constant dense<0.000000e+00> : vector<16x1xf32>
    %351 = tpu.matmul %16, %350, %cst_145 {dimension_numbers = #tpu.dot_dimension_numbers<[1], [0], [0], [1], [0, 0, 1, 1], [], []>} : vector<16x2xf32>, vector<2x1xf32>, vector<16x1xf32> -> vector<16x1xf32>
    %352 = arith.divf %349, %351 : vector<16x1xf32>
    %353 = vector.broadcast %352 : vector<16x1xf32> to vector<16x32xf32>
    %354 = arith.mulf %353, %320 : vector<16x32xf32>
    %cst_146 = arith.constant dense<0.000000e+00> : vector<2x32xf32>
    %355 = tpu.matmul %28, %354, %cst_146 {dimension_numbers = #tpu.dot_dimension_numbers<[1], [0], [0], [1], [0, 0, 1, 1], [], []>} : vector<2x16xf32>, vector<16x32xf32>, vector<2x32xf32> -> vector<2x32xf32>
    %c528_147 = arith.constant 528 : index
    %c0_148 = arith.constant 0 : index
    %356 = vector.load %arg0[%c528_147, %c0_148] : memref<776x128xf32, #tpu.memory_space<vmem>>, vector<1x32xf32>
    %357 = vector.broadcast %356 : vector<1x32xf32> to vector<2x32xf32>
    %358 = arith.addf %355, %357 : vector<2x32xf32>
    %cst_149 = arith.constant 0.000000e+00 : f32
    %359 = vector.broadcast %cst_149 : f32 to vector<2x32xf32>
    %360 = arith.cmpf ogt, %358, %359 : vector<2x32xf32>
    %cst_150 = arith.constant 0.000000e+00 : f32
    %361 = vector.broadcast %cst_150 : f32 to vector<2x32xf32>
    %362 = arith.minimumf %358, %361 : vector<2x32xf32>
    %363 = math.exp %362 : vector<2x32xf32>
    %cst_151 = arith.constant 1.000000e+00 : f32
    %364 = vector.broadcast %cst_151 : f32 to vector<2x32xf32>
    %365 = arith.subf %363, %364 : vector<2x32xf32>
    %366 = arith.select %360, %358, %365 : vector<2x32xi1>, vector<2x32xf32>
    %c536_152 = arith.constant 536 : index
    %c0_153 = arith.constant 0 : index
    %367 = vector.load %arg0[%c536_152, %c0_153] : memref<776x128xf32, #tpu.memory_space<vmem>>, vector<32x96xf32>
    %cst_154 = arith.constant dense<0.000000e+00> : vector<2x96xf32>
    %368 = tpu.matmul %366, %367, %cst_154 {dimension_numbers = #tpu.dot_dimension_numbers<[1], [0], [0], [1], [0, 0, 1, 1], [], []>} : vector<2x32xf32>, vector<32x96xf32>, vector<2x96xf32> -> vector<2x96xf32>
    %c600_155 = arith.constant 600 : index
    %c0_156 = arith.constant 0 : index
    %369 = vector.load %arg0[%c600_155, %c0_156] : memref<776x128xf32, #tpu.memory_space<vmem>>, vector<1x96xf32>
    %370 = vector.broadcast %369 : vector<1x96xf32> to vector<2x96xf32>
    %371 = arith.addf %368, %370 : vector<2x96xf32>
    %c568_157 = arith.constant 568 : index
    %c0_158 = arith.constant 0 : index
    %372 = vector.load %arg0[%c568_157, %c0_158] : memref<776x128xf32, #tpu.memory_space<vmem>>, vector<32x96xf32>
    %cst_159 = arith.constant dense<0.000000e+00> : vector<2x96xf32>
    %373 = tpu.matmul %318, %372, %cst_159 {dimension_numbers = #tpu.dot_dimension_numbers<[1], [0], [0], [1], [0, 0, 1, 1], [], []>} : vector<2x32xf32>, vector<32x96xf32>, vector<2x96xf32> -> vector<2x96xf32>
    %c608_160 = arith.constant 608 : index
    %c0_161 = arith.constant 0 : index
    %374 = vector.load %arg0[%c608_160, %c0_161] : memref<776x128xf32, #tpu.memory_space<vmem>>, vector<1x96xf32>
    %375 = vector.broadcast %374 : vector<1x96xf32> to vector<2x96xf32>
    %376 = arith.addf %373, %375 : vector<2x96xf32>
    %377 = vector.extract_strided_slice %371 {offsets = [0, 0], sizes = [2, 32], strides = [1, 1]} : vector<2x96xf32> to vector<2x32xf32>
    %378 = vector.extract_strided_slice %376 {offsets = [0, 0], sizes = [2, 32], strides = [1, 1]} : vector<2x96xf32> to vector<2x32xf32>
    %379 = arith.addf %377, %378 : vector<2x32xf32>
    %380 = arith.negf %379 : vector<2x32xf32>
    %381 = math.exp %380 : vector<2x32xf32>
    %cst_162 = arith.constant 1.000000e+00 : f32
    %382 = vector.broadcast %cst_162 : f32 to vector<2x32xf32>
    %383 = arith.addf %382, %381 : vector<2x32xf32>
    %384 = arith.divf %382, %383 : vector<2x32xf32>
    %385 = vector.extract_strided_slice %371 {offsets = [0, 32], sizes = [2, 32], strides = [1, 1]} : vector<2x96xf32> to vector<2x32xf32>
    %386 = vector.extract_strided_slice %376 {offsets = [0, 32], sizes = [2, 32], strides = [1, 1]} : vector<2x96xf32> to vector<2x32xf32>
    %387 = arith.addf %385, %386 : vector<2x32xf32>
    %388 = arith.negf %387 : vector<2x32xf32>
    %389 = math.exp %388 : vector<2x32xf32>
    %cst_163 = arith.constant 1.000000e+00 : f32
    %390 = vector.broadcast %cst_163 : f32 to vector<2x32xf32>
    %391 = arith.addf %390, %389 : vector<2x32xf32>
    %392 = arith.divf %390, %391 : vector<2x32xf32>
    %393 = vector.extract_strided_slice %371 {offsets = [0, 64], sizes = [2, 32], strides = [1, 1]} : vector<2x96xf32> to vector<2x32xf32>
    %394 = vector.extract_strided_slice %376 {offsets = [0, 64], sizes = [2, 32], strides = [1, 1]} : vector<2x96xf32> to vector<2x32xf32>
    %395 = arith.mulf %384, %394 : vector<2x32xf32>
    %396 = arith.addf %393, %395 : vector<2x32xf32>
    %397 = math.tanh %396 : vector<2x32xf32>
    %cst_164 = arith.constant 1.000000e+00 : f32
    %398 = vector.broadcast %cst_164 : f32 to vector<2x32xf32>
    %399 = arith.subf %398, %392 : vector<2x32xf32>
    %400 = arith.mulf %399, %397 : vector<2x32xf32>
    %401 = arith.mulf %392, %318 : vector<2x32xf32>
    %402 = arith.addf %400, %401 : vector<2x32xf32>
    %cst_165 = arith.constant 0.000000e+00 : f32
    %403 = vector.broadcast %cst_165 : f32 to vector<2x32xf32>
    %404 = arith.maximumf %402, %403 : vector<2x32xf32>
    %c616 = arith.constant 616 : index
    %c0_166 = arith.constant 0 : index
    %405 = vector.load %arg0[%c616, %c0_166] : memref<776x128xf32, #tpu.memory_space<vmem>>, vector<32x16xf32>
    %cst_167 = arith.constant dense<0.000000e+00> : vector<2x16xf32>
    %406 = tpu.matmul %404, %405, %cst_167 {dimension_numbers = #tpu.dot_dimension_numbers<[1], [0], [0], [1], [0, 0, 1, 1], [], []>} : vector<2x32xf32>, vector<32x16xf32>, vector<2x16xf32> -> vector<2x16xf32>
    %c648 = arith.constant 648 : index
    %c0_168 = arith.constant 0 : index
    %407 = vector.load %arg0[%c648, %c0_168] : memref<776x128xf32, #tpu.memory_space<vmem>>, vector<1x16xf32>
    %408 = vector.broadcast %407 : vector<1x16xf32> to vector<2x16xf32>
    %409 = arith.addf %406, %408 : vector<2x16xf32>
    %c48 = arith.constant 48 : index
    %c0_169 = arith.constant 0 : index
    %410 = vector.load %arg1[%c48, %c0_169] : memref<64x16xf32, #tpu.memory_space<vmem>>, vector<2x10xf32>
    %c40 = arith.constant 40 : index
    %c0_170 = arith.constant 0 : index
    %411 = vector.load %arg0[%c40, %c0_170] : memref<776x128xf32, #tpu.memory_space<vmem>>, vector<10x13xf32>
    %cst_171 = arith.constant dense<0.000000e+00> : vector<2x13xf32>
    %412 = tpu.matmul %410, %411, %cst_171 {dimension_numbers = #tpu.dot_dimension_numbers<[1], [0], [0], [1], [0, 0, 1, 1], [], []>} : vector<2x10xf32>, vector<10x13xf32>, vector<2x13xf32> -> vector<2x13xf32>
    %c56 = arith.constant 56 : index
    %c0_172 = arith.constant 0 : index
    %413 = vector.load %arg0[%c56, %c0_172] : memref<776x128xf32, #tpu.memory_space<vmem>>, vector<1x13xf32>
    %414 = vector.broadcast %413 : vector<1x13xf32> to vector<2x13xf32>
    %415 = arith.addf %412, %414 : vector<2x13xf32>
    %cst_173 = arith.constant 0.000000e+00 : f32
    %416 = vector.broadcast %cst_173 : f32 to vector<2x13xf32>
    %417 = arith.maximumf %415, %416 : vector<2x13xf32>
    %c56_174 = arith.constant 56 : index
    %c0_175 = arith.constant 0 : index
    %418 = vector.load %arg1[%c56_174, %c0_175] : memref<64x16xf32, #tpu.memory_space<vmem>>, vector<2x3xf32>
    %c656 = arith.constant 656 : index
    %c0_176 = arith.constant 0 : index
    %419 = vector.load %arg0[%c656, %c0_176] : memref<776x128xf32, #tpu.memory_space<vmem>>, vector<1x16xf32>
    %420 = vector.broadcast %419 : vector<1x16xf32> to vector<2x16xf32>
    %421 = arith.mulf %409, %420 : vector<2x16xf32>
    %c664 = arith.constant 664 : index
    %c0_177 = arith.constant 0 : index
    %422 = vector.load %arg0[%c664, %c0_177] : memref<776x128xf32, #tpu.memory_space<vmem>>, vector<1x16xf32>
    %423 = vector.broadcast %422 : vector<1x16xf32> to vector<2x16xf32>
    %424 = arith.addf %421, %423 : vector<2x16xf32>
    %c704 = arith.constant 704 : index
    %c0_178 = arith.constant 0 : index
    %425 = vector.load %arg0[%c704, %c0_178] : memref<776x128xf32, #tpu.memory_space<vmem>>, vector<16x16xf32>
    %cst_179 = arith.constant dense<0.000000e+00> : vector<2x16xf32>
    %426 = tpu.matmul %424, %425, %cst_179 {dimension_numbers = #tpu.dot_dimension_numbers<[1], [0], [0], [1], [0, 0, 1, 1], [], []>} : vector<2x16xf32>, vector<16x16xf32>, vector<2x16xf32> -> vector<2x16xf32>
    %c672 = arith.constant 672 : index
    %c0_180 = arith.constant 0 : index
    %427 = vector.load %arg0[%c672, %c0_180] : memref<776x128xf32, #tpu.memory_space<vmem>>, vector<1x13xf32>
    %428 = vector.broadcast %427 : vector<1x13xf32> to vector<2x13xf32>
    %429 = arith.mulf %417, %428 : vector<2x13xf32>
    %c680 = arith.constant 680 : index
    %c0_181 = arith.constant 0 : index
    %430 = vector.load %arg0[%c680, %c0_181] : memref<776x128xf32, #tpu.memory_space<vmem>>, vector<1x13xf32>
    %431 = vector.broadcast %430 : vector<1x13xf32> to vector<2x13xf32>
    %432 = arith.addf %429, %431 : vector<2x13xf32>
    %c720 = arith.constant 720 : index
    %c0_182 = arith.constant 0 : index
    %433 = vector.load %arg0[%c720, %c0_182] : memref<776x128xf32, #tpu.memory_space<vmem>>, vector<13x16xf32>
    %cst_183 = arith.constant dense<0.000000e+00> : vector<2x16xf32>
    %434 = tpu.matmul %432, %433, %cst_183 {dimension_numbers = #tpu.dot_dimension_numbers<[1], [0], [0], [1], [0, 0, 1, 1], [], []>} : vector<2x13xf32>, vector<13x16xf32>, vector<2x16xf32> -> vector<2x16xf32>
    %435 = arith.addf %426, %434 : vector<2x16xf32>
    %c688 = arith.constant 688 : index
    %c0_184 = arith.constant 0 : index
    %436 = vector.load %arg0[%c688, %c0_184] : memref<776x128xf32, #tpu.memory_space<vmem>>, vector<1x3xf32>
    %437 = vector.broadcast %436 : vector<1x3xf32> to vector<2x3xf32>
    %438 = arith.mulf %418, %437 : vector<2x3xf32>
    %c696 = arith.constant 696 : index
    %c0_185 = arith.constant 0 : index
    %439 = vector.load %arg0[%c696, %c0_185] : memref<776x128xf32, #tpu.memory_space<vmem>>, vector<1x3xf32>
    %440 = vector.broadcast %439 : vector<1x3xf32> to vector<2x3xf32>
    %441 = arith.addf %438, %440 : vector<2x3xf32>
    %c736 = arith.constant 736 : index
    %c0_186 = arith.constant 0 : index
    %442 = vector.load %arg0[%c736, %c0_186] : memref<776x128xf32, #tpu.memory_space<vmem>>, vector<3x16xf32>
    %cst_187 = arith.constant dense<0.000000e+00> : vector<2x16xf32>
    %443 = tpu.matmul %441, %442, %cst_187 {dimension_numbers = #tpu.dot_dimension_numbers<[1], [0], [0], [1], [0, 0, 1, 1], [], []>} : vector<2x3xf32>, vector<3x16xf32>, vector<2x16xf32> -> vector<2x16xf32>
    %444 = arith.addf %435, %443 : vector<2x16xf32>
    %c744 = arith.constant 744 : index
    %c0_188 = arith.constant 0 : index
    %445 = vector.load %arg0[%c744, %c0_188] : memref<776x128xf32, #tpu.memory_space<vmem>>, vector<1x16xf32>
    %446 = vector.broadcast %445 : vector<1x16xf32> to vector<2x16xf32>
    %447 = arith.addf %444, %446 : vector<2x16xf32>
    %cst_189 = arith.constant 0.000000e+00 : f32
    %448 = vector.broadcast %cst_189 : f32 to vector<2x16xf32>
    %449 = arith.maximumf %447, %448 : vector<2x16xf32>
    %c752 = arith.constant 752 : index
    %c0_190 = arith.constant 0 : index
    %450 = vector.load %arg0[%c752, %c0_190] : memref<776x128xf32, #tpu.memory_space<vmem>>, vector<16x1xf32>
    %cst_191 = arith.constant dense<0.000000e+00> : vector<2x1xf32>
    %451 = tpu.matmul %449, %450, %cst_191 {dimension_numbers = #tpu.dot_dimension_numbers<[1], [0], [0], [1], [0, 0, 1, 1], [], []>} : vector<2x16xf32>, vector<16x1xf32>, vector<2x1xf32> -> vector<2x1xf32>
    %c768 = arith.constant 768 : index
    %c0_192 = arith.constant 0 : index
    %452 = vector.load %arg0[%c768, %c0_192] : memref<776x128xf32, #tpu.memory_space<vmem>>, vector<1x1xf32>
    %453 = vector.broadcast %452 : vector<1x1xf32> to vector<2x1xf32>
    %454 = arith.addf %451, %453 : vector<2x1xf32>
    %c0_193 = arith.constant 0 : index
    %c0_194 = arith.constant 0 : index
    %455 = vector.load %arg4[%c0_193, %c0_194] : memref<2x1xf32, #tpu.memory_space<vmem>>, vector<2x1xf32>
    tpu.vector_store %arg4[%c0_193, %c0_194], %454 {strides = array<i32>} : memref<2x1xf32, #tpu.memory_space<vmem>>, vector<2x1xf32>,
    return
  }
}

</mosaic_0001>

<bundles_post_ra>
// kernel: artnet_forward_pallas.1
= control target key start
LH: loop header
LB: loop body
LE: loop exit
PB: predicated region body
PF: predicated region fallthrough
CT: control target
= control target key end

     0   :  { %9 = vsyncpa [#allocation3], 0  ;;  %s5886_s15 = smov [#allocation2]   ;;  %s6595_s0 = inlined_call_operand.hbm [shape: f32[776,128], index: 0, kind: input, shape index: {}]   ;;  %s6596_s1 = inlined_call_operand.vmem [shape: f32[64,16], index: 1, kind: input, shape index: {}]   ;;  %s6597_s2 = inlined_call_operand.vmem [shape: s32[32,8], index: 2, kind: input, shape index: {}]   ;;  %s6598_s3 = inlined_call_operand.vmem [shape: s32[8,32], index: 3, kind: input, shape index: {}]   ;;  %s6599_s4 = inlined_call_operand.vmem [shape: f32[2,1], index: 4, kind: output, shape index: {}]  }
   0x1   :  { %s15_s16 = sshll.u32 %s5886_s15, 4  ;;  %s16_s16 = int_to_ptr.vmem [resolvable:$true] %s15_s16 }
   0x2   :  { %s5872_s17 = scalar_lea.vmem %s16_s16, 12416  ;;  %p5877_p1 = scmp.lt.s32.totalorder %s16_s16, %s16_s16 }
   0x3   :  { %p5873_p0 = scmp.ne.s32.totalorder %s16_s16, %s5872_s17  ;;  %p5878_p2 = scmp.lt.s32.totalorder %s5872_s17, %s5872_s17 }
   0x5   :  { %p5879_p3 = por %p5878_p2, %p5877_p1 }
   0x7   :  { %p5880_p4 = pnand %p5879_p3, %p5873_p0 }
   0x9   :  { %5883 = shalt.err (!%p5880_p4)
}
   0xa   :  { %s5887_s18 = smov 128   ;;  %s5888_s19 = smov 8  }
   0xb   :  { %21 = dma.hbm_to_vmem [thread:$0]  %s6595_s0, 12416, %s16_s16, [#allocation3], %s5887_s18, %s5887_s18, %s5888_s19  }
   0xc   :  { %5884 = dma.done.wait [#allocation3], 12416  }
   0xd   :  { %5885 = vsyncadd [#allocation3], 4294954880  ;;  %vm137_vm0 = vcmask 1040384   ;;  %vm130_vm1 = vcmask 72704   ;;  %v124_v0 = vld [vmem:[#allocation2 + $0x8] sm:$0x1]  ;;  %v31_v23 = vlaneseq }
   0xe   :  { %v123_v1 = vld [vmem:[#allocation2] sm:$0xff]  ;;  %5277 = vmatprep.subr.msk.mxu0 %vm137_vm0, %v124_v0  ;;  %v122_v3 = vld [vmem:[%s6596_s1 + $0x8] sm:$0xff]  ;;  %v35_v7 = vld [vmem:[%s6597_s2 + $0x10] sm:$0xff]  ;;  %vm241_vm2 = vcmask 1045504   ;;  %v5889_v8 = vmov 0   ;;  %vm228_vm3 = vcmask 48128  }
   0xf   :  { %v121_v2 = vld [vmem:[%s6596_s1] sm:$0xff]  ;;  %5278 = vmatpush3.msk.msra.mxu0 %vm137_vm0, %v124_v0  ;;  %v335_v4 = vld [vmem:[#allocation2 + $0x48] sm:$0xff]  ;;  %5758 = vset.pattern.permute.xlu0 %v5889_v8  ;;  %v222_v9 = vld [vmem:[#allocation2 + $0x18] sm:$0x3f]  ;;  %v5890_v15 = vmov 1   ;;  %vm341_vm4 = vcmask 130048  }
  0x10   :  { %5281 = vmatprep.mubr.msk.f32.mxu0 %vm130_vm1, %v121_v2  ;;  %5279 = vmatprep.subr.mxu0 %v123_v1  ;;  %v334_v5 = vld [vmem:[#allocation2 + $0x40] sm:$0xff]  ;;  %v218_v10 = vld [vmem:[%s6596_s1 + $0x10] sm:$0xff]  ;;  %v219_v11 = vld [vmem:[%s6596_s1 + $0x18] sm:$0xff]  ;;  %v5963_v24 = vand.u32 127, %v31_v23  ;;  %v5891_v26 = vmov 0.0   ;;  %vm628_vm15 = vcmask 64512  }
  0x11   :  { %5280 = vmatpush3.msra.mxu0 %v123_v1  ;;  %v33_v6 = vld [vmem:[%s6597_s2] sm:$0xff]  ;;  %5759 = vset.pattern.permute.xlu1 %v5889_v8  ;;  %v34_v12 = vld [vmem:[%s6597_s2 + $0x8] sm:$0xff]  ;;  %v36_v13 = vld [vmem:[%s6597_s2 + $0x18] sm:$0xff]  ;;  %vm726_vm0 = vcmask 261120   ;;  %s5892_s15 = smov 32   ;;  %s5893_s18 = smov 64  }
  0x12   :  { %5282 = vmatmul.mubr.msk.f32.vlgmr.msra.gmra.mxu0 %vm130_vm1, %v122_v3  ;;  %5292 = vmatprep.subr.mxu0 %v335_v4  ;;  %v220_v14 = vld [vmem:[%s6596_s1 + $0x20] sm:$0xff]  ;;  %v4885_v16 = vld [vmem:[#allocation2 + $0x10] ss:$0 sm:$0xff]  ;;  %v221_v28 = vld [vmem:[%s6596_s1 + $0x28] sm:$0xff]  ;;  %s5894_s19 = smov 96   ;;  %s5895_s20 = smov 127  }
  0x13   :  { %5293 = vmatpush3.msra.mxu0 %v335_v4  ;;  %38 = vperm.xlu0 %5758, %v33_v6   ;;  %v4895_v35 = vld [vmem:[#allocation2 + $0x50] ss:$0 sm:$0xff]  ;;  %v4889_v43 = vld [vmem:[#allocation2 + $0x20] ss:$0 sm:$0xff]  ;;  %v627_v54 = vld [vmem:[#allocation2 + $0x78] sm:$0xff] }
  0x14   :  { %5294 = vmatprep.subr.mxu0 %v334_v5  ;;  %44 = vperm.xlu1 %5759, %v35_v7   ;;  %v626_v55 = vld [vmem:[#allocation2 + $0x70] sm:$0xff]  ;;  %v625_v59 = vld [vmem:[#allocation2 + $0x68] sm:$0xff]  ;;  %v624_v4 = vld [vmem:[#allocation2 + $0x60] sm:$0xff] }
  0x15   :  { %5295 = vmatpush3.msra.mxu0 %v334_v5  ;;  %5284 = vmatprep.subr.msk.mxu1 %vm241_vm2, %v222_v9  ;;  %v623_v5 = vld [vmem:[#allocation2 + $0x58] sm:$0xff] }
  0x16   :  { %5286 = vmatprep.mubr.msk.f32.mxu1 %vm228_vm3, %v218_v10  ;;  %5285 = vmatpush3.msk.msra.mxu1 %vm241_vm2, %v222_v9  ;;  %v861_v9 = vld [vmem:[#allocation2 + $0xa8] sm:$0xff]  ;;  %v860_v10 = vld [vmem:[#allocation2 + $0xa0] sm:$0xff] }
  0x17   :  { %5287 = vmatmul.mubr.msk.f32.vlgmr.msra.gmra.mxu1 %vm228_vm3, %v219_v11  ;;  %41 = vperm.xlu0 %5758, %v34_v12  }
  0x18   :  { %47 = vperm.xlu1 %5759, %v36_v13   ;;  %5289 = vmatprep.mubr.msk.f32.mxu1 %vm228_vm3, %v220_v14 }
  0x1b   :  { %5760 = vset.pattern.permute.xlu0 %v5890_v15  ;;  %5290 = vmatmul.mubr.msk.f32.gmra.mxu1 %vm228_vm3, %v221_v28  ;;  %vm864_vm3 = vcmask 523264  }
  0x1c   :  { %5761 = vset.pattern.permute.xlu1 %v5890_v15  ;;  %62 = vperm.xlu0 %5760, %v33_v6   ;;  %v863_v6 = vld [vmem:[#allocation2 + $0xb8] sm:$0xff] }
  0x1d   :  { %65 = vperm.xlu1 %5761, %v34_v12  }
  0x20   :  { %71 = vperm.xlu0 %5760, %v36_v13  }
  0x21   :  { %68 = vperm.xlu1 %5761, %v35_v7   ;;  %v862_v7 = vld [vmem:[#allocation2 + $0xb0] sm:$0xff] }
  0x24   :  { %5762 = vset.pattern.permute.xlu0 %v5889_v8 }
  0x25   :  { %5763 = vset.pattern.permute.xlu1 %v5889_v8 }
  0x8e   :  { %v39_v25 = vpop.permute.xlu0 %38 }
  0x8f   :  { %vm49_vm5 = vcmp.eq.s32.totalorder %v5963_v24, %v39_v25  ;;  %v45_v32 = vpop.permute.xlu1 %44 }
  0x90   :  { %v5967_v27 = vsel %vm49_vm5, 1.0, %v5891_v26  ;;  %vm51_vm8 = vcmp.eq.s32.totalorder %v5963_v24, %v45_v32 }
  0x91   :  { %5303 = vmatprep.mubr.msk.f32.mxu1 %vm341_vm4, %v5967_v27  ;;  %v5999_v51 = vsel %vm51_vm8, 1.0, %v5891_v26 }
  0x92   :  { %v42_v29 = vpop.permute.xlu0 %41 }
  0x93   :  { %v48_v33 = vpop.permute.xlu1 %47  ;;  %vm50_vm12 = vcmp.eq.s32.totalorder %v5963_v24, %v42_v29 }
  0x94   :  { %v6008_v53 = vsel %vm50_vm12, 1.0, %v5891_v26  ;;  %vm52_vm14 = vcmp.eq.s32.totalorder %v5963_v24, %v48_v33 }
  0x95   :  { %v6025_v60 = vsel %vm52_vm14, 1.0, %v5891_v26 }
  0x97   :  { %v63_v30 = vpop.permute.xlu0 %62 }
  0x98   :  { %vm73_vm6 = vcmp.eq.s32.totalorder %v5963_v24, %v63_v30  ;;  %v66_v34 = vpop.permute.xlu1 %65 }
  0x99   :  { %v5977_v31 = vsel %vm73_vm6, 1.0, %v5891_v26  ;;  %vm74_vm9 = vcmp.eq.s32.totalorder %v5963_v24, %v66_v34 }
  0x9a   :  { %v5994_v49 = vsel %vm74_vm9, 1.0, %v5891_v26 }
  0x9b   :  { %v72_v47 = vpop.permute.xlu0 %71  ;;  %vm975_vm12 = vcmp.gt.f32.partialorder %v5994_v49, 0.0 }
  0x9c   :  { %v69_v40 = vpop.permute.xlu1 %68  ;;  %vm76_vm13 = vcmp.eq.s32.totalorder %v5963_v24, %v72_v47 }
  0x9d   :  { %vm75_vm11 = vcmp.eq.s32.totalorder %v5963_v24, %v69_v40  ;;  %v6020_v57 = vsel %vm76_vm13, 1.0, %v5891_v26 }
  0x9e   :  { %v6004_v52 = vsel %vm75_vm11, 1.0, %v5891_v26  ;;  %vm974_vm11 = vcmp.gt.f32.partialorder %v5977_v31, 0.0  ;;  %vm977_vm14 = vcmp.gt.f32.partialorder %v6020_v57, 0.0 }
  0x9f   :  { %vm976_vm13 = vcmp.gt.f32.partialorder %v6004_v52, 0.0 }
  0xd2   :  { %v5283_v17 = vpop.f32.mrf.mxu0 }
  0xd3   :  { %v213_v18 = vadd.f32 %v5283_v17, %v4885_v16 }
  0xd4   :  { %v207_v19 = vpop.f32.mrf.mxu0 }
  0xd5   :  { %v208_v20 = vadd.f32 %v4885_v16, %v207_v19  ;;  %v217_v22 = vmax.f32 %v213_v18, 0.0  ;;  %v859_v19 = vld [vmem:[#allocation2 + $0x98] sm:$0xff] }
  0xd7   :  { %v216_v21 = vmax.f32 %v208_v20, 0.0  ;;  %v5288_v37 = vpop.f32.mrf.mxu1  ;;  %v858_v20 = vld [vmem:[#allocation2 + $0x90] sm:$0xff] }
  0xd8   :  { %v317_v56 = vadd.f32 %v5288_v37, %v4889_v43 }
  0xd9   :  { %5296 = vmatprep.mubr.msk.f32.mxu0 %vm341_vm4, %v216_v21  ;;  %v311_v44 = vpop.f32.mrf.mxu1  ;;  %v857_v21 = vld [vmem:[#allocation2 + $0x88] sm:$0xff] }
  0xda   :  { %5297 = vmatmul.mubr.msk.f32.vlgmr.msra.gmra.mxu0 %vm341_vm4, %v217_v22  ;;  %v312_v50 = vadd.f32 %v4889_v43, %v311_v44  ;;  %v331_v61 = vmax.f32 %v317_v56, 0.0  ;;  %v856_v22 = vld [vmem:[#allocation2 + $0x80] sm:$0xff] }
  0xdb   :  { %5313 = vmatprep.mubr.msk.f32.mxu0 %vm341_vm4, %v5977_v31  ;;  %v5291_v62 = vpop.f32.mrf.mxu1 }
  0xdc   :  { %v330_v58 = vmax.f32 %v312_v50, 0.0  ;;  %v327_v63 = vadd.f32 %v5291_v62, %v4889_v43 }
  0xdd   :  { %v321_v0 = vpop.f32.mrf.mxu1 }
  0xde   :  { %v322_v1 = vadd.f32 %v4889_v43, %v321_v0  ;;  %v333_v2 = vmax.f32 %v327_v63, 0.0 }
  0xe0   :  { %v332_v3 = vmax.f32 %v322_v1, 0.0 }
 0x19a   :  { %v5298_v36 = vpop.f32.mrf.mxu0 }
 0x19b   :  { %v420_v38 = vadd.f32 %v5298_v36, %v4895_v35 }
 0x19c   :  { %v414_v39 = vpop.f32.mrf.mxu0 }
 0x19d   :  { %vm424_vm7 = vcmp.gt.f32.partialorder %v420_v38, 0.0  ;;  %v426_v41 = vmul.f32 0.01, %v420_v38  ;;  %v415_v42 = vadd.f32 %v4895_v35, %v414_v39 }
 0x19f   :  { %v5983_v45 = vsel %vm424_vm7, %v420_v38, %v426_v41  ;;  %vm423_vm10 = vcmp.gt.f32.partialorder %v415_v42, 0.0  ;;  %v425_v46 = vmul.f32 0.01, %v415_v42 }
 0x1a0   :  { %5299 = vmatprep.subr.mxu1 %v5983_v45  ;;  %5309 = vmatprep.subr.mxu0 %v5983_v45 }
 0x1a1   :  { %v5989_v48 = vsel %vm423_vm10, %v415_v42, %v425_v46  ;;  %5300 = vmatpush3.msra.mxu1 %v5983_v45  ;;  %5310 = vmatpush3.msra.mxu0 %v5983_v45 }
 0x1a2   :  { %5301 = vmatprep.subr.mxu1 %v5989_v48  ;;  %5311 = vmatprep.subr.mxu0 %v5989_v48 }
 0x1a3   :  { %5302 = vmatpush3.msra.mxu1 %v5989_v48  ;;  %5312 = vmatpush3.msra.mxu0 %v5989_v48 }
 0x1a4   :  { %5304 = vmatmul.mubr.msk.f32.vlgmr.msra.gmra.mxu1 %vm341_vm4, %v6008_v53  ;;  %5314 = vmatmul.mubr.msk.f32.vlgmr.msra.gmra.mxu0 %vm341_vm4, %v5994_v49 }
 0x1a5   :  { %5306 = vmatprep.mubr.msk.f32.mxu1 %vm341_vm4, %v5999_v51  ;;  %5316 = vmatprep.mubr.msk.f32.mxu0 %vm341_vm4, %v6004_v52 }
 0x1a6   :  { %5319 = vmatprep.subr.mxu1 %v627_v54  ;;  %5327 = vmatprep.subr.mxu0 %v626_v55 }
 0x1a7   :  { %5320 = vmatpush3.msra.mxu1 %v627_v54  ;;  %5328 = vmatpush3.msra.mxu0 %v626_v55 }
 0x1a8   :  { %5307 = vmatmul.mubr.msk.f32.gmra.mxu1 %vm341_vm4, %v6025_v60  ;;  %5317 = vmatmul.mubr.msk.f32.gmra.mxu0 %vm341_vm4, %v6020_v57 }
 0x1a9   :  { %5321 = vmatprep.mubr.msk.f32.mxu1 %vm628_vm15, %v330_v58  ;;  %5329 = vmatprep.subr.mxu0 %v625_v59 }
 0x1aa   :  { %5330 = vmatpush3.msra.mxu0 %v625_v59  ;;  %5341 = vmatprep.subr.mxu1 %v863_v6 }
 0x1ab   :  { %5331 = vmatprep.subr.mxu0 %v624_v4 }
 0x1ac   :  { %5322 = vmatmul.mubr.msk.f32.vlgmr.msra.gmra.mxu1 %vm628_vm15, %v331_v61  ;;  %5332 = vmatpush3.msra.mxu0 %v624_v4 }
 0x1ad   :  { %5324 = vmatprep.mubr.msk.f32.mxu1 %vm628_vm15, %v332_v3  ;;  %5333 = vmatprep.subr.mxu0 %v623_v5 }
 0x1ae   :  { %5334 = vmatpush3.msra.mxu0 %v623_v5  ;;  %5342 = vmatpush3.msra.mxu1 %v863_v6 }
 0x1af   :  { %5343 = vmatprep.subr.mxu1 %v862_v7 }
 0x1b0   :  { %5325 = vmatmul.mubr.msk.f32.gmra.mxu1 %vm628_vm15, %v333_v2 }
 0x1b1   :  { %5344 = vmatpush3.msra.mxu1 %v862_v7 }
 0x1b2   :  { %5345 = vmatprep.subr.mxu1 %v861_v9 }
 0x1b3   :  { %5346 = vmatpush3.msra.mxu1 %v861_v9 }
 0x1b4   :  { %5347 = vmatprep.subr.mxu1 %v860_v10 }
 0x1b5   :  { %5348 = vmatpush3.msra.mxu1 %v860_v10 }
 0x1b6   :  { %5349 = vmatprep.subr.mxu1 %v859_v19 }
 0x1b7   :  { %5350 = vmatpush3.msra.mxu1 %v859_v19 }
 0x1b8   :  { %5351 = vmatprep.subr.mxu1 %v858_v20 }
 0x1b9   :  { %5352 = vmatpush3.msra.mxu1 %v858_v20 }
 0x1ba   :  { %5353 = vmatprep.subr.mxu1 %v857_v21 }
 0x1bb   :  { %5354 = vmatpush3.msra.mxu1 %v857_v21 }
 0x1bc   :  { %5355 = vmatprep.subr.mxu1 %v856_v22 }
 0x1bd   :  { %5356 = vmatpush3.msra.mxu1 %v856_v22 }
 0x264   :  { %v6035_v11 = vpop.f32.mrf.mxu1  ;;  %v5315_v12 = vpop.f32.mrf.mxu0 }
 0x265   :  { %842 = vrot.lane.b32.xlu0 %v5315_v12, %s5892_s15 }
 0x266   :  { %v6038_v13 = vpop.f32.mrf.mxu1  ;;  %v604_v14 = vpop.f32.mrf.mxu0 }
 0x267   :  { %5335 = vmatprep.mubr.msk.f32.mxu0 %vm726_vm0, %v6038_v13  ;;  %840 = vrot.lane.b32.xlu1 %v604_v14, %s5892_s15 }
 0x268   :  { %v6043_v15 = vpop.f32.mrf.mxu1  ;;  %5336 = vmatmul.mubr.msk.f32.vlgmr.msra.gmra.mxu0 %vm726_vm0, %v6035_v11  ;;  %v5318_v16 = vpop.f32.mrf.mxu0 }
 0x269   :  { %846 = vrot.lane.b32.xlu0 %v5318_v16, %s5892_s15 }
 0x26a   :  { %v6048_v17 = vpop.f32.mrf.mxu1  ;;  %v614_v18 = vpop.f32.mrf.mxu0 }
 0x26b   :  { %5338 = vmatprep.mubr.msk.f32.mxu0 %vm726_vm0, %v6048_v17  ;;  %844 = vrot.lane.b32.xlu1 %v614_v18, %s5892_s15 }
 0x26c   :  { %5339 = vmatmul.mubr.msk.f32.gmra.mxu0 %vm726_vm0, %v6043_v15  ;;  %v5323_v25 = vpop.f32.mrf.mxu1 }
 0x26e   :  { %v707_v28 = vpop.f32.mrf.mxu1 }
 0x270   :  { %v5326_v30 = vpop.f32.mrf.mxu1 }
 0x272   :  { %v717_v37 = vpop.f32.mrf.mxu1 }
 0x2d7   :  { %v843_v42 = vpop.permute.xlu0 %842 }
 0x2d9   :  { %v841_v38 = vpop.permute.xlu1 %840 }
 0x2db   :  { %v847_v61 = vpop.permute.xlu0 %846 }
 0x2dd   :  { %v845_v58 = vpop.permute.xlu1 %844 }
 0x328   :  { %v5337_v29 = vpop.f32.mrf.mxu0 }
 0x329   :  { %v811_v32 = vadd.f32 %v5337_v29, %v5323_v25 }
 0x32a   :  { %v805_v33 = vpop.f32.mrf.mxu0 }
 0x32b   :  { %vm825_vm1 = vcmp.gt.f32.partialorder %v811_v32, 0.0  ;;  %v829_v34 = vmul.f32 0.01, %v811_v32  ;;  %v806_v35 = vadd.f32 %v805_v33, %v707_v28 }
 0x32c   :  { %v5340_v36 = vpop.f32.mrf.mxu0 }
 0x32d   :  { %vm824_vm2 = vcmp.gt.f32.partialorder %v806_v35, 0.0  ;;  %v828_v39 = vmul.f32 0.01, %v806_v35  ;;  %v821_v40 = vadd.f32 %v5340_v36, %v5326_v30  ;;  %v833_v41 = vsel %vm825_vm1, %v811_v32, %v829_v34 }
 0x32e   :  { %v815_v43 = vpop.f32.mrf.mxu0  ;;  %v853_v54 = vsel %vm726_vm0, %v833_v41, %v843_v42 }
 0x32f   :  { %v832_v44 = vsel %vm824_vm2, %v806_v35, %v828_v39  ;;  %vm827_vm5 = vcmp.gt.f32.partialorder %v821_v40, 0.0  ;;  %v831_v46 = vmul.f32 0.01, %v821_v40  ;;  %v816_v47 = vadd.f32 %v815_v43, %v717_v37 }
 0x330   :  { %v852_v50 = vsel %vm726_vm0, %v832_v44, %v841_v38 }
 0x331   :  { %vm826_vm6 = vcmp.gt.f32.partialorder %v816_v47, 0.0  ;;  %v830_v55 = vmul.f32 0.01, %v816_v47  ;;  %5357 = vmatprep.mubr.msk.f32.mxu1 %vm864_vm3, %v852_v50  ;;  %v835_v56 = vsel %vm827_vm5, %v821_v40, %v831_v46 }
 0x332   :  { %5358 = vmatmul.mubr.msk.f32.vlgmr.msra.gmra.mxu1 %vm864_vm3, %v853_v54  ;;  %v855_v63 = vsel %vm726_vm0, %v835_v56, %v847_v61 }
 0x333   :  { %v834_v59 = vsel %vm826_vm6, %v816_v47, %v830_v55 }
 0x334   :  { %v854_v62 = vsel %vm726_vm0, %v834_v59, %v845_v58  ;;  %v6094_v58 = vshrl.u32 %v31_v23, 7  ;;  %v4880_v59 = vld [vmem:[%s6598_s3] ss:$0 sm:$0xff] }
 0x335   :  { %5360 = vmatprep.mubr.msk.f32.mxu1 %vm864_vm3, %v854_v62 }
 0x336   :  { %5361 = vmatmul.mubr.msk.f32.gmra.mxu1 %vm864_vm3, %v855_v63  ;;  %vm107_vm15 = vcmp.eq.s32.totalorder %v6094_v58, %v4880_v59 }
 0x337   :  { %v6101_v61 = vsel %vm107_vm15, 1.0, %v5891_v26  ;;  %vm3094_vm15 = vcmask 1041408  }
 0x338   :  { %5371 = vmatprep.mubr.msk.f32.mxu0 %vm726_vm0, %v6101_v61  ;;  %5406 = vmatprep.mubr.msk.f32.mxu1 %vm726_vm0, %v6101_v61 }
 0x3f2   :  { %v5359_v0 = vpop.f32.mrf.mxu1 }
 0x3f3   :  { %vm963_vm7 = vcmp.gt.f32.partialorder %v5359_v0, 0.0  ;;  %v967_v1 = vmul.f32 0.01, %v5359_v0 }
 0x3f4   :  { %v943_v2 = vpop.f32.mrf.mxu1 }
 0x3f5   :  { %vm962_vm8 = vcmp.gt.f32.partialorder %v943_v2, 0.0  ;;  %v966_v3 = vmul.f32 0.01, %v943_v2  ;;  %v6063_v4 = vsel %vm963_vm7, %v5359_v0, %v967_v1 }
 0x3f6   :  { %985 = vperm.xlu0 %5762, %v6063_v4   ;;  %v5362_v5 = vpop.f32.mrf.mxu1 }
 0x3f7   :  { %v6066_v6 = vsel %vm962_vm8, %v943_v2, %v966_v3  ;;  %v969_v10 = vmul.f32 0.01, %v5362_v5  ;;  %vm965_vm10 = vcmp.gt.f32.partialorder %v5362_v5, 0.0 }
 0x3f8   :  { %980 = vperm.xlu1 %5763, %v6066_v6   ;;  %v953_v7 = vpop.f32.mrf.mxu1 }
 0x3f9   :  { %vm964_vm9 = vcmp.gt.f32.partialorder %v953_v7, 0.0  ;;  %v968_v9 = vmul.f32 0.01, %v953_v7  ;;  %v973_v14 = vsel %vm965_vm10, %v5362_v5, %v969_v10 }
 0x3fb   :  { %v972_v12 = vsel %vm964_vm9, %v953_v7, %v968_v9 }
 0x3fc   :  { %990 = vperm.xlu1 %5763, %v972_v12  }
 0x400   :  { %995 = vperm.xlu1 %5763, %v973_v14  }
 0x471   :  { %v986_v18 = vpop.permute.xlu0 %985 }
 0x472   :  { %v999_v21 = vsel %vm975_vm12, %v986_v18, -1e+30 }
 0x473   :  { %v981_v16 = vpop.permute.xlu1 %980  ;;  %v1003_v30 = vsel %vm341_vm4, %v999_v21, -inf }
 0x474   :  { %v998_v20 = vsel %vm974_vm11, %v981_v16, -1e+30 }
 0x475   :  { %v1002_v25 = vsel %vm341_vm4, %v998_v20, -inf }
 0x476   :  { %v1006_v34 = vmax.f32 %v1002_v25, %v1003_v30  ;;  %v1219_v25 = vld [vmem:[#allocation2 + $0xd0] sm:$0xff] }
 0x477   :  { %v991_v19 = vpop.permute.xlu1 %990 }
 0x478   :  { %v1000_v22 = vsel %vm976_vm13, %v991_v19, -1e+30  ;;  %v101_v19 = vadd.s32 8, %v6094_v58 }
 0x479   :  { %v1004_v32 = vsel %vm341_vm4, %v1000_v22, -inf  ;;  %v1220_v22 = vld [vmem:[#allocation2 + $0xd8] sm:$0xff] }
 0x47a   :  { %vm108_vm1 = vcmp.eq.s32.totalorder %v101_v19, %v4880_v59  ;;  %v1515_v59 = vld [vmem:[#allocation2 + $0x120] sm:$0xff] }
 0x47b   :  { %v996_v28 = vpop.permute.xlu1 %995  ;;  %v6111_v20 = vsel %vm108_vm1, 1.0, %v5891_v26 }
 0x47c   :  { %v1001_v29 = vsel %vm977_vm14, %v996_v28, -1e+30  ;;  %v1218_v28 = vld [vmem:[#allocation2 + $0xc8] sm:$0xff] }
 0x47d   :  { %v1005_v33 = vsel %vm341_vm4, %v1001_v29, -inf  ;;  %v1217_v29 = vld [vmem:[#allocation2 + $0xc0] sm:$0xff] }
 0x47e   :  { %v1007_v35 = vmax.f32 %v1004_v32, %v1005_v33 }
 0x480   :  { %v1008_v36 = vmax.f32 %v1006_v34, %v1007_v35 }
 0x482   :  { %v1009_v37 = vrot.slane %v1008_v36, 4 }
 0x484   :  { %v1010_v38 = vmax.f32 %v1008_v36, %v1009_v37 }
 0x486   :  { %v1011_v39 = vrot.slane %v1010_v38, 2 }
 0x488   :  { %v1012_v40 = vmax.f32 %v1010_v38, %v1011_v39 }
 0x48a   :  { %v1013_v41 = vrot.slane %v1012_v40, 1 }
 0x48c   :  { %v1014_v42 = vmax.f32 %v1012_v40, %v1013_v41 }
 0x48e   :  { %v1018_v43 = vmul.f32 %v6020_v57, %v1014_v42  ;;  %v1017_v44 = vmul.f32 %v6004_v52, %v1014_v42  ;;  %v1016_v50 = vmul.f32 %v5994_v49, %v1014_v42  ;;  %v1015_v55 = vmul.f32 %v5977_v31, %v1014_v42 }
 0x490   :  { %v1028_v46 = vsel %vm341_vm4, %v1018_v43, 0.0  ;;  %v1025_v47 = vsel %vm341_vm4, %v1017_v44, 0.0  ;;  %v1022_v54 = vsel %vm341_vm4, %v1016_v50, 0.0  ;;  %v1019_v56 = vsel %vm341_vm4, %v1015_v55, 0.0 }
 0x491   :  { %1029 = vadd.xlane.f32.xlu0 %v1028_v46  ;;  %1026 = vadd.xlane.f32.xlu1 %v1025_v47 }
 0x495   :  { %1023 = vadd.xlane.f32.xlu0 %v1022_v54 }
 0x499   :  { %1020 = vadd.xlane.f32.xlu0 %v1019_v56 }
 0x51a   :  { %v1030_v62 = vpop.xlane.xlu0 %1029  ;;  %v1027_v63 = vpop.xlane.xlu1 %1026 }
 0x51b   :  { %v1034_v0 = vsub.f32 %v973_v14, %v1030_v62  ;;  %v1033_v23 = vsub.f32 %v972_v12, %v1027_v63  ;;  %v1514_v62 = vld [vmem:[#allocation2 + $0x118] sm:$0xff]  ;;  %v1513_v63 = vld [vmem:[#allocation2 + $0x110] sm:$0xff] }
 0x51d   :  { %v1041_v1 = vmul.f32 1.442695, %v1034_v0  ;;  %v1039_v2 = vmul.f32 1.442695, %v1033_v23  ;;  %v1512_v0 = vld [vmem:[#allocation2 + $0x108] sm:$0xff]  ;;  %v1425_v23 = vld [vmem:[#allocation2 + $0x100] sm:$0xff] }
 0x51e   :  { %v1024_v3 = vpop.xlane.xlu0 %1023 }
 0x51f   :  { %5768 = vpow2.f32 %v1041_v1  ;;  %v1032_v5 = vsub.f32 %v6063_v4, %v1024_v3  ;;  %v1424_v1 = vld [vmem:[#allocation2 + $0xf8] sm:$0xff]  ;;  %v1422_v3 = vld [vmem:[#allocation2 + $0xe8] sm:$0xff] }
 0x520   :  { %5770 = vpow2.f32 %v1039_v2  ;;  %v1423_v2 = vld [vmem:[#allocation2 + $0xf0] sm:$0xff] }
 0x521   :  { %v1037_v7 = vmul.f32 1.442695, %v1032_v5  ;;  %v4928_v5 = vld [vmem:[#allocation2 + $0xe0] ss:$0 sm:$0xff] }
 0x522   :  { %v1021_v9 = vpop.xlane.xlu0 %1020 }
 0x523   :  { %5772 = vpow2.f32 %v1037_v7  ;;  %v1031_v10 = vsub.f32 %v6066_v6, %v1021_v9 }
 0x525   :  { %v1035_v16 = vmul.f32 1.442695, %v1031_v10 }
 0x527   :  { %5774 = vpow2.f32 %v1035_v16 }
 0x52c   :  { %v5769_v18 = vpop.eup %5768 }
 0x52d   :  { %5363 = vmatprep.subr.mxu0 %v5769_v18  ;;  %v5771_v14 = vpop.eup %5770 }
 0x52e   :  { %5364 = vmatpush3.msra.mxu0 %v5769_v18 }
 0x52f   :  { %5365 = vmatprep.subr.mxu0 %v5771_v14 }
 0x530   :  { %v5773_v12 = vpop.eup %5772  ;;  %5366 = vmatpush3.msra.mxu0 %v5771_v14 }
 0x531   :  { %5367 = vmatprep.subr.mxu0 %v5773_v12 }
 0x532   :  { %5368 = vmatpush3.msra.mxu0 %v5773_v12 }
 0x534   :  { %v5775_v4 = vpop.eup %5774 }
 0x535   :  { %5369 = vmatprep.subr.mxu0 %v5775_v4 }
 0x536   :  { %5370 = vmatpush3.msra.mxu0 %v5775_v4 }
 0x537   :  { %5372 = vmatmul.mubr.msk.f32.vlgmr.msra.gmra.mxu0 %vm726_vm0, %v6111_v20 }
 0x538   :  { %5378 = vmatprep.mubr.msk.f32.mxu0 %vm341_vm4, %v5977_v31 }
 0x5f7   :  { %v5373_v6 = vpop.f32.mrf.mxu0 }
 0x5f8   :  { %5374 = vmatprep.subr.mxu0 %v5373_v6 }
 0x5f9   :  { %v1115_v21 = vpop.f32.mrf.mxu0  ;;  %5375 = vmatpush3.msra.mxu0 %v5373_v6 }
 0x5fa   :  { %5376 = vmatprep.subr.mxu0 %v1115_v21 }
 0x5fb   :  { %5377 = vmatpush3.msra.mxu0 %v1115_v21 }
 0x5fc   :  { %5379 = vmatmul.mubr.msk.f32.vlgmr.msra.gmra.mxu0 %vm341_vm4, %v5994_v49  ;;  %5384 = vmatprep.subr.mxu0 %v1220_v22 }
 0x5fd   :  { %5381 = vmatprep.mubr.msk.f32.mxu0 %vm341_vm4, %v6004_v52  ;;  %5385 = vmatpush3.msra.mxu0 %v1220_v22 }
 0x5fe   :  { %5386 = vmatprep.subr.mxu0 %v1219_v25 }
 0x5ff   :  { %5387 = vmatpush3.msra.mxu0 %v1219_v25 }
 0x600   :  { %5382 = vmatmul.mubr.msk.f32.gmra.mxu0 %vm341_vm4, %v6020_v57  ;;  %5388 = vmatprep.subr.mxu0 %v1218_v28 }
 0x601   :  { %5389 = vmatpush3.msra.mxu0 %v1218_v28  ;;  %5392 = vmatprep.mubr.msk.f32.mxu0 %vm726_vm0, %v6038_v13 }
 0x602   :  { %5390 = vmatprep.subr.mxu0 %v1217_v29 }
 0x603   :  { %5391 = vmatpush3.msra.mxu0 %v1217_v29 }
 0x604   :  { %5393 = vmatmul.mubr.msk.f32.vlgmr.msra.gmra.mxu0 %vm726_vm0, %v6035_v11  ;;  %5409 = vmatprep.subr.mxu0 %v1425_v23 }
 0x605   :  { %5395 = vmatprep.mubr.msk.f32.mxu0 %vm726_vm0, %v6048_v17  ;;  %5410 = vmatpush3.msra.mxu0 %v1425_v23  ;;  %v1664_v23 = vld [vmem:[#allocation2 + $0x148] sm:$0xff] }
 0x606   :  { %5411 = vmatprep.subr.mxu0 %v1424_v1 }
 0x607   :  { %5412 = vmatpush3.msra.mxu0 %v1424_v1 }
 0x608   :  { %5396 = vmatmul.mubr.msk.f32.gmra.mxu0 %vm726_vm0, %v6043_v15  ;;  %5413 = vmatprep.subr.mxu0 %v1423_v2 }
 0x609   :  { %5414 = vmatpush3.msra.mxu0 %v1423_v2  ;;  %v1662_v2 = vld [vmem:[#allocation2 + $0x138] sm:$0xff] }
 0x60a   :  { %5415 = vmatprep.subr.mxu0 %v1422_v3 }
 0x60b   :  { %5416 = vmatpush3.msra.mxu0 %v1422_v3 }
 0x6bc   :  { %v5380_v30 = vpop.f32.mrf.mxu0 }
 0x6be   :  { %v1190_v32 = vpop.f32.mrf.mxu0 }
 0x6c0   :  { %v5383_v33 = vpop.f32.mrf.mxu0 }
 0x6c1   :  { %5776 = vrcp.f32 %v5383_v33 }
 0x6c2   :  { %5778 = vrcp.f32 %v5380_v30  ;;  %v1200_v34 = vpop.f32.mrf.mxu0 }
 0x6c3   :  { %5780 = vrcp.f32 %v1200_v34 }
 0x6c4   :  { %5782 = vrcp.f32 %v1190_v32  ;;  %v5394_v15 = vpop.f32.mrf.mxu0 }
 0x6c6   :  { %v1287_v40 = vpop.f32.mrf.mxu0 }
 0x6c8   :  { %v5397_v41 = vpop.f32.mrf.mxu0 }
 0x6ca   :  { %v1297_v44 = vpop.f32.mrf.mxu0 }
 0x6ce   :  { %v5777_v13 = vpop.eup %5776 }
 0x6cf   :  { %v5779_v35 = vpop.eup %5778  ;;  %v1216_v36 = vmul.f32 %v5777_v13, %v5769_v18  ;;  %v4933_v13 = vld [vmem:[#allocation2 + $0x128] ss:$0 sm:$0xff] }
 0x6d0   :  { %v5781_v37 = vpop.eup %5780  ;;  %v1212_v38 = vmul.f32 %v5779_v35, %v5773_v12  ;;  %v4936_v12 = vld [vmem:[#allocation2 + $0x130] ss:$0 sm:$0xff] }
 0x6d1   :  { %1323 = vperm.xlu1 %5763, %v1216_v36   ;;  %v1214_v11 = vmul.f32 %v5781_v37, %v5771_v14  ;;  %v5783_v17 = vpop.eup %5782 }
 0x6d2   :  { %v1210_v39 = vmul.f32 %v5783_v17, %v5775_v4 }
 0x6d3   :  { %1318 = vperm.xlu0 %5762, %v1214_v11  }
 0x6d5   :  { %1313 = vperm.xlu1 %5763, %v1212_v38  }
 0x6d9   :  { %1308 = vperm.xlu1 %5763, %v1210_v39  }
 0x74c   :  { %v1324_v42 = vpop.permute.xlu1 %1323 }
 0x74d   :  { %v1329_v43 = vmul.f32 %v5397_v41, %v1324_v42 }
 0x74e   :  { %v1319_v46 = vpop.permute.xlu0 %1318 }
 0x74f   :  { %v1328_v47 = vmul.f32 %v1319_v46, %v1297_v44  ;;  %5398 = vmatprep.subr.mxu1 %v1329_v43 }
 0x750   :  { %v1314_v50 = vpop.permute.xlu1 %1313  ;;  %5399 = vmatpush3.msra.mxu1 %v1329_v43 }
 0x751   :  { %v1327_v54 = vmul.f32 %v5394_v15, %v1314_v50  ;;  %5400 = vmatprep.subr.mxu1 %v1328_v47 }
 0x752   :  { %5401 = vmatpush3.msra.mxu1 %v1328_v47 }
 0x753   :  { %5402 = vmatprep.subr.mxu1 %v1327_v54 }
 0x754   :  { %v1309_v55 = vpop.permute.xlu1 %1308  ;;  %5403 = vmatpush3.msra.mxu1 %v1327_v54 }
 0x755   :  { %v1326_v56 = vmul.f32 %v1309_v55, %v1287_v40 }
 0x757   :  { %5404 = vmatprep.subr.mxu1 %v1326_v56 }
 0x758   :  { %5405 = vmatpush3.msra.mxu1 %v1326_v56 }
 0x759   :  { %5407 = vmatmul.mubr.msk.f32.vlgmr.msra.gmra.mxu1 %vm726_vm0, %v6111_v20  ;;  %5420 = vmatprep.subr.mxu1 %v1515_v59 }
 0x75a   :  { %5421 = vmatpush3.msra.mxu1 %v1515_v59  ;;  %5428 = vmatprep.mubr.msk.f32.mxu1 %vm726_vm0, %v5989_v48 }
 0x75b   :  { %5422 = vmatprep.subr.mxu1 %v1514_v62 }
 0x75c   :  { %5423 = vmatpush3.msra.mxu1 %v1514_v62 }
 0x75d   :  { %5424 = vmatprep.subr.mxu1 %v1513_v63 }
 0x75e   :  { %5425 = vmatpush3.msra.mxu1 %v1513_v63 }
 0x75f   :  { %5426 = vmatprep.subr.mxu1 %v1512_v0 }
 0x760   :  { %5427 = vmatpush3.msra.mxu1 %v1512_v0  ;;  %v1665_v0 = vld [vmem:[#allocation2 + $0x150] sm:$0xff] }
 0x761   :  { %5429 = vmatmul.mubr.msk.f32.vlgmr.msra.gmra.mxu1 %vm726_vm0, %v5983_v45  ;;  %5431 = vmatprep.subr.mxu0 %v1665_v0 }
 0x819   :  { %v5408_v7 = vpop.f32.mrf.mxu1 }
 0x81a   :  { %v1407_v9 = vadd.f32 %v5408_v7, %v4928_v5  ;;  %v1754_v7 = vld [vmem:[#allocation2 + $0x170] sm:$0xff] }
 0x81b   :  { %v1401_v10 = vpop.f32.mrf.mxu1  ;;  %5442 = vmatprep.subr.mxu1 %v1754_v7 }
 0x81c   :  { %v1413_v16 = vmin.f32 %v1407_v9, 0.0  ;;  %v1402_v18 = vadd.f32 %v4928_v5, %v1401_v10  ;;  %vm1411_vm3 = vcmp.gt.f32.partialorder %v1407_v9, 0.0  ;;  %5443 = vmatpush3.msra.mxu1 %v1754_v7 }
 0x81e   :  { %v1416_v19 = vmul.f32 1.442695, %v1413_v16  ;;  %v1412_v14 = vmin.f32 %v1402_v18, 0.0  ;;  %vm1410_vm2 = vcmp.gt.f32.partialorder %v1402_v18, 0.0 }
 0x820   :  { %5784 = vpow2.f32 %v1416_v19  ;;  %v1414_v4 = vmul.f32 1.442695, %v1412_v14 }
 0x821   :  { %v5430_v6 = vpop.f32.mrf.mxu1 }
 0x822   :  { %5786 = vpow2.f32 %v1414_v4  ;;  %v1599_v21 = vadd.f32 %v5430_v6, %v4936_v12 }
 0x823   :  { %v1593_v22 = vpop.f32.mrf.mxu1 }
 0x824   :  { %v1594_v25 = vadd.f32 %v4936_v12, %v1593_v22  ;;  %1620 = vrot.lane.b32.xlu1 %v1599_v21, %s5893_s18 }
 0x826   :  { %1618 = vrot.lane.b32.xlu0 %v1594_v25, %s5893_s18 }
 0x82d   :  { %v5785_v28 = vpop.eup %5784 }
 0x82e   :  { %v4932_v30 = vadd.f32 -1.0, %v5785_v28 }
 0x82f   :  { %v5787_v29 = vpop.eup %5786 }
 0x830   :  { %v4931_v32 = vadd.f32 -1.0, %v5787_v29  ;;  %v1421_v34 = vsel %vm1411_vm3, %v1407_v9, %v4932_v30  ;;  %v1753_v9 = vld [vmem:[#allocation2 + $0x168] sm:$0xff] }
 0x831   :  { %5444 = vmatprep.subr.mxu1 %v1753_v9 }
 0x832   :  { %v1420_v33 = vsel %vm1410_vm2, %v1402_v18, %v4931_v32  ;;  %5445 = vmatpush3.msra.mxu1 %v1753_v9  ;;  %v1752_v32 = vld [vmem:[#allocation2 + $0x160] sm:$0xff] }
 0x833   :  { %5417 = vmatprep.mubr.msk.f32.mxu0 %vm726_vm0, %v1420_v33  ;;  %5446 = vmatprep.subr.mxu1 %v1752_v32  ;;  %v1751_v33 = vld [vmem:[#allocation2 + $0x158] sm:$0xff] }
 0x834   :  { %5418 = vmatmul.mubr.msk.f32.vlgmr.msra.gmra.mxu0 %vm726_vm0, %v1421_v34  ;;  %5447 = vmatpush3.msra.mxu1 %v1752_v32 }
 0x835   :  { %5432 = vmatpush3.msra.mxu0 %v1665_v0  ;;  %5448 = vmatprep.subr.mxu1 %v1751_v33 }
 0x836   :  { %5433 = vmatprep.subr.mxu0 %v1664_v23  ;;  %5449 = vmatpush3.msra.mxu1 %v1751_v33 }
 0x837   :  { %5434 = vmatpush3.msra.mxu0 %v1664_v23 }
 0x896   :  { %v1621_v46 = vpop.permute.xlu1 %1620 }
 0x898   :  { %v1619_v54 = vpop.permute.xlu0 %1618 }
 0x8f4   :  { %v5419_v35 = vpop.f32.mrf.mxu0 }
 0x8f5   :  { %v1509_v36 = vadd.f32 %v5419_v35, %v4933_v13 }
 0x8f6   :  { %v1503_v37 = vpop.f32.mrf.mxu0 }
 0x8f7   :  { %v1603_v11 = vadd.f32 %v1599_v21, %v1509_v36  ;;  %v1504_v38 = vadd.f32 %v4933_v13, %v1503_v37 }
 0x8f9   :  { %v4940_v17 = vmul.f32 -1.442695, %v1603_v11  ;;  %v1602_v39 = vadd.f32 %v1594_v25, %v1504_v38 }
 0x8fb   :  { %5788 = vpow2.f32 %v4940_v17  ;;  %v4939_v15 = vmul.f32 -1.442695, %v1602_v39 }
 0x8fd   :  { %5790 = vpow2.f32 %v4939_v15 }
 0x908   :  { %v5789_v40 = vpop.eup %5788 }
 0x909   :  { %v1611_v41 = vadd.f32 1.0, %v5789_v40 }
 0x90a   :  { %v5791_v42 = vpop.eup %5790 }
 0x90b   :  { %5792 = vrcp.f32 %v1611_v41  ;;  %v1610_v43 = vadd.f32 1.0, %v5791_v42 }
 0x90d   :  { %5794 = vrcp.f32 %v1610_v43 }
 0x918   :  { %v5793_v44 = vpop.eup %5792 }
 0x919   :  { %v1625_v47 = vmul.f32 %v5793_v44, %v1621_v46  ;;  %v1639_v12 = vsub.f32 1.0, %v5793_v44 }
 0x91a   :  { %v5795_v50 = vpop.eup %5794 }
 0x91b   :  { %1630 = vrot.lane.b32.xlu1 %v1625_v47, %s5893_s18  ;;  %v1624_v55 = vmul.f32 %v5795_v50, %v1619_v54  ;;  %v1638_v5 = vsub.f32 1.0, %v5795_v50 }
 0x91d   :  { %1628 = vrot.lane.b32.xlu0 %v1624_v55, %s5893_s18 }
 0x91f   :  { %1650 = vrot.lane.b32.xlu1 %v5989_v48, %s5892_s15 }
 0x923   :  { %1652 = vrot.lane.b32.xlu1 %v5983_v45, %s5892_s15  ;;  %v1663_v45 = vld [vmem:[#allocation2 + $0x140] sm:$0xff] }
 0x924   :  { %5435 = vmatprep.subr.mxu0 %v1663_v45 }
 0x925   :  { %5436 = vmatpush3.msra.mxu0 %v1663_v45 }
 0x926   :  { %5437 = vmatprep.subr.mxu0 %v1662_v2 }
 0x927   :  { %5438 = vmatpush3.msra.mxu0 %v1662_v2 }
 0x98d   :  { %v1631_v56 = vpop.permute.xlu1 %1630 }
 0x98e   :  { %v1635_v63 = vadd.f32 %v1631_v56, %v1509_v36 }
 0x98f   :  { %v1629_v59 = vpop.permute.xlu0 %1628 }
 0x990   :  { %v1634_v62 = vadd.f32 %v1629_v59, %v1504_v38 }
 0x991   :  { %v1651_v3 = vpop.permute.xlu1 %1650 }
 0x992   :  { %5796 = vtanh.f32 %v1634_v62  ;;  %v1656_v16 = vmul.f32 %v5795_v50, %v1651_v3 }
 0x993   :  { %5798 = vtanh.f32 %v1635_v63 }
 0x995   :  { %v1653_v19 = vpop.permute.xlu1 %1652 }
 0x996   :  { %v1657_v6 = vmul.f32 %v5793_v44, %v1653_v19 }
 0x99f   :  { %v5797_v1 = vpop.eup %5796 }
 0x9a0   :  { %1642 = vrot.lane.b32.xlu0 %v5797_v1, %s5894_s19  ;;  %v5799_v48 = vpop.eup %5798 }
 0x9a4   :  { %1644 = vrot.lane.b32.xlu0 %v5799_v48, %s5894_s19 }
 0xa12   :  { %v1643_v10 = vpop.permute.xlu0 %1642 }
 0xa13   :  { %v1648_v18 = vmul.f32 %v1643_v10, %v1638_v5 }
 0xa15   :  { %v6149_v14 = vadd.f32 %v1656_v16, %v1648_v18 }
 0xa16   :  { %v1645_v4 = vpop.permute.xlu0 %1644 }
 0xa17   :  { %v1660_v21 = vmax.f32 %v6149_v14, 0.0  ;;  %v1649_v22 = vmul.f32 %v1645_v4, %v1639_v12  ;;  %v4883_v14 = vld [vmem:[%s6598_s3 + $0x1] ss:$0 sm:$0xff] }
 0xa19   :  { %v6152_v25 = vadd.f32 %v1657_v6, %v1649_v22  ;;  %1668 = vrot.lane.b32.xlu0 %v1660_v21, %s5894_s19 }
 0xa1b   :  { %v1661_v28 = vmax.f32 %v6152_v25, 0.0 }
 0xa1d   :  { %1670 = vrot.lane.b32.xlu1 %v1661_v28, %s5894_s19 }
 0xa8b   :  { %v6161_v29 = vpop.permute.xlu0 %1668 }
 0xa8c   :  { %5439 = vmatprep.mubr.msk.f32.mxu0 %vm726_vm0, %v6161_v29 }
 0xa8f   :  { %v6165_v30 = vpop.permute.xlu1 %1670 }
 0xa90   :  { %5440 = vmatmul.mubr.msk.f32.vlgmr.msra.gmra.mxu0 %vm726_vm0, %v6165_v30 }
 0xa91   :  { %5457 = vmatprep.mubr.msk.f32.mxu0 %vm341_vm4, %v5977_v31 }
 0xb50   :  { %v6171_v34 = vpop.f32.mrf.mxu0 }
 0xb52   :  { %v6173_v13 = vpop.f32.mrf.mxu0 }
 0xb53   :  { %5450 = vmatprep.mubr.msk.f32.mxu1 %vm726_vm0, %v6173_v13 }
 0xb54   :  { %5451 = vmatmul.mubr.msk.f32.vlgmr.msra.gmra.mxu1 %vm726_vm0, %v6171_v34 }
 0xb55   :  { %5467 = vmatprep.mubr.msk.f32.mxu1 %vm341_vm4, %v5967_v27 }
 0xc14   :  { %v5452_v35 = vpop.f32.mrf.mxu1 }
 0xc15   :  { %1840 = vrot.lane.b32.xlu0 %v5452_v35, %s5895_s20  ;;  %5463 = vmatprep.subr.mxu1 %v5452_v35 }
 0xc16   :  { %v1827_v36 = vpop.f32.mrf.mxu1  ;;  %5464 = vmatpush3.msra.mxu1 %v5452_v35 }
 0xc17   :  { %1838 = vrot.lane.b32.xlu1 %v1827_v36, %s5895_s20  ;;  %5465 = vmatprep.subr.mxu1 %v1827_v36 }
 0xc18   :  { %5466 = vmatpush3.msra.mxu1 %v1827_v36 }
 0xc19   :  { %5468 = vmatmul.mubr.msk.f32.vlgmr.msra.gmra.mxu1 %vm341_vm4, %v6008_v53 }
 0xc1a   :  { %5470 = vmatprep.mubr.msk.f32.mxu1 %vm341_vm4, %v5999_v51 }
 0xc1d   :  { %5471 = vmatmul.mubr.msk.f32.gmra.mxu1 %vm341_vm4, %v6025_v60 }
 0xc1e   :  { %5488 = vmatprep.mubr.msk.f32.mxu1 %vm341_vm4, %v5977_v31 }
 0xc87   :  { %v1841_v37 = vpop.permute.xlu0 %1840 }
 0xc88   :  { %5453 = vmatprep.subr.mxu0 %v1841_v37 }
 0xc89   :  { %5454 = vmatpush3.msra.mxu0 %v1841_v37  ;;  %v1839_v11 = vpop.permute.xlu1 %1838 }
 0xc8a   :  { %5455 = vmatprep.subr.mxu0 %v1839_v11 }
 0xc8b   :  { %5456 = vmatpush3.msra.mxu0 %v1839_v11 }
 0xc8c   :  { %5458 = vmatmul.mubr.msk.f32.vlgmr.msra.gmra.mxu0 %vm341_vm4, %v5994_v49 }
 0xc8d   :  { %5460 = vmatprep.mubr.msk.f32.mxu0 %vm341_vm4, %v6004_v52 }
 0xc90   :  { %5461 = vmatmul.mubr.msk.f32.gmra.mxu0 %vm341_vm4, %v6020_v57 }
 0xc91   :  { %5481 = vmatprep.mubr.msk.f32.mxu0 %vm726_vm0, %v6101_v61 }
 0xcd9   :  { %v5469_v38 = vpop.f32.mrf.mxu1 }
 0xcdb   :  { %v1995_v17 = vpop.f32.mrf.mxu1 }
 0xcdd   :  { %v5472_v40 = vpop.f32.mrf.mxu1 }
 0xcdf   :  { %v2005_v54 = vpop.f32.mrf.mxu1 }
 0xd4c   :  { %v5459_v39 = vpop.f32.mrf.mxu0 }
 0xd4d   :  { %v2001_v15 = vadd.f32 %v5469_v38, %v5459_v39 }
 0xd4e   :  { %v1910_v41 = vpop.f32.mrf.mxu0 }
 0xd4f   :  { %v2019_v42 = vmul.f32 0.01, %v2001_v15  ;;  %v1996_v43 = vadd.f32 %v1995_v17, %v1910_v41  ;;  %vm2015_vm5 = vcmp.gt.f32.partialorder %v2001_v15, 0.0 }
 0xd50   :  { %v5462_v44 = vpop.f32.mrf.mxu0 }
 0xd51   :  { %v2018_v46 = vmul.f32 0.01, %v1996_v43  ;;  %v2011_v47 = vadd.f32 %v5472_v40, %v5462_v44  ;;  %v2023_v50 = vsel %vm2015_vm5, %v2001_v15, %v2019_v42  ;;  %vm2014_vm6 = vcmp.gt.f32.partialorder %v1996_v43, 0.0 }
 0xd52   :  { %v1920_v55 = vpop.f32.mrf.mxu0  ;;  %2033 = vperm.xlu1 %5763, %v2023_v50  }
 0xd53   :  { %v2021_v56 = vmul.f32 0.01, %v2011_v47  ;;  %v2006_v59 = vadd.f32 %v2005_v54, %v1920_v55  ;;  %v2022_v62 = vsel %vm2014_vm6, %v1996_v43, %v2018_v46  ;;  %vm2017_vm7 = vcmp.gt.f32.partialorder %v2011_v47, 0.0 }
 0xd54   :  { %2028 = vperm.xlu0 %5762, %v2022_v62  }
 0xd55   :  { %v2020_v63 = vmul.f32 0.01, %v2006_v59  ;;  %v2025_v0 = vsel %vm2017_vm7, %v2011_v47, %v2021_v56  ;;  %vm2016_vm8 = vcmp.gt.f32.partialorder %v2006_v59, 0.0 }
 0xd56   :  { %2043 = vperm.xlu1 %5763, %v2025_v0  }
 0xd57   :  { %v2024_v23 = vsel %vm2016_vm8, %v2006_v59, %v2020_v63 }
 0xd58   :  { %2038 = vperm.xlu0 %5762, %v2024_v23  }
 0xdcd   :  { %v2034_v1 = vpop.permute.xlu1 %2033 }
 0xdce   :  { %v2047_v3 = vsel %vm975_vm12, %v2034_v1, -1e+30  ;;  %vm118_vm12 = vcmp.eq.s32.totalorder %v6094_v58, %v4883_v14  ;;  %v6303_v58 = vld [vmem:[#allocation2 + $0x208] sm:$0xff] }
 0xdcf   :  { %v2029_v48 = vpop.permute.xlu0 %2028  ;;  %v2051_v16 = vsel %vm341_vm4, %v2047_v3, -inf }
 0xdd0   :  { %v2046_v45 = vsel %vm974_vm11, %v2029_v48, -1e+30  ;;  %vm5896_vm11 = vmmov 0  }
 0xdd1   :  { %v2044_v2 = vpop.permute.xlu1 %2043  ;;  %v2050_v7 = vsel %vm341_vm4, %v2046_v45, -inf }
 0xdd2   :  { %v2049_v5 = vsel %vm977_vm14, %v2044_v2, -1e+30  ;;  %v2054_v12 = vmax.f32 %v2050_v7, %v2051_v16  ;;  %vm3087_vm14 = vcmask 15360  }
 0xdd3   :  { %v2039_v9 = vpop.permute.xlu0 %2038  ;;  %v2053_v18 = vsel %vm341_vm4, %v2049_v5, -inf }
 0xdd4   :  { %v2048_v10 = vsel %vm976_vm13, %v2039_v9, -1e+30 }
 0xdd5   :  { %v2052_v19 = vsel %vm341_vm4, %v2048_v10, -inf }
 0xdd6   :  { %v2055_v4 = vmax.f32 %v2052_v19, %v2053_v18 }
 0xdd8   :  { %v2056_v6 = vmax.f32 %v2054_v12, %v2055_v4 }
 0xdda   :  { %v2057_v22 = vrot.slane %v2056_v6, 4 }
 0xddc   :  { %v2058_v32 = vmax.f32 %v2056_v6, %v2057_v22 }
 0xdde   :  { %v2059_v33 = vrot.slane %v2058_v32, 2 }
 0xde0   :  { %v2060_v35 = vmax.f32 %v2058_v32, %v2059_v33 }
 0xde2   :  { %v2061_v36 = vrot.slane %v2060_v35, 1 }
 0xde4   :  { %v2062_v37 = vmax.f32 %v2060_v35, %v2061_v36  ;;  %v2553_v35 = vld [vmem:[#allocation2 + $0x1b8] sm:$0xff]  ;;  %v2552_v36 = vld [vmem:[#allocation2 + $0x1b0] sm:$0xff] }
 0xde6   :  { %v2066_v11 = vmul.f32 %v6020_v57, %v2062_v37  ;;  %v2065_v38 = vmul.f32 %v6004_v52, %v2062_v37  ;;  %v2064_v15 = vmul.f32 %v5994_v49, %v2062_v37  ;;  %v2063_v41 = vmul.f32 %v5977_v31, %v2062_v37  ;;  %v2551_v37 = vld [vmem:[#allocation2 + $0x1a8] sm:$0xff] }
 0xde8   :  { %v2076_v17 = vsel %vm341_vm4, %v2066_v11, 0.0  ;;  %v2073_v39 = vsel %vm341_vm4, %v2065_v38, 0.0  ;;  %v2070_v40 = vsel %vm341_vm4, %v2064_v15, 0.0  ;;  %v2067_v42 = vsel %vm341_vm4, %v2063_v41, 0.0  ;;  %v2550_v11 = vld [vmem:[#allocation2 + $0x1a0] sm:$0xff]  ;;  %v2463_v38 = vld [vmem:[#allocation2 + $0x198] sm:$0xff] }
 0xde9   :  { %2077 = vadd.xlane.f32.xlu0 %v2076_v17  ;;  %2074 = vadd.xlane.f32.xlu1 %v2073_v39  ;;  %v2460_v17 = vld [vmem:[#allocation2 + $0x180] sm:$0xff]  ;;  %v4963_v39 = vld [vmem:[#allocation2 + $0x178] ss:$0 sm:$0xff] }
 0xded   :  { %2071 = vadd.xlane.f32.xlu0 %v2070_v40 }
 0xdf1   :  { %2068 = vadd.xlane.f32.xlu0 %v2067_v42 }
 0xe72   :  { %v2078_v43 = vpop.xlane.xlu0 %2077  ;;  %v2075_v44 = vpop.xlane.xlu1 %2074 }
 0xe73   :  { %v2082_v46 = vsub.f32 %v2025_v0, %v2078_v43  ;;  %v2081_v47 = vsub.f32 %v2024_v23, %v2075_v44 }
 0xe75   :  { %v2089_v54 = vmul.f32 1.442695, %v2082_v46  ;;  %v2087_v55 = vmul.f32 1.442695, %v2081_v47  ;;  %v4971_v46 = vld [vmem:[#allocation2 + $0x1c8] ss:$0 sm:$0xff] }
 0xe76   :  { %v2072_v56 = vpop.xlane.xlu0 %2071 }
 0xe77   :  { %5800 = vpow2.f32 %v2089_v54  ;;  %v2080_v59 = vsub.f32 %v2023_v50, %v2072_v56 }
 0xe78   :  { %5802 = vpow2.f32 %v2087_v55 }
 0xe79   :  { %v2085_v63 = vmul.f32 1.442695, %v2080_v59 }
 0xe7a   :  { %v2069_v1 = vpop.xlane.xlu0 %2068 }
 0xe7b   :  { %5804 = vpow2.f32 %v2085_v63  ;;  %v2079_v48 = vsub.f32 %v2022_v62, %v2069_v1 }
 0xe7d   :  { %v2083_v45 = vmul.f32 1.442695, %v2079_v48 }
 0xe7f   :  { %5806 = vpow2.f32 %v2083_v45 }
 0xe84   :  { %v5801_v31 = vpop.eup %5800 }
 0xe85   :  { %5473 = vmatprep.subr.mxu0 %v5801_v31  ;;  %v5803_v2 = vpop.eup %5802 }
 0xe86   :  { %5474 = vmatpush3.msra.mxu0 %v5801_v31 }
 0xe87   :  { %5475 = vmatprep.subr.mxu0 %v5803_v2 }
 0xe88   :  { %v5805_v3 = vpop.eup %5804  ;;  %5476 = vmatpush3.msra.mxu0 %v5803_v2 }
 0xe89   :  { %5477 = vmatprep.subr.mxu0 %v5805_v3 }
 0xe8a   :  { %5478 = vmatpush3.msra.mxu0 %v5805_v3 }
 0xe8c   :  { %v5807_v0 = vpop.eup %5806 }
 0xe8d   :  { %5479 = vmatprep.subr.mxu0 %v5807_v0 }
 0xe8e   :  { %5480 = vmatpush3.msra.mxu0 %v5807_v0 }
 0xe8f   :  { %5482 = vmatmul.mubr.msk.f32.vlgmr.msra.gmra.mxu0 %vm726_vm0, %v6111_v20  ;;  %5494 = vmatprep.subr.mxu0 %v6171_v34 }
 0xe90   :  { %5495 = vmatpush3.msra.mxu0 %v6171_v34  ;;  %5498 = vmatprep.mubr.msk.f32.mxu0 %vm341_vm4, %v5967_v27 }
 0xe91   :  { %5496 = vmatprep.subr.mxu0 %v6173_v13 }
 0xe92   :  { %5497 = vmatpush3.msra.mxu0 %v6173_v13 }
 0xe93   :  { %5499 = vmatmul.mubr.msk.f32.vlgmr.msra.gmra.mxu0 %vm341_vm4, %v6008_v53  ;;  %5515 = vmatprep.subr.mxu0 %v2463_v38 }
 0xe94   :  { %5501 = vmatprep.mubr.msk.f32.mxu0 %vm341_vm4, %v5999_v51  ;;  %5516 = vmatpush3.msra.mxu0 %v2463_v38  ;;  %v6270_v38 = vld [vmem:[#allocation2 + $0x1d8] sm:$0xff] }
 0xe97   :  { %5502 = vmatmul.mubr.msk.f32.gmra.mxu0 %vm341_vm4, %v6025_v60 }
 0xf4f   :  { %v5483_v50 = vpop.f32.mrf.mxu0 }
 0xf50   :  { %5484 = vmatprep.subr.mxu1 %v5483_v50 }
 0xf51   :  { %v2157_v62 = vpop.f32.mrf.mxu0  ;;  %5485 = vmatpush3.msra.mxu1 %v5483_v50 }
 0xf52   :  { %5486 = vmatprep.subr.mxu1 %v2157_v62 }
 0xf53   :  { %5487 = vmatpush3.msra.mxu1 %v2157_v62 }
 0xf54   :  { %5489 = vmatmul.mubr.msk.f32.vlgmr.msra.gmra.mxu1 %vm341_vm4, %v5994_v49 }
 0xf55   :  { %5491 = vmatprep.mubr.msk.f32.mxu1 %vm341_vm4, %v6004_v52 }
 0xf58   :  { %5492 = vmatmul.mubr.msk.f32.gmra.mxu1 %vm341_vm4, %v6020_v57 }
 0xf59   :  { %5512 = vmatprep.mubr.msk.f32.mxu1 %vm726_vm0, %v6101_v61  ;;  %v5500_v61 = vpop.f32.mrf.mxu0 }
 0xf5b   :  { %v2325_v9 = vpop.f32.mrf.mxu0 }
 0xf5d   :  { %v5503_v10 = vpop.f32.mrf.mxu0 }
 0xf5f   :  { %v2335_v19 = vpop.f32.mrf.mxu0 }
0x1014   :  { %v5490_v27 = vpop.f32.mrf.mxu1 }
0x1016   :  { %v2232_v51 = vpop.f32.mrf.mxu1 }
0x1018   :  { %v5493_v53 = vpop.f32.mrf.mxu1 }
0x1019   :  { %5808 = vrcp.f32 %v5493_v53 }
0x101a   :  { %5810 = vrcp.f32 %v5490_v27  ;;  %v2242_v60 = vpop.f32.mrf.mxu1 }
0x101b   :  { %5812 = vrcp.f32 %v2242_v60 }
0x101c   :  { %5814 = vrcp.f32 %v2232_v51 }
0x1026   :  { %v5809_v34 = vpop.eup %5808 }
0x1027   :  { %v5811_v13 = vpop.eup %5810  ;;  %v2258_v49 = vmul.f32 %v5809_v34, %v5801_v31 }
0x1028   :  { %v5813_v23 = vpop.eup %5812  ;;  %v2254_v5 = vmul.f32 %v5811_v13, %v5805_v3  ;;  %v4968_v3 = vld [vmem:[#allocation2 + $0x1c0] ss:$0 sm:$0xff] }
0x1029   :  { %2361 = vperm.xlu1 %5763, %v2258_v49   ;;  %v2256_v52 = vmul.f32 %v5813_v23, %v5803_v2  ;;  %v5815_v57 = vpop.eup %5814 }
0x102a   :  { %v2252_v7 = vmul.f32 %v5815_v57, %v5807_v0 }
0x102b   :  { %2356 = vperm.xlu0 %5762, %v2256_v52  }
0x102d   :  { %2351 = vperm.xlu1 %5763, %v2254_v5  }
0x1031   :  { %2346 = vperm.xlu1 %5763, %v2252_v7  }
0x10a4   :  { %v2362_v16 = vpop.permute.xlu1 %2361 }
0x10a5   :  { %v2367_v18 = vmul.f32 %v5503_v10, %v2362_v16 }
0x10a6   :  { %v2357_v12 = vpop.permute.xlu0 %2356 }
0x10a7   :  { %v2366_v4 = vmul.f32 %v2357_v12, %v2335_v19  ;;  %5504 = vmatprep.subr.mxu1 %v2367_v18 }
0x10a8   :  { %5505 = vmatpush3.msra.mxu1 %v2367_v18  ;;  %v2352_v6 = vpop.permute.xlu1 %2351 }
0x10a9   :  { %v2365_v22 = vmul.f32 %v5500_v61, %v2352_v6  ;;  %5506 = vmatprep.subr.mxu1 %v2366_v4 }
0x10aa   :  { %5507 = vmatpush3.msra.mxu1 %v2366_v4 }
0x10ab   :  { %5508 = vmatprep.subr.mxu1 %v2365_v22 }
0x10ac   :  { %v2347_v32 = vpop.permute.xlu1 %2346  ;;  %5509 = vmatpush3.msra.mxu1 %v2365_v22  ;;  %v6259_v22 = vld [vmem:[#allocation2 + $0x1e8] sm:$0xff] }
0x10ad   :  { %v2364_v33 = vmul.f32 %v2347_v32, %v2325_v9 }
0x10af   :  { %5510 = vmatprep.subr.mxu1 %v2364_v33 }
0x10b0   :  { %5511 = vmatpush3.msra.mxu1 %v2364_v33  ;;  %v6264_v33 = vld [vmem:[#allocation2 + $0x1e0] sm:$0xff] }
0x10b1   :  { %5513 = vmatmul.mubr.msk.f32.vlgmr.msra.gmra.mxu1 %vm726_vm0, %v6111_v20  ;;  %5526 = vmatprep.subr.mxu1 %v2553_v35  ;;  %v2462_v20 = vld [vmem:[#allocation2 + $0x190] sm:$0xff] }
0x10b2   :  { %5527 = vmatpush3.msra.mxu1 %v2553_v35  ;;  %5534 = vmatprep.mubr.msk.f32.mxu1 %vm726_vm0, %v6161_v29  ;;  %v2461_v29 = vld [vmem:[#allocation2 + $0x188] sm:$0xff] }
0x10b3   :  { %5528 = vmatprep.subr.mxu1 %v2552_v36  ;;  %5517 = vmatprep.subr.mxu0 %v2462_v20 }
0x10b4   :  { %5529 = vmatpush3.msra.mxu1 %v2552_v36  ;;  %5518 = vmatpush3.msra.mxu0 %v2462_v20 }
0x10b5   :  { %5530 = vmatprep.subr.mxu1 %v2551_v37  ;;  %5519 = vmatprep.subr.mxu0 %v2461_v29 }
0x10b6   :  { %5531 = vmatpush3.msra.mxu1 %v2551_v37  ;;  %5520 = vmatpush3.msra.mxu0 %v2461_v29 }
0x10b7   :  { %5532 = vmatprep.subr.mxu1 %v2550_v11  ;;  %5521 = vmatprep.subr.mxu0 %v2460_v17 }
0x10b8   :  { %5533 = vmatpush3.msra.mxu1 %v2550_v11  ;;  %5522 = vmatpush3.msra.mxu0 %v2460_v17 }
0x10b9   :  { %5535 = vmatmul.mubr.msk.f32.vlgmr.msra.gmra.mxu1 %vm726_vm0, %v6165_v30  ;;  %5555 = vmatprep.subr.mxu1 %v5891_v26 }
0x10ba   :  { %5537 = vmatprep.subr.mxu0 %v5891_v26  ;;  %5563 = vmatprep.mubr.msk.f32.mxu1 %vm5896_vm11, %v5891_v26 }
0x10bb   :  { %5556 = vmatpush3.msra.mxu1 %v6259_v22 }
0x10bc   :  { %5557 = vmatprep.subr.mxu1 %v5891_v26 }
0x10bd   :  { %5558 = vmatpush3.msra.mxu1 %v6264_v33 }
0x10be   :  { %5559 = vmatprep.subr.mxu1 %v5891_v26 }
0x10bf   :  { %5560 = vmatpush3.msra.mxu1 %v6270_v38 }
0x10c0   :  { %5561 = vmatprep.subr.mxu1 %v5891_v26 }
0x1171   :  { %v5514_v15 = vpop.f32.mrf.mxu1 }
0x1172   :  { %v2445_v40 = vadd.f32 %v5514_v15, %v4963_v39  ;;  %v6276_v15 = vld [vmem:[#allocation2 + $0x1d0] sm:$0xff] }
0x1173   :  { %v2439_v30 = vpop.f32.mrf.mxu1  ;;  %5562 = vmatpush3.msra.mxu1 %v6276_v15 }
0x1174   :  { %v2451_v41 = vmin.f32 %v2445_v40, 0.0  ;;  %v2440_v42 = vadd.f32 %v4963_v39, %v2439_v30  ;;  %vm2449_vm10 = vcmp.gt.f32.partialorder %v2445_v40, 0.0  ;;  %5577 = vmatprep.subr.mxu1 %v5891_v26  ;;  %v6288_v30 = vsel %vm118_vm12, 1.0, %v5891_v26 }
0x1175   :  { %vm4426_vm12 = vcmask 80896  }
0x1176   :  { %v2454_v43 = vmul.f32 1.442695, %v2451_v41  ;;  %v2450_v44 = vmin.f32 %v2440_v42, 0.0  ;;  %vm2448_vm9 = vcmp.gt.f32.partialorder %v2440_v42, 0.0 }
0x1178   :  { %5816 = vpow2.f32 %v2454_v43  ;;  %v2452_v47 = vmul.f32 1.442695, %v2450_v44  ;;  %v6311_v43 = vld [vmem:[#allocation2 + $0x1f8] sm:$0xff]  ;;  %v6315_v44 = vld [vmem:[#allocation2 + $0x1f0] sm:$0xff] }
0x1179   :  { %v5536_v54 = vpop.f32.mrf.mxu1 }
0x117a   :  { %5818 = vpow2.f32 %v2452_v47  ;;  %v2631_v55 = vadd.f32 %v5536_v54, %v4971_v46 }
0x117b   :  { %v2625_v56 = vpop.f32.mrf.mxu1 }
0x117c   :  { %v2626_v59 = vadd.f32 %v4971_v46, %v2625_v56  ;;  %2652 = vrot.lane.b32.xlu0 %v2631_v55, %s5893_s18 }
0x117e   :  { %2650 = vrot.lane.b32.xlu1 %v2626_v59, %s5893_s18 }
0x1185   :  { %v5817_v63 = vpop.eup %5816 }
0x1186   :  { %v4967_v48 = vadd.f32 -1.0, %v5817_v63  ;;  %v85_v63 = vld [vmem:[%s6597_s2] sm:$0xff] }
0x1187   :  { %v5819_v1 = vpop.eup %5818 }
0x1188   :  { %v4966_v45 = vadd.f32 -1.0, %v5819_v1  ;;  %v2459_v2 = vsel %vm2449_vm10, %v2445_v40, %v4967_v48  ;;  %v5897_v1 = vmov 2  }
0x1189   :  { %5765 = vset.pattern.permute.xlu1 %v5897_v1  ;;  %5764 = vset.pattern.permute.xlu0 %v5897_v1 }
0x118a   :  { %v2458_v31 = vsel %vm2448_vm9, %v2440_v42, %v4966_v45  ;;  %v6305_v42 = vld [vmem:[#allocation2 + $0x200] sm:$0xff] }
0x118b   :  { %5523 = vmatprep.mubr.msk.f32.mxu0 %vm726_vm0, %v2458_v31 }
0x118c   :  { %5524 = vmatmul.mubr.msk.f32.vlgmr.msra.gmra.mxu0 %vm726_vm0, %v2459_v2 }
0x118d   :  { %5541 = vmatprep.mubr.msk.f32.mxu0 %vm5896_vm11, %v5891_v26 }
0x11ee   :  { %v2653_v57 = vpop.permute.xlu0 %2652 }
0x11f0   :  { %v2651_v9 = vpop.permute.xlu1 %2650 }
0x124c   :  { %v5525_v0 = vpop.f32.mrf.mxu0 }
0x124d   :  { %v2547_v50 = vadd.f32 %v5525_v0, %v4968_v3 }
0x124e   :  { %v2541_v62 = vpop.f32.mrf.mxu0 }
0x124f   :  { %v2635_v27 = vadd.f32 %v2631_v55, %v2547_v50  ;;  %v2542_v51 = vadd.f32 %v4968_v3, %v2541_v62 }
0x1251   :  { %v4975_v53 = vmul.f32 -1.442695, %v2635_v27  ;;  %v2634_v60 = vadd.f32 %v2626_v59, %v2542_v51  ;;  %v86_v59 = vld [vmem:[%s6597_s2 + $0x8] sm:$0xff] }
0x1253   :  { %5820 = vpow2.f32 %v4975_v53  ;;  %v4974_v34 = vmul.f32 -1.442695, %v2634_v60 }
0x1255   :  { %5822 = vpow2.f32 %v4974_v34 }
0x1260   :  { %v5821_v13 = vpop.eup %5820 }
0x1261   :  { %v2643_v49 = vadd.f32 1.0, %v5821_v13 }
0x1262   :  { %v5823_v23 = vpop.eup %5822 }
0x1263   :  { %5824 = vrcp.f32 %v2643_v49  ;;  %v2642_v52 = vadd.f32 1.0, %v5823_v23 }
0x1265   :  { %5826 = vrcp.f32 %v2642_v52 }
0x1270   :  { %v5825_v5 = vpop.eup %5824 }
0x1271   :  { %v2657_v7 = vmul.f32 %v5825_v5, %v2653_v57  ;;  %v2671_v32 = vsub.f32 1.0, %v5825_v5  ;;  %v2683_v36 = vmul.f32 %v5825_v5, %v1661_v28 }
0x1272   :  { %v5827_v61 = vpop.eup %5826 }
0x1273   :  { %2662 = vrot.lane.b32.xlu0 %v2657_v7, %s5893_s18  ;;  %v2656_v10 = vmul.f32 %v5827_v61, %v2651_v9  ;;  %v2670_v11 = vsub.f32 1.0, %v5827_v61  ;;  %v2682_v17 = vmul.f32 %v5827_v61, %v1660_v21 }
0x1275   :  { %2660 = vrot.lane.b32.xlu1 %v2656_v10, %s5893_s18 }
0x12e5   :  { %v2663_v16 = vpop.permute.xlu0 %2662 }
0x12e6   :  { %v2667_v18 = vadd.f32 %v2663_v16, %v2547_v50 }
0x12e7   :  { %v2661_v19 = vpop.permute.xlu1 %2660 }
0x12e8   :  { %5828 = vtanh.f32 %v2667_v18  ;;  %v2666_v12 = vadd.f32 %v2661_v19, %v2542_v51 }
0x12ea   :  { %5830 = vtanh.f32 %v2666_v12 }
0x12f5   :  { %v5829_v4 = vpop.eup %5828 }
0x12f6   :  { %2676 = vrot.lane.b32.xlu0 %v5829_v4, %s5894_s19 }
0x12f7   :  { %v5831_v6 = vpop.eup %5830 }
0x12f8   :  { %2674 = vrot.lane.b32.xlu1 %v5831_v6, %s5894_s19 }
0x1368   :  { %v2677_v35 = vpop.permute.xlu0 %2676 }
0x1369   :  { %v2681_v37 = vmul.f32 %v2677_v35, %v2671_v32 }
0x136a   :  { %v2675_v20 = vpop.permute.xlu1 %2674 }
0x136b   :  { %v2685_v29 = vadd.f32 %v2683_v36, %v2681_v37  ;;  %v2680_v39 = vmul.f32 %v2675_v20, %v2670_v11 }
0x136d   :  { %v2687_v25 = vmax.f32 %v2685_v29, 0.0  ;;  %v2684_v28 = vadd.f32 %v2682_v17, %v2680_v39 }
0x136f   :  { %v2686_v40 = vmax.f32 %v2684_v28, 0.0  ;;  %2692 = vrot.lane.b32.xlu0 %v2687_v25, %s5894_s19 }
0x1371   :  { %2690 = vrot.lane.b32.xlu1 %v2686_v40, %s5894_s19 }
0x1373   :  { %88 = vperm.xlu0 %5764, %v85_v63  }
0x1375   :  { %91 = vperm.xlu1 %5765, %v86_v59  }
0x1377   :  { %5766 = vset.pattern.permute.xlu0 %v5889_v8 }
0x1379   :  { %5767 = vset.pattern.permute.xlu1 %v5889_v8 }
0x13e1   :  { %v2693_v21 = vpop.permute.xlu0 %2692 }
0x13e2   :  { %5538 = vmatpush3.msra.mxu0 %v2693_v21 }
0x13e3   :  { %5539 = vmatprep.subr.mxu0 %v5891_v26  ;;  %v2691_v41 = vpop.permute.xlu1 %2690 }
0x13e4   :  { %5540 = vmatpush3.msra.mxu0 %v2691_v41 }
0x13e5   :  { %5542 = vmatmul.mubr.msk.f32.vlgmr.msra.gmra.mxu0 %vm341_vm4, %v6288_v30  ;;  %5544 = vmatprep.subr.mxu0 %v6259_v22 }
0x13e6   :  { %5545 = vmatpush3.msra.mxu0 %v6259_v22  ;;  %5552 = vmatprep.mubr.msk.f32.mxu0 %vm726_vm0, %v2691_v41 }
0x13e7   :  { %5546 = vmatprep.subr.mxu0 %v6264_v33 }
0x13e8   :  { %5547 = vmatpush3.msra.mxu0 %v6264_v33 }
0x13e9   :  { %5548 = vmatprep.subr.mxu0 %v6270_v38 }
0x13ea   :  { %5549 = vmatpush3.msra.mxu0 %v6270_v38 }
0x13eb   :  { %5550 = vmatprep.subr.mxu0 %v6276_v15 }
0x13ec   :  { %5551 = vmatpush3.msra.mxu0 %v6276_v15 }
0x13ed   :  { %5553 = vmatmul.mubr.msk.f32.vlgmr.msra.gmra.mxu0 %vm726_vm0, %v2693_v21  ;;  %5566 = vmatprep.subr.mxu0 %v6303_v58 }
0x13ee   :  { %5567 = vmatpush3.msra.mxu0 %v6303_v58  ;;  %v89_v31 = vpop.permute.xlu0 %88 }
0x13ef   :  { %5568 = vmatprep.subr.mxu0 %v6305_v42  ;;  %vm93_vm13 = vcmp.eq.s32.totalorder %v5963_v24, %v89_v31 }
0x13f0   :  { %5569 = vmatpush3.msra.mxu0 %v6305_v42  ;;  %v6354_v2 = vsel %vm93_vm13, 1.0, %v5891_v26  ;;  %v92_v0 = vpop.permute.xlu1 %91  ;;  %vm4537_vm13 = vcmask 1044480  }
0x13f1   :  { %5570 = vmatprep.subr.mxu0 %v6311_v43  ;;  %vm94_vm1 = vcmp.eq.s32.totalorder %v5963_v24, %v92_v0  ;;  %vm3180_vm6 = vcmp.gt.f32.partialorder %v6354_v2, 0.0  ;;  %v6403_v0 = vld [vmem:[#allocation2 + $0x250] sm:$0xff] }
0x13f2   :  { %5571 = vmatpush3.msra.mxu0 %v6311_v43  ;;  %v6362_v62 = vsel %vm94_vm1, 1.0, %v5891_v26 }
0x13f3   :  { %5572 = vmatprep.subr.mxu0 %v6315_v44  ;;  %vm3181_vm5 = vcmp.gt.f32.partialorder %v6362_v62, 0.0 }
0x13f4   :  { %5573 = vmatpush3.msra.mxu0 %v6315_v44 }
0x14a5   :  { %v2765_v46 = vpop.f32.mrf.mxu0 }
0x14a6   :  { %v6319_v47 = vmax.f32 %v2765_v46, 0.0 }
0x14a7   :  { %v5543_v54 = vpop.f32.mrf.mxu0 }
0x14a8   :  { %5564 = vmatmul.mubr.msk.f32.vlgmr.msra.gmra.mxu1 %vm726_vm0, %v6319_v47 }
0x14a9   :  { %5578 = vmatpush3.msra.mxu1 %v6303_v58  ;;  %5585 = vmatprep.mubr.msk.f32.mxu1 %vm5896_vm11, %v5891_v26 }
0x14aa   :  { %5579 = vmatprep.subr.mxu1 %v5891_v26 }
0x14ab   :  { %5580 = vmatpush3.msra.mxu1 %v6305_v42 }
0x14ac   :  { %5581 = vmatprep.subr.mxu1 %v5891_v26 }
0x14ad   :  { %v6329_v55 = vpop.f32.mrf.mxu0  ;;  %5582 = vmatpush3.msra.mxu1 %v6311_v43 }
0x14ae   :  { %5583 = vmatprep.subr.mxu1 %v5891_v26 }
0x14af   :  { %v6333_v56 = vpop.f32.mrf.mxu0  ;;  %5584 = vmatpush3.msra.mxu1 %v6315_v44 }
0x14b0   :  { %5574 = vmatprep.mubr.msk.f32.mxu0 %vm726_vm0, %v6333_v56  ;;  %5593 = vmatprep.subr.mxu1 %v5891_v26 }
0x14b1   :  { %5575 = vmatmul.mubr.msk.f32.vlgmr.msra.gmra.mxu0 %vm726_vm0, %v6329_v55 }
0x14b2   :  { %5590 = vmatprep.mubr.msk.f32.mxu0 %vm3087_vm14, %v6354_v2 }
0x1568   :  { %v2922_v48 = vpop.f32.mrf.mxu1 }
0x1569   :  { %5586 = vmatmul.mubr.msk.f32.vlgmr.msra.gmra.mxu1 %vm726_vm0, %v2922_v48 }
0x156a   :  { %v5565_v45 = vpop.f32.mrf.mxu1  ;;  %5597 = vmatprep.mubr.msk.f32.mxu1 %vm5896_vm11, %v5891_v26 }
0x1571   :  { %v6369_v27 = vpop.f32.mrf.mxu0 }
0x1573   :  { %v6371_v51 = vpop.f32.mrf.mxu0 }
0x1629   :  { %v3080_v3 = vpop.f32.mrf.mxu1 }
0x162a   :  { %3085 = vrot.lane.b32.xlu1 %v3080_v3, %s5895_s20 }
0x162b   :  { %v5587_v8 = vpop.f32.mrf.mxu1 }
0x169c   :  { %v3086_v50 = vpop.permute.xlu1 %3085 }
0x169d   :  { %5588 = vmatprep.subr.msk.mxu0 %vm3094_vm15, %v3086_v50 }
0x169e   :  { %5589 = vmatpush3.msk.msra.mxu0 %vm3094_vm15, %v3086_v50  ;;  %v6408_v50 = vld [vmem:[#allocation2 + $0x248] sm:$0xff] }
0x169f   :  { %5591 = vmatmul.mubr.msk.f32.vlgmr.msra.gmra.mxu0 %vm3087_vm14, %v6362_v62 }
0x16a0   :  { %5602 = vmatprep.mubr.msk.f32.mxu0 %vm3087_vm14, %v6354_v2 }
0x175f   :  { %v5592_v53 = vpop.f32.mrf.mxu0 }
0x1760   :  { %v3173_v24 = vadd.f32 %v5592_v53, %v6369_v27  ;;  %v6414_v53 = vld [vmem:[#allocation2 + $0x240] sm:$0xff] }
0x1761   :  { %v3163_v60 = vpop.f32.mrf.mxu0 }
0x1762   :  { %v3177_v34 = vmul.f32 0.01, %v3173_v24  ;;  %v3172_v13 = vadd.f32 %v3163_v60, %v6371_v51  ;;  %vm3175_vm2 = vcmp.gt.f32.partialorder %v3173_v24, 0.0  ;;  %v6436_v60 = vld [vmem:[#allocation2 + $0x230] sm:$0xff] }
0x1764   :  { %v3176_v49 = vmul.f32 0.01, %v3172_v13  ;;  %v3179_v23 = vsel %vm3175_vm2, %v3173_v24, %v3177_v34  ;;  %vm3174_vm3 = vcmp.gt.f32.partialorder %v3172_v13, 0.0  ;;  %v6418_v24 = vld [vmem:[#allocation2 + $0x238] sm:$0xff] }
0x1765   :  { %3189 = vperm.xlu1 %5767, %v3179_v23  }
0x1766   :  { %v3178_v52 = vsel %vm3174_vm3, %v3172_v13, %v3176_v49 }
0x1767   :  { %3184 = vperm.xlu0 %5766, %v3178_v52  }
0x17e0   :  { %v3190_v5 = vpop.permute.xlu1 %3189 }
0x17e1   :  { %v3193_v57 = vsel %vm3181_vm5, %v3190_v5, -1e+30  ;;  %v6455_v5 = vld [vmem:[#allocation2 + $0x260] ss:$0 sm:$0xff] }
0x17e2   :  { %v3185_v7 = vpop.permute.xlu0 %3184  ;;  %v3195_v9 = vsel %vm3087_vm14, %v3193_v57, -inf }
0x17e3   :  { %v3192_v61 = vsel %vm3180_vm6, %v3185_v7, -1e+30 }
0x17e4   :  { %v3194_v10 = vsel %vm3087_vm14, %v3192_v61, -inf }
0x17e5   :  { %v3196_v16 = vmax.f32 %v3194_v10, %v3195_v9 }
0x17e7   :  { %v3197_v18 = vrot.slane %v3196_v16, 4 }
0x17e9   :  { %v3198_v19 = vmax.f32 %v3196_v16, %v3197_v18  ;;  %v6469_v18 = vld [vmem:[#allocation2 + $0x258] ss:$0 sm:$0xff] }
0x17eb   :  { %v3199_v12 = vrot.slane %v3198_v19, 2 }
0x17ed   :  { %v3200_v4 = vmax.f32 %v3198_v19, %v3199_v12 }
0x17ef   :  { %v3201_v6 = vrot.slane %v3200_v4, 1 }
0x17f1   :  { %v3202_v32 = vmax.f32 %v3200_v4, %v3201_v6 }
0x17f3   :  { %v3204_v35 = vmul.f32 %v6362_v62, %v3202_v32  ;;  %v3203_v36 = vmul.f32 %v6354_v2, %v3202_v32 }
0x17f5   :  { %v3208_v37 = vsel %vm3087_vm14, %v3204_v35, 0.0  ;;  %v3205_v11 = vsel %vm3087_vm14, %v3203_v36, 0.0 }
0x17f6   :  { %3209 = vadd.xlane.f32.xlu1 %v3208_v37  ;;  %3206 = vadd.xlane.f32.xlu0 %v3205_v11 }
0x187f   :  { %v3210_v20 = vpop.xlane.xlu1 %3209  ;;  %v3207_v29 = vpop.xlane.xlu0 %3206 }
0x1880   :  { %v3212_v17 = vsub.f32 %v3179_v23, %v3210_v20  ;;  %v3211_v39 = vsub.f32 %v3178_v52, %v3207_v29 }
0x1882   :  { %v3215_v25 = vmul.f32 1.442695, %v3212_v17  ;;  %v3213_v28 = vmul.f32 1.442695, %v3211_v39 }
0x1884   :  { %5832 = vpow2.f32 %v3215_v25 }
0x1885   :  { %5834 = vpow2.f32 %v3213_v28 }
0x1891   :  { %v5833_v40 = vpop.eup %5832 }
0x1892   :  { %5594 = vmatpush3.msra.mxu1 %v5833_v40  ;;  %v5835_v14 = vpop.eup %5834 }
0x1893   :  { %5595 = vmatprep.subr.mxu1 %v5891_v26 }
0x1894   :  { %5596 = vmatpush3.msra.mxu1 %v5835_v14 }
0x1895   :  { %5598 = vmatmul.mubr.msk.f32.vlgmr.msra.gmra.mxu1 %vm341_vm4, %v6288_v30  ;;  %5605 = vmatprep.subr.mxu1 %v5891_v26 }
0x1896   :  { %5609 = vmatprep.mubr.msk.f32.mxu1 %vm5896_vm11, %v5891_v26 }
0x1955   :  { %v3283_v21 = vpop.f32.mrf.mxu1 }
0x1956   :  { %5600 = vmatprep.subr.msk.mxu0 %vm3094_vm15, %v3283_v21 }
0x1957   :  { %v5599_v41 = vpop.f32.mrf.mxu1  ;;  %5601 = vmatpush3.msk.msra.mxu0 %vm3094_vm15, %v3283_v21 }
0x1958   :  { %5603 = vmatmul.mubr.msk.f32.vlgmr.msra.gmra.mxu0 %vm3087_vm14, %v6362_v62  ;;  %5612 = vmatprep.subr.mxu0 %v5891_v26 }
0x1959   :  { %5620 = vmatprep.mubr.msk.f32.mxu0 %vm5896_vm11, %v5891_v26  ;;  %5613 = vmatpush3.msra.mxu0 %v6436_v60 }
0x195a   :  { %5614 = vmatprep.subr.mxu0 %v5891_v26 }
0x1a18   :  { %v5604_v46 = vpop.f32.mrf.mxu0 }
0x1a19   :  { %5836 = vrcp.f32 %v5604_v46 }
0x1a1a   :  { %v3356_v54 = vpop.f32.mrf.mxu0 }
0x1a1b   :  { %5838 = vrcp.f32 %v3356_v54 }
0x1a26   :  { %v5837_v59 = vpop.eup %5836 }
0x1a27   :  { %v3368_v63 = vmul.f32 %v5837_v59, %v5833_v40 }
0x1a28   :  { %v5839_v1 = vpop.eup %5838 }
0x1a29   :  { %3376 = vperm.xlu0 %5766, %v3368_v63   ;;  %v3366_v48 = vmul.f32 %v5839_v1, %v5835_v14 }
0x1a2b   :  { %3371 = vperm.xlu1 %5767, %v3366_v48  }
0x1aa4   :  { %v3377_v45 = vpop.permute.xlu0 %3376 }
0x1aa5   :  { %v3380_v31 = vmul.f32 %v6329_v55, %v3377_v45 }
0x1aa6   :  { %v3372_v3 = vpop.permute.xlu1 %3371 }
0x1aa7   :  { %v3379_v8 = vmul.f32 %v3372_v3, %v6333_v56  ;;  %5606 = vmatpush3.msra.mxu1 %v3380_v31 }
0x1aa8   :  { %5607 = vmatprep.subr.mxu1 %v5891_v26 }
0x1aa9   :  { %5608 = vmatpush3.msra.mxu1 %v3379_v8 }
0x1aaa   :  { %5610 = vmatmul.mubr.msk.f32.vlgmr.msra.gmra.mxu1 %vm341_vm4, %v6288_v30  ;;  %5623 = vmatprep.subr.mxu1 %v5891_v26 }
0x1aab   :  { %5624 = vmatpush3.msra.mxu1 %v6403_v0  ;;  %5631 = vmatprep.mubr.msk.f32.mxu1 %vm5896_vm11, %v5891_v26 }
0x1aac   :  { %5625 = vmatprep.subr.mxu1 %v5891_v26 }
0x1aad   :  { %5626 = vmatpush3.msra.mxu1 %v6408_v50 }
0x1aae   :  { %5627 = vmatprep.subr.mxu1 %v5891_v26 }
0x1aaf   :  { %5628 = vmatpush3.msra.mxu1 %v6414_v53 }
0x1ab0   :  { %5629 = vmatprep.subr.mxu1 %v5891_v26 }
0x1ab1   :  { %5630 = vmatpush3.msra.mxu1 %v6418_v24 }
0x1ab2   :  { %5632 = vmatmul.mubr.msk.f32.vlgmr.msra.gmra.mxu1 %vm726_vm0, %v6319_v47  ;;  %5645 = vmatprep.subr.mxu1 %v5891_v26 }
0x1ab3   :  { %5646 = vmatpush3.msra.mxu1 %v6303_v58  ;;  %5653 = vmatprep.mubr.msk.f32.mxu1 %vm5896_vm11, %v5891_v26  ;;  %v6440_v58 = vld [vmem:[#allocation2 + $0x228] sm:$0xff] }
0x1ab4   :  { %5647 = vmatprep.subr.mxu1 %v5891_v26  ;;  %5615 = vmatpush3.msra.mxu0 %v6440_v58 }
0x1ab5   :  { %5648 = vmatpush3.msra.mxu1 %v6305_v42  ;;  %5616 = vmatprep.subr.mxu0 %v5891_v26  ;;  %v6444_v42 = vld [vmem:[#allocation2 + $0x220] sm:$0xff] }
0x1ab6   :  { %5649 = vmatprep.subr.mxu1 %v5891_v26  ;;  %5617 = vmatpush3.msra.mxu0 %v6444_v42 }
0x1ab7   :  { %5650 = vmatpush3.msra.mxu1 %v6311_v43  ;;  %5618 = vmatprep.subr.mxu0 %v5891_v26  ;;  %v6448_v43 = vld [vmem:[#allocation2 + $0x218] sm:$0xff] }
0x1ab8   :  { %5651 = vmatprep.subr.mxu1 %v5891_v26  ;;  %5619 = vmatpush3.msra.mxu0 %v6448_v43 }
0x1ab9   :  { %5652 = vmatpush3.msra.mxu1 %v6315_v44  ;;  %5634 = vmatprep.subr.mxu0 %v5891_v26  ;;  %v6452_v44 = vld [vmem:[#allocation2 + $0x210] ss:$0 sm:$0xff] }
0x1aba   :  { %5661 = vmatprep.subr.mxu1 %v5891_v26 }
0x1b6a   :  { %v3452_v34 = vpop.f32.mrf.mxu1 }
0x1b6b   :  { %v3453_v13 = vadd.f32 %v6452_v44, %v3452_v34 }
0x1b6c   :  { %v5611_v49 = vpop.f32.mrf.mxu1 }
0x1b6d   :  { %v3457_v23 = vmin.f32 %v3453_v13, 0.0  ;;  %vm3456_vm7 = vcmp.gt.f32.partialorder %v3453_v13, 0.0 }
0x1b6f   :  { %v3458_v52 = vmul.f32 1.442695, %v3457_v23 }
0x1b71   :  { %5840 = vpow2.f32 %v3458_v52 }
0x1b72   :  { %v3619_v57 = vpop.f32.mrf.mxu1 }
0x1b73   :  { %v3620_v7 = vadd.f32 %v6455_v5, %v3619_v57 }
0x1b74   :  { %v5633_v61 = vpop.f32.mrf.mxu1 }
0x1b75   :  { %3631 = vrot.lane.b32.xlu1 %v3620_v7, %s5893_s18 }
0x1b7e   :  { %v5841_v9 = vpop.eup %5840 }
0x1b7f   :  { %v4992_v10 = vadd.f32 -1.0, %v5841_v9 }
0x1b81   :  { %v3461_v16 = vsel %vm3456_vm7, %v3453_v13, %v4992_v10 }
0x1b82   :  { %5621 = vmatmul.mubr.msk.f32.vlgmr.msra.gmra.mxu0 %vm726_vm0, %v3461_v16 }
0x1b83   :  { %5635 = vmatpush3.msra.mxu0 %v6259_v22  ;;  %5642 = vmatprep.mubr.msk.f32.mxu0 %vm5896_vm11, %v5891_v26 }
0x1b84   :  { %5636 = vmatprep.subr.mxu0 %v5891_v26 }
0x1b85   :  { %5637 = vmatpush3.msra.mxu0 %v6264_v33 }
0x1b86   :  { %5638 = vmatprep.subr.mxu0 %v5891_v26 }
0x1b87   :  { %5639 = vmatpush3.msra.mxu0 %v6270_v38 }
0x1b88   :  { %5640 = vmatprep.subr.mxu0 %v5891_v26 }
0x1b89   :  { %5641 = vmatpush3.msra.mxu0 %v6276_v15 }
0x1be7   :  { %v3632_v36 = vpop.permute.xlu1 %3631 }
0x1c42   :  { %v3540_v19 = vpop.f32.mrf.mxu0 }
0x1c43   :  { %v3541_v22 = vadd.f32 %v6469_v18, %v3540_v19 }
0x1c44   :  { %v5622_v12 = vpop.f32.mrf.mxu0 }
0x1c45   :  { %v3623_v4 = vadd.f32 %v3620_v7, %v3541_v22 }
0x1c47   :  { %v4997_v6 = vmul.f32 -1.442695, %v3623_v4 }
0x1c49   :  { %5842 = vpow2.f32 %v4997_v6 }
0x1c56   :  { %v5843_v32 = vpop.eup %5842 }
0x1c57   :  { %v3627_v35 = vadd.f32 1.0, %v5843_v32 }
0x1c59   :  { %5844 = vrcp.f32 %v3627_v35 }
0x1c66   :  { %v5845_v33 = vpop.eup %5844 }
0x1c67   :  { %v3634_v37 = vmul.f32 %v5845_v33, %v3632_v36  ;;  %v3641_v29 = vsub.f32 1.0, %v5845_v33 }
0x1c69   :  { %3636 = vrot.lane.b32.xlu0 %v3634_v37, %s5893_s18 }
0x1c6d   :  { %3647 = vrot.lane.b32.xlu0 %v6319_v47, %s5892_s15 }
0x1cdb   :  { %v3637_v38 = vpop.permute.xlu0 %3636 }
0x1cdc   :  { %v3639_v15 = vadd.f32 %v3637_v38, %v3541_v22 }
0x1cde   :  { %5846 = vtanh.f32 %v3639_v15 }
0x1cdf   :  { %v3648_v20 = vpop.permute.xlu0 %3647 }
0x1ce0   :  { %v3650_v39 = vmul.f32 %v5845_v33, %v3648_v20 }
0x1ceb   :  { %v5847_v11 = vpop.eup %5846 }
0x1cec   :  { %3643 = vrot.lane.b32.xlu1 %v5847_v11, %s5894_s19 }
0x1d5e   :  { %v3644_v17 = vpop.permute.xlu1 %3643 }
0x1d5f   :  { %v3646_v25 = vmul.f32 %v3644_v17, %v3641_v29 }
0x1d61   :  { %v6476_v28 = vadd.f32 %v3650_v39, %v3646_v25 }
0x1d63   :  { %v3652_v40 = vmax.f32 %v6476_v28, 0.0  ;;  %v5020_v28 = vld [vmem:[#allocation2 + $0x2a8] ss:$0 sm:$0xff] }
0x1d65   :  { %3654 = vrot.lane.b32.xlu1 %v3652_v40, %s5894_s19 }
0x1dd7   :  { %v6482_v47 = vpop.permute.xlu1 %3654 }
0x1dd8   :  { %5643 = vmatmul.mubr.msk.f32.vlgmr.msra.gmra.mxu0 %vm726_vm0, %v6482_v47 }
0x1dd9   :  { %5658 = vmatprep.mubr.msk.f32.mxu0 %vm3087_vm14, %v6354_v2 }
0x1e98   :  { %v3724_v14 = vpop.f32.mrf.mxu0 }
0x1e99   :  { %5654 = vmatmul.mubr.msk.f32.vlgmr.msra.gmra.mxu1 %vm726_vm0, %v3724_v14 }
0x1e9a   :  { %v5644_v21 = vpop.f32.mrf.mxu0  ;;  %5665 = vmatprep.mubr.msk.f32.mxu1 %vm5896_vm11, %v5891_v26 }
0x1f59   :  { %v3797_v41 = vpop.f32.mrf.mxu1 }
0x1f5a   :  { %3802 = vrot.lane.b32.xlu0 %v3797_v41, %s5895_s20 }
0x1f5b   :  { %v5655_v46 = vpop.f32.mrf.mxu1 }
0x1fcc   :  { %v3803_v54 = vpop.permute.xlu0 %3802 }
0x1fcd   :  { %5656 = vmatprep.subr.msk.mxu0 %vm3094_vm15, %v3803_v54 }
0x1fce   :  { %5657 = vmatpush3.msk.msra.mxu0 %vm3094_vm15, %v3803_v54 }
0x1fcf   :  { %5659 = vmatmul.mubr.msk.f32.vlgmr.msra.gmra.mxu0 %vm3087_vm14, %v6362_v62 }
0x1fd0   :  { %5670 = vmatprep.mubr.msk.f32.mxu0 %vm3087_vm14, %v6354_v2 }
0x208f   :  { %v5660_v59 = vpop.f32.mrf.mxu0 }
0x2090   :  { %v3882_v63 = vadd.f32 %v5660_v59, %v6369_v27 }
0x2091   :  { %v3872_v1 = vpop.f32.mrf.mxu0 }
0x2092   :  { %v3886_v48 = vmul.f32 0.01, %v3882_v63  ;;  %v3881_v45 = vadd.f32 %v3872_v1, %v6371_v51  ;;  %vm3884_vm8 = vcmp.gt.f32.partialorder %v3882_v63, 0.0 }
0x2094   :  { %v3885_v31 = vmul.f32 0.01, %v3881_v45  ;;  %v3888_v3 = vsel %vm3884_vm8, %v3882_v63, %v3886_v48  ;;  %vm3883_vm9 = vcmp.gt.f32.partialorder %v3881_v45, 0.0 }
0x2095   :  { %3896 = vperm.xlu0 %5766, %v3888_v3  }
0x2096   :  { %v3887_v8 = vsel %vm3883_vm9, %v3881_v45, %v3885_v31 }
0x2097   :  { %3891 = vperm.xlu1 %5767, %v3887_v8  }
0x2110   :  { %v3897_v34 = vpop.permute.xlu0 %3896 }
0x2111   :  { %v3900_v13 = vsel %vm3181_vm5, %v3897_v34, -1e+30  ;;  %v4337_v34 = vld [vmem:[#allocation2 + $0x280] sm:$0xff] }
0x2112   :  { %v3892_v49 = vpop.permute.xlu1 %3891  ;;  %v3902_v27 = vsel %vm3087_vm14, %v3900_v13, -inf  ;;  %v4420_v13 = vld [vmem:[#allocation2 + $0x30] sm:$0x3] }
0x2113   :  { %v3899_v23 = vsel %vm3180_vm6, %v3892_v49, -1e+30  ;;  %v4336_v49 = vld [vmem:[#allocation2 + $0x278] sm:$0xff] }
0x2114   :  { %v3901_v52 = vsel %vm3087_vm14, %v3899_v23, -inf  ;;  %v4418_v23 = vld [vmem:[%s6596_s1 + $0x30] sm:$0x3] }
0x2115   :  { %v3903_v51 = vmax.f32 %v3901_v52, %v3902_v27  ;;  %v4335_v27 = vld [vmem:[#allocation2 + $0x270] sm:$0xff]  ;;  %v4334_v52 = vld [vmem:[#allocation2 + $0x268] sm:$0xff] }
0x2117   :  { %v3904_v57 = vrot.slane %v3903_v51, 4 }
0x2119   :  { %v3905_v7 = vmax.f32 %v3903_v51, %v3904_v57 }
0x211b   :  { %v3906_v61 = vrot.slane %v3905_v7, 2 }
0x211d   :  { %v3907_v9 = vmax.f32 %v3905_v7, %v3906_v61 }
0x211f   :  { %v3908_v10 = vrot.slane %v3907_v9, 1 }
0x2121   :  { %v3909_v16 = vmax.f32 %v3907_v9, %v3908_v10 }
0x2123   :  { %v3911_v19 = vmul.f32 %v6362_v62, %v3909_v16  ;;  %v3910_v22 = vmul.f32 %v6354_v2, %v3909_v16 }
0x2125   :  { %v3915_v12 = vsel %vm3087_vm14, %v3911_v19, 0.0  ;;  %v3912_v4 = vsel %vm3087_vm14, %v3910_v22, 0.0 }
0x2126   :  { %3916 = vadd.xlane.f32.xlu1 %v3915_v12  ;;  %3913 = vadd.xlane.f32.xlu0 %v3912_v4  ;;  %v5014_v4 = vld [vmem:[#allocation2 + $0x38] ss:$0 sm:$0xff] }
0x21af   :  { %v3917_v6 = vpop.xlane.xlu1 %3916  ;;  %v3914_v32 = vpop.xlane.xlu0 %3913 }
0x21b0   :  { %v3919_v35 = vsub.f32 %v3888_v3, %v3917_v6  ;;  %v3918_v33 = vsub.f32 %v3887_v8, %v3914_v32 }
0x21b2   :  { %v3922_v36 = vmul.f32 1.442695, %v3919_v35  ;;  %v3920_v37 = vmul.f32 1.442695, %v3918_v33  ;;  %v5019_v35 = vld [vmem:[#allocation2 + $0x2a0] ss:$0 sm:$0xff] }
0x21b4   :  { %5848 = vpow2.f32 %v3922_v36  ;;  %v4532_v36 = vld [vmem:[#allocation2 + $0x2d8] sm:$0x1f] }
0x21b5   :  { %5850 = vpow2.f32 %v3920_v37  ;;  %v4531_v37 = vld [vmem:[#allocation2 + $0x2d0] sm:$0xff] }
0x21c1   :  { %v5849_v38 = vpop.eup %5848 }
0x21c2   :  { %5662 = vmatpush3.msra.mxu1 %v5849_v38  ;;  %v5851_v15 = vpop.eup %5850 }
0x21c3   :  { %5663 = vmatprep.subr.mxu1 %v5891_v26 }
0x21c4   :  { %5664 = vmatpush3.msra.mxu1 %v5851_v15 }
0x21c5   :  { %5666 = vmatmul.mubr.msk.f32.vlgmr.msra.gmra.mxu1 %vm341_vm4, %v6288_v30  ;;  %5673 = vmatprep.subr.mxu1 %v5891_v26 }
0x21c6   :  { %5677 = vmatprep.mubr.msk.f32.mxu1 %vm5896_vm11, %v5891_v26 }
0x2285   :  { %v3990_v2 = vpop.f32.mrf.mxu1 }
0x2286   :  { %5668 = vmatprep.subr.msk.mxu0 %vm3094_vm15, %v3990_v2 }
0x2287   :  { %v5667_v11 = vpop.f32.mrf.mxu1  ;;  %5669 = vmatpush3.msk.msra.mxu0 %vm3094_vm15, %v3990_v2  ;;  %v5024_v2 = vld [vmem:[#allocation2 + $0x2b0] ss:$0 sm:$0xff] }
0x2288   :  { %5671 = vmatmul.mubr.msk.f32.vlgmr.msra.gmra.mxu0 %vm3087_vm14, %v6362_v62  ;;  %5680 = vmatprep.subr.mxu0 %v5891_v26  ;;  %vm4533_vm14 = vcmask 105472   ;;  %v4517_v11 = vld [vmem:[#allocation2 + $0x2c0] sm:$0xff] }
0x2289   :  { %5681 = vmatpush3.msra.mxu0 %v6436_v60  ;;  %5688 = vmatprep.mubr.msk.f32.mxu0 %vm5896_vm11, %v5891_v26 }
0x228a   :  { %5682 = vmatprep.subr.mxu0 %v5891_v26 }
0x228b   :  { %5683 = vmatpush3.msra.mxu0 %v6440_v58 }
0x228c   :  { %5684 = vmatprep.subr.mxu0 %v5891_v26 }
0x228d   :  { %5685 = vmatpush3.msra.mxu0 %v6444_v42 }
0x228e   :  { %5686 = vmatprep.subr.mxu0 %v5891_v26 }
0x228f   :  { %5687 = vmatpush3.msra.mxu0 %v6448_v43 }
0x2290   :  { %5702 = vmatprep.subr.mxu0 %v5891_v26 }
0x2348   :  { %v5672_v62 = vpop.f32.mrf.mxu0 }
0x2349   :  { %5852 = vrcp.f32 %v5672_v62 }
0x234a   :  { %v4063_v60 = vpop.f32.mrf.mxu0 }
0x234b   :  { %5854 = vrcp.f32 %v4063_v60  ;;  %v5025_v60 = vld [vmem:[#allocation2 + $0x2b8] ss:$0 sm:$0xff] }
0x2356   :  { %v5853_v20 = vpop.eup %5852 }
0x2357   :  { %v4075_v29 = vmul.f32 %v5853_v20, %v5849_v38  ;;  %v4504_v38 = vld [vmem:[%s6596_s1 + $0x38] sm:$0x3]  ;;  %v4696_v20 = vld [vmem:[#allocation2 + $0x2e0] sm:$0x7] }
0x2358   :  { %v5855_v17 = vpop.eup %5854  ;;  %v4689_v62 = vmul.f32 %v5024_v2, %v4504_v38 }
0x2359   :  { %4083 = vperm.xlu0 %5766, %v4075_v29   ;;  %v4073_v39 = vmul.f32 %v5855_v17, %v5851_v15  ;;  %v4518_v15 = vld [vmem:[#allocation2 + $0x2c8] sm:$0xff] }
0x235a   :  { %v4695_v29 = vadd.f32 %v5025_v60, %v4689_v62  ;;  %v5012_v17 = vld [vmem:[#allocation2 + $0x288] ss:$0 sm:$0xff] }
0x235b   :  { %4078 = vperm.xlu1 %5767, %v4073_v39  }
0x23d4   :  { %v4084_v58 = vpop.permute.xlu0 %4083 }
0x23d5   :  { %v4087_v25 = vmul.f32 %v6329_v55, %v4084_v58  ;;  %v5017_v58 = vld [vmem:[#allocation2 + $0x290] ss:$0 sm:$0xff] }
0x23d6   :  { %v4079_v42 = vpop.permute.xlu1 %4078 }
0x23d7   :  { %v4086_v14 = vmul.f32 %v4079_v42, %v6333_v56  ;;  %5674 = vmatpush3.msra.mxu1 %v4087_v25  ;;  %v5018_v42 = vld [vmem:[#allocation2 + $0x298] ss:$0 sm:$0xff] }
0x23d8   :  { %5675 = vmatprep.subr.mxu1 %v5891_v26 }
0x23d9   :  { %5676 = vmatpush3.msra.mxu1 %v4086_v14 }
0x23da   :  { %5678 = vmatmul.mubr.msk.f32.vlgmr.msra.gmra.mxu1 %vm341_vm4, %v6288_v30  ;;  %5691 = vmatprep.subr.mxu1 %v5891_v26 }
0x23db   :  { %5692 = vmatpush3.msra.mxu1 %v6403_v0  ;;  %5699 = vmatprep.mubr.msk.f32.mxu1 %vm5896_vm11, %v5891_v26 }
0x23dc   :  { %5693 = vmatprep.subr.mxu1 %v5891_v26 }
0x23dd   :  { %5694 = vmatpush3.msra.mxu1 %v6408_v50 }
0x23de   :  { %5695 = vmatprep.subr.mxu1 %v5891_v26 }
0x23df   :  { %5696 = vmatpush3.msra.mxu1 %v6414_v53 }
0x23e0   :  { %5697 = vmatprep.subr.mxu1 %v5891_v26 }
0x23e1   :  { %5698 = vmatpush3.msra.mxu1 %v6418_v24 }
0x23e2   :  { %5700 = vmatmul.mubr.msk.f32.vlgmr.msra.gmra.mxu1 %vm726_vm0, %v6482_v47  ;;  %5713 = vmatprep.subr.mxu1 %v5891_v26 }
0x23e3   :  { %5717 = vmatprep.mubr.msk.f32.mxu1 %vm5896_vm11, %v5891_v26  ;;  %5714 = vmatpush3.msk.msra.mxu1 %vm3094_vm15, %v4420_v13  ;;  %vm4697_vm15 = vcmask 23552  }
0x23e4   :  { %5715 = vmatprep.subr.mxu1 %v5891_v26 }
0x249a   :  { %v4154_v30 = vpop.f32.mrf.mxu1 }
0x249b   :  { %v4155_v55 = vadd.f32 %v6452_v44, %v4154_v30 }
0x249c   :  { %v5679_v56 = vpop.f32.mrf.mxu1 }
0x249d   :  { %v4159_v0 = vmin.f32 %v4155_v55, 0.0  ;;  %vm4158_vm10 = vcmp.gt.f32.partialorder %v4155_v55, 0.0 }
0x249f   :  { %v4160_v50 = vmul.f32 1.442695, %v4159_v0 }
0x24a1   :  { %5856 = vpow2.f32 %v4160_v50 }
0x24a2   :  { %v4303_v53 = vpop.f32.mrf.mxu1 }
0x24a3   :  { %v4304_v43 = vadd.f32 %v6455_v5, %v4303_v53 }
0x24a4   :  { %v5701_v21 = vpop.f32.mrf.mxu1 }
0x24a5   :  { %4315 = vrot.lane.b32.xlu1 %v4304_v43, %s5893_s18  ;;  %v4783_v21 = vld [vmem:[#allocation2 + $0x2f0] sm:$0xff] }
0x24ae   :  { %v5857_v24 = vpop.eup %5856 }
0x24af   :  { %v5008_v47 = vadd.f32 -1.0, %v5857_v24 }
0x24b1   :  { %v4163_v41 = vsel %vm4158_vm10, %v4155_v55, %v5008_v47 }
0x24b2   :  { %5689 = vmatmul.mubr.msk.f32.vlgmr.msra.gmra.mxu0 %vm726_vm0, %v4163_v41 }
0x24b3   :  { %5710 = vmatprep.mubr.msk.f32.mxu0 %vm5896_vm11, %v5891_v26  ;;  %5703 = vmatpush3.msra.mxu0 %v4337_v34 }
0x24b4   :  { %5704 = vmatprep.subr.mxu0 %v5891_v26 }
0x24b5   :  { %5705 = vmatpush3.msra.mxu0 %v4336_v49 }
0x24b6   :  { %5706 = vmatprep.subr.mxu0 %v5891_v26 }
0x24b7   :  { %5707 = vmatpush3.msra.mxu0 %v4335_v27 }
0x24b8   :  { %5708 = vmatprep.subr.mxu0 %v5891_v26 }
0x24b9   :  { %5709 = vmatpush3.msra.mxu0 %v4334_v52 }
0x24ba   :  { %5727 = vmatprep.subr.mxu0 %v5891_v26 }
0x2517   :  { %v4316_v45 = vpop.permute.xlu1 %4315 }
0x2572   :  { %v4233_v44 = vpop.f32.mrf.mxu0 }
0x2573   :  { %v4234_v46 = vadd.f32 %v6469_v18, %v4233_v44  ;;  %v4419_v18 = vld [vmem:[#allocation2 + $0x28] sm:$0xff] }
0x2574   :  { %v5690_v54 = vpop.f32.mrf.mxu0  ;;  %5716 = vmatpush3.msra.mxu1 %v4419_v18  ;;  %v5028_v44 = vld [vmem:[#allocation2 + $0x2e8] ss:$0 sm:$0xff] }
0x2575   :  { %v4307_v59 = vadd.f32 %v4304_v43, %v4234_v46  ;;  %5718 = vmatmul.mubr.msk.f32.vlgmr.msra.gmra.mxu1 %vm4426_vm12, %v4418_v23  ;;  %5720 = vmatprep.subr.mxu1 %v5891_v26  ;;  %v4784_v43 = vld [vmem:[#allocation2 + $0x2f8] sm:$0xff] }
0x2576   :  { %5724 = vmatprep.mubr.msk.f32.mxu1 %vm5896_vm11, %v5891_v26  ;;  %5721 = vmatpush3.msk.msra.mxu1 %vm4537_vm13, %v4532_v36 }
0x2577   :  { %v5011_v63 = vmul.f32 -1.442695, %v4307_v59  ;;  %5722 = vmatprep.subr.mxu1 %v5891_v26 }
0x2578   :  { %5723 = vmatpush3.msra.mxu1 %v4531_v37 }
0x2579   :  { %5858 = vpow2.f32 %v5011_v63  ;;  %5734 = vmatprep.subr.mxu1 %v5891_v26  ;;  %v5029_v63 = vld [vmem:[#allocation2 + $0x300] ss:$0 sm:$0xff] }
0x2586   :  { %v5859_v5 = vpop.eup %5858 }
0x2587   :  { %v4311_v1 = vadd.f32 1.0, %v5859_v5 }
0x2589   :  { %5860 = vrcp.f32 %v4311_v1 }
0x2596   :  { %v5861_v48 = vpop.eup %5860 }
0x2597   :  { %v4318_v31 = vmul.f32 %v5861_v48, %v4316_v45  ;;  %v4325_v57 = vsub.f32 1.0, %v5861_v48  ;;  %v4331_v61 = vmul.f32 %v5861_v48, %v3652_v40 }
0x2599   :  { %4320 = vrot.lane.b32.xlu0 %v4318_v31, %s5893_s18 }
0x260b   :  { %v4321_v3 = vpop.permute.xlu0 %4320 }
0x260c   :  { %v4323_v8 = vadd.f32 %v4321_v3, %v4234_v46 }
0x260e   :  { %5862 = vtanh.f32 %v4323_v8 }
0x261b   :  { %v5863_v51 = vpop.eup %5862 }
0x261c   :  { %4327 = vrot.lane.b32.xlu1 %v5863_v51, %s5894_s19 }
0x2635   :  { %v4499_v19 = vpop.f32.mrf.mxu1 }
0x2636   :  { %v4500_v6 = vadd.f32 %v5014_v4, %v4499_v19 }
0x2637   :  { %v5719_v22 = vpop.f32.mrf.mxu1 }
0x2638   :  { %v4503_v32 = vmax.f32 %v4500_v6, 0.0 }
0x263a   :  { %v4524_v33 = vmul.f32 %v5019_v35, %v4503_v32 }
0x263c   :  { %v4530_v40 = vadd.f32 %v5020_v28, %v4524_v33 }
0x263e   :  { %5725 = vmatmul.mubr.msk.f32.vlgmr.msra.gmra.mxu1 %vm4533_vm14, %v4530_v40 }
0x263f   :  { %5736 = vmatprep.mubr.msk.f32.mxu1 %vm5896_vm11, %v5891_v26 }
0x268e   :  { %v4328_v7 = vpop.permute.xlu1 %4327 }
0x268f   :  { %v4330_v9 = vmul.f32 %v4328_v7, %v4325_v57 }
0x2691   :  { %v4332_v10 = vadd.f32 %v4331_v61, %v4330_v9 }
0x2693   :  { %v4333_v16 = vmax.f32 %v4332_v10, 0.0 }
0x2695   :  { %4344 = vrot.lane.b32.xlu0 %v4333_v16, %s5894_s19 }
0x26fe   :  { %v4607_v56 = vpop.f32.mrf.mxu1 }
0x2700   :  { %v5726_v0 = vpop.f32.mrf.mxu1 }
0x2707   :  { %v4345_v12 = vpop.permute.xlu0 %4344 }
0x2708   :  { %5711 = vmatmul.mubr.msk.f32.vlgmr.msra.gmra.mxu0 %vm726_vm0, %v4345_v12  ;;  %vm4701_vm0 = vcmask 1042432  }
0x2709   :  { %5731 = vmatprep.mubr.msk.f32.mxu0 %vm5896_vm11, %v5891_v26  ;;  %5728 = vmatpush3.msra.mxu0 %v4518_v15 }
0x270a   :  { %5729 = vmatprep.subr.mxu0 %v5891_v26  ;;  %5735 = vmatpush3.msk.msra.mxu1 %vm4701_vm0, %v4696_v20 }
0x270b   :  { %5730 = vmatpush3.msra.mxu0 %v4517_v11  ;;  %5737 = vmatmul.mubr.msk.f32.vlgmr.msra.gmra.mxu1 %vm4697_vm15, %v4695_v29 }
0x270c   :  { %5739 = vmatprep.subr.mxu0 %v5891_v26 }
0x27c8   :  { %v4414_v39 = vpop.f32.mrf.mxu0 }
0x27c9   :  { %v4415_v25 = vadd.f32 %v5012_v17, %v4414_v39 }
0x27ca   :  { %v5712_v14 = vpop.f32.mrf.mxu0 }
0x27cb   :  { %v4510_v30 = vmul.f32 %v5017_v58, %v4415_v25  ;;  %v4771_v50 = vpop.f32.mrf.mxu1 }
0x27cd   :  { %v4516_v55 = vadd.f32 %v5018_v42, %v4510_v30  ;;  %v5738_v53 = vpop.f32.mrf.mxu1 }
0x27cf   :  { %5732 = vmatmul.mubr.msk.f32.vlgmr.msra.gmra.mxu0 %vm341_vm4, %v4516_v55 }
0x27d0   :  { %5743 = vmatprep.mubr.msk.f32.mxu0 %vm5896_vm11, %v5891_v26  ;;  %5740 = vmatpush3.msra.mxu0 %v4784_v43  ;;  %vm4863_vm11 = vcmask 1024  }
0x27d1   :  { %5741 = vmatprep.subr.mxu0 %v5891_v26 }
0x27d2   :  { %5742 = vmatpush3.msra.mxu0 %v4783_v21 }
0x288f   :  { %v4680_v24 = vpop.f32.mrf.mxu0 }
0x2890   :  { %v4681_v47 = vadd.f32 %v4680_v24, %v4607_v56 }
0x2891   :  { %v5733_v41 = vpop.f32.mrf.mxu0 }
0x2892   :  { %v4775_v46 = vadd.f32 %v4771_v50, %v4681_v47 }
0x2894   :  { %v4781_v54 = vadd.f32 %v5028_v44, %v4775_v46 }
0x2896   :  { %v4782_v59 = vmax.f32 %v4781_v54, 0.0 }
0x2898   :  { %5744 = vmatmul.mubr.msk.f32.vlgmr.msra.gmra.mxu0 %vm341_vm4, %v4782_v59 }
0x2958   :  { %v4859_v5 = vpop.f32.mrf.mxu0 }
0x2959   :  { %v4860_v1 = vadd.f32 %v5029_v63, %v4859_v5 }
0x295a   :  { %v5745_v48 = vpop.f32.mrf.mxu0 }
0x295b   :  { %4864 = vst.msk [vmem:[%s6599_s4] sm:$0x3] %vm4863_vm11, %v4860_v1 }
0x295c   :  { %4869 = vsyncpa [#allocation3], 1 }

</bundles_post_ra>
